<compile_context>
chip_gen: v6e
topology: v6e:2x2x1
jax: 0.10.0
libtpu: 0.0.40
codegen_flags: <defaults>
</compile_context>

<pallas_src>
import functools

import jax
import jax.numpy as jnp
from jax.experimental import pallas as pl
from jax.experimental.pallas import tpu as pltpu

EPS = 1e-6                       # every LayerNorm in the module uses eps=1e-6
KSIZE = 7                        # conv kernel size hardcoded in the module
MATMUL_DTYPE = jnp.bfloat16      # MXU operand dtype (weights + casted acts)
GELU_TANH_APPROX = True          # tanh-GELU (EUP) instead of exact erf (VPU)
HALF_PI = 1.5707963267948966
PI = 3.141592653589793


def _round_up(n, m):
    return ((n + m - 1) // m) * m


def _default_vmem_limit():
    # Scoped-VMEM budget derived from the hardware generation.
    try:
        info = pltpu.get_tpu_info()
        cap = int(getattr(info, "vmem_capacity_bytes", 128 * 1024 * 1024))
    except Exception:
        cap = 64 * 1024 * 1024
    return max(32 * 1024 * 1024, min(64 * 1024 * 1024, cap // 2))


VMEM_LIMIT = _default_vmem_limit()


# ---------------------------------------------------------------------------
# In-kernel helpers
# ---------------------------------------------------------------------------
def _layernorm(x, g, b):
    # x: (T, C) float32, g/b: (1, C); LayerNorm over the last dim, eps=1e-6.
    mean = jnp.mean(x, axis=-1, keepdims=True)
    xc = x - mean
    var = jnp.mean(xc * xc, axis=-1, keepdims=True)
    inv = jax.lax.rsqrt(var + EPS)
    return xc * inv * g + b


def _layernorm_na(x):
    # Non-affine LayerNorm: the (g, b) affine has been folded into pwconv1.
    mean = jnp.mean(x, axis=-1, keepdims=True)
    xc = x - mean
    var = jnp.mean(xc * xc, axis=-1, keepdims=True)
    return xc * jax.lax.rsqrt(var + EPS)


def _erf(x):
    # Abramowitz & Stegun 7.1.26, |err| <= 1.5e-7 (exact-GELU fallback path).
    a1, a2, a3, a4, a5 = (0.254829592, -0.284496736, 1.421413741,
                          -1.453152027, 1.061405429)
    p = 0.3275911
    ax = jnp.abs(x)
    t = 1.0 / (1.0 + p * ax)
    poly = ((((a5 * t + a4) * t + a3) * t + a2) * t + a1) * t
    y = 1.0 - poly * jnp.exp(-ax * ax)
    return jnp.where(x >= 0.0, y, -y)


def _gelu(x):
    if GELU_TANH_APPROX:
        # tanh-form GELU: ~5 VPU ops + 1 EUP op (tanh) on the widest tensor;
        # differences vs PyTorch's exact erf GELU are below bf16-weight noise.
        c0 = 0.7978845608028654   # sqrt(2/pi)
        return 0.5 * x * (1.0 + jnp.tanh(c0 * (x + 0.044715 * x * x * x)))
    return 0.5 * x * (1.0 + _erf(x * 0.7071067811865476))


def _atan01(t):
    # Minimax polynomial for atan(t), t in [0, 1]; |err| ~ 1e-5 rad.
    t2 = t * t
    p = -0.0117212
    p = p * t2 + 0.05265332
    p = p * t2 - 0.11643287
    p = p * t2 + 0.19354346
    p = p * t2 - 0.33262347
    p = p * t2 + 0.99997726
    return t * p


def _atan2(y, x):
    # Quadrant-corrected atan2 via range reduction to [0, 1].
    # atan2(0, 0) -> 0, matching torch.atan2.
    ax = jnp.abs(x)
    ay = jnp.abs(y)
    mx = jnp.maximum(ax, ay)
    mn = jnp.minimum(ax, ay)
    t = mn / jnp.maximum(mx, 1e-30)
    r = _atan01(t)
    r = jnp.where(ay > ax, HALF_PI - r, r)
    r = jnp.where(x < 0.0, PI - r, r)
    return jnp.where(y < 0.0, -r, r)


def _dwconv_same(x, dww, dwb, *, T, K):
    # Depthwise "same" conv (kernel K, zero padding) along the time axis of a
    # resident (T, C) slab.  pltpu.roll follows the jnp.roll convention
    # out[t] = x[(t - shift) % T], so shift = (-s) % T gives out[t] = x[t+s].
    # Boundary validity is a (T, 1) column mask (compares stay lane-narrow).
    pad = (K - 1) // 2
    row = jax.lax.broadcasted_iota(jnp.int32, (T, 1), 0)
    acc = x * dww[pad, :]                              # center tap (shift 0)
    for k in range(K):
        if k == pad:
            continue
        s = k - pad                                    # want x[t + s]
        shifted = pltpu.roll(x, shift=(-s) % T, axis=0)
        valid = (row >= -s) & (row < T - s)            # (T, 1) zero-pad mask
        acc = acc + jnp.where(valid, shifted, 0.0) * dww[k, :]
    return acc + dwb


def _convnext_branch(x, dww, dwb, w1, b1, w2, b2, *, T, K):
    # x: (T, C) float32 block input (== residual).  LN affine is folded into
    # (w1, b1); layer-scale gamma is folded into (w2, b2).
    y = _dwconv_same(x, dww, dwb, T=T, K=K)
    y = _layernorm_na(y)
    h = jnp.dot(y.astype(w1.dtype), w1,
                preferred_element_type=jnp.float32) + b1
    h = _gelu(h)
    z = jnp.dot(h.astype(w2.dtype), w2,
                preferred_element_type=jnp.float32) + b2
    return x + z


# ---------------------------------------------------------------------------
# Kernel 1: both conv_pre's (im2col matmul) + pre LayerNorms, one launch
# ---------------------------------------------------------------------------
def pre_kernel(xm_ref, xp_ref,
               wm_ref, bm_ref, gm_ref, betam_ref,
               wp_ref, bp_ref, gp_ref, betap_ref,
               om_ref, op_ref):
    ym = jnp.dot(xm_ref[0], wm_ref[...],
                 preferred_element_type=jnp.float32) + bm_ref[...]
    om_ref[0] = _layernorm(ym, gm_ref[...], betam_ref[...]).astype(om_ref.dtype)
    yp = jnp.dot(xp_ref[0], wp_ref[...],
                 preferred_element_type=jnp.float32) + bp_ref[...]
    op_ref[0] = _layernorm(yp, gp_ref[...], betap_ref[...]).astype(op_ref.dtype)


def _im2col(x_btf, K, kf_pad):
    # (B, T, F) -> (B, T, kf_pad), column order k*F + f ("same" zero padding
    # along T, zero lane padding up to kf_pad which is a multiple of 128).
    # For PyTorch conv weights use w.permute(2, 1, 0).reshape(K * F, C).
    # TODO(synk): build these columns in-kernel (rolls along T) if n_freq is
    # ever large; at n_freq=33 the HBM cost of this wrapper pass is negligible.
    B, T, F = x_btf.shape
    pad = (K - 1) // 2
    xp = jnp.pad(x_btf, ((0, 0), (pad, pad), (0, 0)))
    cols = jnp.concatenate([xp[:, k:k + T, :] for k in range(K)], axis=-1)
    if kf_pad > K * F:
        cols = jnp.pad(cols, ((0, 0), (0, 0), (0, kf_pad - K * F)))
    return cols.astype(MATMUL_DTYPE)


def conv_pre_ln(mag_btf, pha_btf, p_mag, p_pha):
    B, T, _ = mag_btf.shape
    kf_pad, C = p_mag["w"].shape
    xm_cols = _im2col(mag_btf, KSIZE, kf_pad)
    xp_cols = _im2col(pha_btf, KSIZE, kf_pad)
    cols = pl.BlockSpec((1, T, kf_pad), lambda b: (b, 0, 0))
    wsp = pl.BlockSpec((kf_pad, C), lambda b: (0, 0))
    vc = pl.BlockSpec((1, C), lambda b: (0, 0))
    btc = pl.BlockSpec((1, T, C), lambda b: (b, 0, 0))
    return pl.pallas_call(
        pre_kernel,
        out_shape=(jax.ShapeDtypeStruct((B, T, C), jnp.float32),
                   jax.ShapeDtypeStruct((B, T, C), jnp.float32)),
        grid=(B,),
        in_specs=[cols, cols, wsp, vc, vc, vc, wsp, vc, vc, vc],
        out_specs=(btc, btc),
        compiler_params=pltpu.CompilerParams(
            dimension_semantics=("parallel",),
            vmem_limit_bytes=VMEM_LIMIT),
    )(xm_cols, xp_cols,
      p_mag["w"], p_mag["b"], p_mag["ln_g"], p_mag["ln_b"],
      p_pha["w"], p_pha["b"], p_pha["ln_g"], p_pha["ln_b"])


# ---------------------------------------------------------------------------
# Kernel 2: ALL ConvNeXt layers fused into one launch.
#   grid = (B, L): B is "parallel" (megacore), L is "arbitrary" (sequential).
#   The x_mag / x_pha residual streams live in the revisited output VMEM
#   buffers across the whole L axis; only the ~per-layer weights are streamed
#   (double-buffered over L, so the next layer's weights prefetch for free).
# ---------------------------------------------------------------------------
def layers_kernel(xm_in_ref, xp_in_ref,
                  mdw_ref, mdb_ref, mw1_ref, mb1_ref, mw2_ref, mb2_ref,
                  pdw_ref, pdb_ref, pw1_ref, pb1_ref, pw2_ref, pb2_ref,
                  om_ref, op_ref, *, T, K):
    layer = pl.program_id(1)

    @pl.when(layer == 0)
    def _():
        om_ref[0] = xm_in_ref[0]
        op_ref[0] = xp_in_ref[0]

    xm = om_ref[0] + op_ref[0]        # x_mag = x_mag + x_pha
    xp = op_ref[0] + xm               # x_pha = x_pha + (new) x_mag
    om_ref[0] = _convnext_branch(
        xm, mdw_ref[0], mdb_ref[0], mw1_ref[0], mb1_ref[0],
        mw2_ref[0], mb2_ref[0], T=T, K=K).astype(om_ref.dtype)
    op_ref[0] = _convnext_branch(
        xp, pdw_ref[0], pdb_ref[0], pw1_ref[0], pb1_ref[0],
        pw2_ref[0], pb2_ref[0], T=T, K=K).astype(op_ref.dtype)


def convnext_stack(x_mag, x_pha, pm, pp):
    # pm / pp hold layer-stacked (L, ...) parameters for the mag / pha blocks.
    B, T, C = x_mag.shape
    L, K, _ = pm["dw_w"].shape
    H = pm["w1"].shape[-1]
    btc = pl.BlockSpec((1, T, C), lambda b, l: (b, 0, 0))

    def lspec(shape):
        return pl.BlockSpec((1,) + shape, lambda b, l: (l, 0, 0))

    branch_specs = [lspec((K, C)), lspec((1, C)), lspec((C, H)),
                    lspec((1, H)), lspec((H, C)), lspec((1, C))]

    def branch_args(p):
        return (p["dw_w"], p["dw_b"], p["w1"], p["b1"], p["w2"], p["b2"])

    # TODO(synk): for very long T at C=512 on v7x, add a T-tile grid axis with
    # a 3-row halo per layer (conflicts with full-stack VMEM residency here).
    return pl.pallas_call(
        functools.partial(layers_kernel, T=T, K=K),
        out_shape=(jax.ShapeDtypeStruct((B, T, C), jnp.float32),
                   jax.ShapeDtypeStruct((B, T, C), jnp.float32)),
        grid=(B, L),
        in_specs=[btc, btc] + branch_specs + branch_specs,
        out_specs=(btc, btc),
        compiler_params=pltpu.CompilerParams(
            dimension_semantics=("parallel", "arbitrary"),
            vmem_limit_bytes=VMEM_LIMIT),
    )(x_mag, x_pha, *branch_args(pm), *branch_args(pp))


# ---------------------------------------------------------------------------
# Kernel 3: post LayerNorms + lane-dense output heads + full epilogue
#   (mag residual, in-kernel atan2, exp / cos / sin).
# ---------------------------------------------------------------------------
def post_kernel(xm_ref, xp_ref, magnb_ref,
                gm_ref, bm_ref, gp_ref, bp_ref,
                wmag_ref, bmag_ref, wri_ref, bri_ref,
                mag_ref, pha_ref, comr_ref, comi_ref, *, Fp):
    xm = _layernorm(xm_ref[0], gm_ref[...], bm_ref[...])
    xp = _layernorm(xp_ref[0], gp_ref[...], bp_ref[...])
    mag = (magnb_ref[0]
           + jnp.dot(xm.astype(wmag_ref.dtype), wmag_ref[...],
                     preferred_element_type=jnp.float32)
           + bmag_ref[...])
    ri = (jnp.dot(xp.astype(wri_ref.dtype), wri_ref[...],
                  preferred_element_type=jnp.float32) + bri_ref[...])
    re = ri[:, :Fp]                        # 128-aligned lane slices
    im = ri[:, Fp:]
    # cos(atan2(im, re)) == re * rsqrt(re^2 + im^2) (exact); the zero-norm
    # case matches torch.atan2(0, 0) = 0 -> cos = 1, sin = 0.
    norm2 = re * re + im * im
    pos = norm2 > 0.0
    inv = jnp.where(pos, jax.lax.rsqrt(norm2), 0.0)
    cosv = jnp.where(pos, re * inv, 1.0)
    sinv = im * inv
    e = jnp.exp(mag)
    mag_ref[0] = mag.astype(mag_ref.dtype)
    pha_ref[0] = _atan2(im, re).astype(pha_ref.dtype)
    comr_ref[0] = (e * cosv).astype(comr_ref.dtype)
    comi_ref[0] = (e * sinv).astype(comi_ref.dtype)


def post_heads(x_mag, x_pha, mag_btf_pad, p):
    B, T, C = x_mag.shape
    Fp = p["w_mag"].shape[-1]
    btc = pl.BlockSpec((1, T, C), lambda b: (b, 0, 0))
    btf = pl.BlockSpec((1, T, Fp), lambda b: (b, 0, 0))
    vc = pl.BlockSpec((1, C), lambda b: (0, 0))
    vf = pl.BlockSpec((1, Fp), lambda b: (0, 0))
    v2f = pl.BlockSpec((1, 2 * Fp), lambda b: (0, 0))
    wm = pl.BlockSpec((C, Fp), lambda b: (0, 0))
    wri = pl.BlockSpec((C, 2 * Fp), lambda b: (0, 0))
    # TODO(synk): optionally transpose in-kernel and emit (B, Fp, T) directly;
    # kept (B, T, Fp) here to preserve lane-dense stores for arbitrary T.
    return pl.pallas_call(
        functools.partial(post_kernel, Fp=Fp),
        out_shape=tuple(jax.ShapeDtypeStruct((B, T, Fp), jnp.float32)
                        for _ in range(4)),
        grid=(B,),
        in_specs=[btc, btc, btf, vc, vc, vc, vc, wm, vf, wri, v2f],
        out_specs=tuple(btf for _ in range(4)),
        compiler_params=pltpu.CompilerParams(
            dimension_semantics=("parallel",),
            vmem_limit_bytes=VMEM_LIMIT),
    )(x_mag, x_pha, mag_btf_pad,
      p["ln_g_mag"], p["ln_b_mag"], p["ln_g_pha"], p["ln_b_pha"],
      p["w_mag"], p["b_mag"], p["w_ri"], p["b_ri"])


# ---------------------------------------------------------------------------
# Parameter initialization (mirrors the module __init__ shapes / init scheme)
# with the LN-affine / gamma folds applied at prep time.
# ---------------------------------------------------------------------------
def trunc_normal(key, shape, std=0.02):
    return std * jax.random.truncated_normal(key, -2.0, 2.0, shape, jnp.float32)


def init_params(key, n_freq, C, n_layers, K=KSIZE):
    Fp = _round_up(n_freq, 128)          # lane-dense head width
    KFp = _round_up(K * n_freq, 128)     # padded im2col contraction dim
    keys = iter(jax.random.split(key, 8 * n_layers + 16))
    ones_c = jnp.ones((1, C), jnp.float32)
    zeros_c = jnp.zeros((1, C), jnp.float32)

    def pre_params():
        w = trunc_normal(next(keys), (K * n_freq, C))          # [k*F + f, c]
        w = jnp.pad(w, ((0, KFp - K * n_freq), (0, 0))).astype(MATMUL_DTYPE)
        return dict(w=w, b=zeros_c, ln_g=ones_c, ln_b=zeros_c)

    def raw_block():
        # Un-folded parameters exactly as in the PyTorch ConvNeXtBlock.
        return dict(
            dw_w=trunc_normal(next(keys), (K, C)),
            dw_b=jnp.zeros((C,), jnp.float32),
            ln_g=jnp.ones((C,), jnp.float32),
            ln_b=jnp.zeros((C,), jnp.float32),
            w1=trunc_normal(next(keys), (C, 3 * C)),
            b1=jnp.zeros((3 * C,), jnp.float32),
            w2=trunc_normal(next(keys), (3 * C, C)),
            b2=jnp.zeros((C,), jnp.float32),
            gamma=jnp.full((C,), 1.0 / n_layers, jnp.float32))

    def fold_block(p):
        # LN affine folded into pwconv1, layer-scale gamma into pwconv2:
        #   (xn*g+b) @ W1 + b1 == xn @ (diag(g) W1) + (b @ W1 + b1)
        #   gamma * (h @ W2 + b2) == h @ (W2 * gamma) + gamma * b2
        w1 = p["ln_g"][:, None] * p["w1"]
        b1 = p["ln_b"] @ p["w1"] + p["b1"]
        w2 = p["w2"] * p["gamma"][None, :]
        b2 = p["b2"] * p["gamma"]
        return dict(dw_w=p["dw_w"], dw_b=p["dw_b"][None, :],
                    w1=w1.astype(MATMUL_DTYPE), b1=b1[None, :],
                    w2=w2.astype(MATMUL_DTYPE), b2=b2[None, :])

    def stack_blocks(blocks):
        return {k: jnp.stack([blk[k] for blk in blocks]) for k in blocks[0]}

    blocks_mag = stack_blocks([fold_block(raw_block()) for _ in range(n_layers)])
    blocks_pha = stack_blocks([fold_block(raw_block()) for _ in range(n_layers)])

    def head_w(k):
        w = trunc_normal(k, (C, n_freq))
        return jnp.pad(w, ((0, 0), (0, Fp - n_freq)))          # zero lane pad

    w_mag = head_w(next(keys))
    w_r = head_w(next(keys))
    w_i = head_w(next(keys))
    post = dict(
        ln_g_mag=ones_c, ln_b_mag=zeros_c,
        ln_g_pha=ones_c, ln_b_pha=zeros_c,
        w_mag=w_mag.astype(MATMUL_DTYPE),
        b_mag=jnp.zeros((1, Fp), jnp.float32),
        w_ri=jnp.concatenate([w_r, w_i], axis=1).astype(MATMUL_DTYPE),
        b_ri=jnp.zeros((1, 2 * Fp), jnp.float32))

    return dict(pre_mag=pre_params(), pre_pha=pre_params(),
                blocks_mag=blocks_mag, blocks_pha=blocks_pha, post=post)


# ---------------------------------------------------------------------------
# Full forward pass (matches APNet_BWE_Model.forward)
# ---------------------------------------------------------------------------
def apnet_bwe_forward(params, mag_nb, pha_nb):
    # mag_nb, pha_nb: (B, n_freq, T)  -- PyTorch NCT layout
    B, F, T = mag_nb.shape
    mag_btf = jnp.transpose(mag_nb, (0, 2, 1))       # (B, T, F)
    pha_btf = jnp.transpose(pha_nb, (0, 2, 1))

    x_mag, x_pha = conv_pre_ln(mag_btf, pha_btf,
                               params["pre_mag"], params["pre_pha"])

    # All ConvNeXt layers in one launch (activations stay resident in VMEM).
    x_mag, x_pha = convnext_stack(x_mag, x_pha,
                                  params["blocks_mag"], params["blocks_pha"])

    Fp = params["post"]["w_mag"].shape[-1]
    mag_btf_pad = jnp.pad(mag_btf, ((0, 0), (0, 0), (0, Fp - F)))
    mag_p, pha_p, cr_p, ci_p = post_heads(x_mag, x_pha, mag_btf_pad,
                                          params["post"])

    # Tiny wrapper-side slice / NTC->NCT transposes on the (B, T, 33) heads.
    mag_wb = jnp.transpose(mag_p[:, :, :F], (0, 2, 1))          # (B, F, T)
    pha_wb = jnp.transpose(pha_p[:, :, :F], (0, 2, 1))
    com_wb = jnp.stack(
        (jnp.transpose(cr_p[:, :, :F], (0, 2, 1)),
         jnp.transpose(ci_p[:, :, :F], (0, 2, 1))), axis=-1)
    return mag_wb, pha_wb, com_wb


if __name__ == "__main__":
    # Small config: n_fft=64 -> n_freq=33, ConvNeXt_channels=64, layers=2
    B, n_freq, T, C, n_layers = 2, 33, 16, 64, 2

    key = jax.random.PRNGKey(0)
    k_param, k_mag, k_pha = jax.random.split(key, 3)
    params = init_params(k_param, n_freq, C, n_layers)

    mag_nb = jax.random.normal(k_mag, (B, n_freq, T), jnp.float32)
    pha_nb = jax.random.uniform(k_pha, (B, n_freq, T), jnp.float32,
                                minval=-3.14159, maxval=3.14159)

    fwd = jax.jit(apnet_bwe_forward)
    mag_wb, pha_wb, com_wb = fwd(params, mag_nb, pha_nb)
    jax.block_until_ready((mag_wb, pha_wb, com_wb))

    assert mag_wb.shape == (B, n_freq, T)
    assert pha_wb.shape == (B, n_freq, T)
    assert com_wb.shape == (B, n_freq, T, 2)
    assert bool(jnp.all(jnp.isfinite(mag_wb)))
    assert bool(jnp.all(jnp.isfinite(pha_wb)))
    assert bool(jnp.all(jnp.isfinite(com_wb)))
    assert bool(jnp.all(jnp.abs(pha_wb) <= PI + 1e-3))
    print("KERNEL_OK")
</pallas_src>

<mosaic_0001>
module attributes {stable_mosaic.version = 11 : i64} {
  func.func @pre_kernel(%arg0: i32, %arg1: memref<1x16x256xbf16, #tpu.memory_space<vmem>>, %arg2: memref<1x16x256xbf16, #tpu.memory_space<vmem>>, %arg3: memref<256x64xbf16, #tpu.memory_space<vmem>>, %arg4: memref<1x64xf32, #tpu.memory_space<vmem>>, %arg5: memref<1x64xf32, #tpu.memory_space<vmem>>, %arg6: memref<1x64xf32, #tpu.memory_space<vmem>>, %arg7: memref<256x64xbf16, #tpu.memory_space<vmem>>, %arg8: memref<1x64xf32, #tpu.memory_space<vmem>>, %arg9: memref<1x64xf32, #tpu.memory_space<vmem>>, %arg10: memref<1x64xf32, #tpu.memory_space<vmem>>, %arg11: memref<1x16x64xf32, #tpu.memory_space<vmem>>, %arg12: memref<1x16x64xf32, #tpu.memory_space<vmem>>) attributes {dimension_semantics = [#tpu.dimension_semantics<parallel>], iteration_bounds = array<i64: 2>, scalar_prefetch = 0 : i64, scratch_operands = 0 : i64, tpu.core_type = #tpu.core_type<tc>, window_params = [{transform_indices = @transform_0, window_bounds = array<i64: 1, 16, 256>}, {transform_indices = @transform_1, window_bounds = array<i64: 1, 16, 256>}, {pipeline_mode = #tpu.pipeline_mode<synchronous>, transform_indices = @transform_2, window_bounds = array<i64: 256, 64>}, {pipeline_mode = #tpu.pipeline_mode<synchronous>, transform_indices = @transform_3, window_bounds = array<i64: 1, 64>}, {pipeline_mode = #tpu.pipeline_mode<synchronous>, transform_indices = @transform_4, window_bounds = array<i64: 1, 64>}, {pipeline_mode = #tpu.pipeline_mode<synchronous>, transform_indices = @transform_5, window_bounds = array<i64: 1, 64>}, {pipeline_mode = #tpu.pipeline_mode<synchronous>, transform_indices = @transform_6, window_bounds = array<i64: 256, 64>}, {pipeline_mode = #tpu.pipeline_mode<synchronous>, transform_indices = @transform_7, window_bounds = array<i64: 1, 64>}, {pipeline_mode = #tpu.pipeline_mode<synchronous>, transform_indices = @transform_8, window_bounds = array<i64: 1, 64>}, {pipeline_mode = #tpu.pipeline_mode<synchronous>, transform_indices = @transform_9, window_bounds = array<i64: 1, 64>}, {transform_indices = @transform_10, window_bounds = array<i64: 1, 16, 64>}, {transform_indices = @transform_11, window_bounds = array<i64: 1, 16, 64>}]} {
    %c0 = arith.constant 0 : index
    %c0_0 = arith.constant 0 : index
    %c0_1 = arith.constant 0 : index
    %0 = vector.load %arg1[%c0, %c0_0, %c0_1] : memref<1x16x256xbf16, #tpu.memory_space<vmem>>, vector<1x16x256xbf16>
    %1 = vector.shape_cast %0 : vector<1x16x256xbf16> to vector<16x256xbf16>
    %c0_2 = arith.constant 0 : index
    %c0_3 = arith.constant 0 : index
    %2 = vector.load %arg3[%c0_2, %c0_3] : memref<256x64xbf16, #tpu.memory_space<vmem>>, vector<256x64xbf16>
    %cst = arith.constant dense<0.000000e+00> : vector<16x64xf32>
    %3 = tpu.matmul %1, %2, %cst {dimension_numbers = #tpu.dot_dimension_numbers<[1], [0], [0], [1], [0, 0, 1, 1], [], []>} : vector<16x256xbf16>, vector<256x64xbf16>, vector<16x64xf32> -> vector<16x64xf32>
    %c0_4 = arith.constant 0 : index
    %c0_5 = arith.constant 0 : index
    %4 = vector.load %arg4[%c0_4, %c0_5] : memref<1x64xf32, #tpu.memory_space<vmem>>, vector<1x64xf32>
    %5 = vector.broadcast %4 : vector<1x64xf32> to vector<16x64xf32>
    %6 = arith.addf %3, %5 : vector<16x64xf32>
    %c0_6 = arith.constant 0 : index
    %c0_7 = arith.constant 0 : index
    %7 = vector.load %arg5[%c0_6, %c0_7] : memref<1x64xf32, #tpu.memory_space<vmem>>, vector<1x64xf32>
    %c0_8 = arith.constant 0 : index
    %c0_9 = arith.constant 0 : index
    %8 = vector.load %arg6[%c0_8, %c0_9] : memref<1x64xf32, #tpu.memory_space<vmem>>, vector<1x64xf32>
    %cst_10 = arith.constant dense<0.000000e+00> : vector<16xf32>
    %9 = vector.multi_reduction <add>, %6, %cst_10 [1] : vector<16x64xf32> to vector<16xf32>
    %10 = vector.shape_cast %9 : vector<16xf32> to vector<16x1xf32>
    %cst_11 = arith.constant 6.400000e+01 : f32
    %11 = vector.broadcast %cst_11 : f32 to vector<16x1xf32>
    %12 = arith.divf %10, %11 : vector<16x1xf32>
    %13 = vector.broadcast %12 : vector<16x1xf32> to vector<16x64xf32>
    %14 = arith.subf %6, %13 : vector<16x64xf32>
    %15 = arith.mulf %14, %14 : vector<16x64xf32>
    %cst_12 = arith.constant dense<0.000000e+00> : vector<16xf32>
    %16 = vector.multi_reduction <add>, %15, %cst_12 [1] : vector<16x64xf32> to vector<16xf32>
    %17 = vector.shape_cast %16 : vector<16xf32> to vector<16x1xf32>
    %cst_13 = arith.constant 6.400000e+01 : f32
    %18 = vector.broadcast %cst_13 : f32 to vector<16x1xf32>
    %19 = arith.divf %17, %18 : vector<16x1xf32>
    %cst_14 = arith.constant 9.99999997E-7 : f32
    %20 = vector.broadcast %cst_14 : f32 to vector<16x1xf32>
    %21 = arith.addf %19, %20 : vector<16x1xf32>
    %22 = math.rsqrt %21 : vector<16x1xf32>
    %23 = vector.broadcast %22 : vector<16x1xf32> to vector<16x64xf32>
    %24 = arith.mulf %14, %23 : vector<16x64xf32>
    %25 = vector.broadcast %7 : vector<1x64xf32> to vector<16x64xf32>
    %26 = arith.mulf %24, %25 : vector<16x64xf32>
    %27 = vector.broadcast %8 : vector<1x64xf32> to vector<16x64xf32>
    %28 = arith.addf %26, %27 : vector<16x64xf32>
    %c0_15 = arith.constant 0 : index
    %c0_16 = arith.constant 0 : index
    %c0_17 = arith.constant 0 : index
    %29 = vector.load %arg11[%c0_15, %c0_16, %c0_17] : memref<1x16x64xf32, #tpu.memory_space<vmem>>, vector<1x16x64xf32>
    %30 = vector.shape_cast %29 : vector<1x16x64xf32> to vector<16x64xf32>
    %31 = vector.shape_cast %28 : vector<16x64xf32> to vector<1x16x64xf32>
    tpu.vector_store %arg11[%c0_15, %c0_16, %c0_17], %31 {strides = array<i32>} : memref<1x16x64xf32, #tpu.memory_space<vmem>>, vector<1x16x64xf32>,
    %c0_18 = arith.constant 0 : index
    %c0_19 = arith.constant 0 : index
    %c0_20 = arith.constant 0 : index
    %32 = vector.load %arg2[%c0_18, %c0_19, %c0_20] : memref<1x16x256xbf16, #tpu.memory_space<vmem>>, vector<1x16x256xbf16>
    %33 = vector.shape_cast %32 : vector<1x16x256xbf16> to vector<16x256xbf16>
    %c0_21 = arith.constant 0 : index
    %c0_22 = arith.constant 0 : index
    %34 = vector.load %arg7[%c0_21, %c0_22] : memref<256x64xbf16, #tpu.memory_space<vmem>>, vector<256x64xbf16>
    %cst_23 = arith.constant dense<0.000000e+00> : vector<16x64xf32>
    %35 = tpu.matmul %33, %34, %cst_23 {dimension_numbers = #tpu.dot_dimension_numbers<[1], [0], [0], [1], [0, 0, 1, 1], [], []>} : vector<16x256xbf16>, vector<256x64xbf16>, vector<16x64xf32> -> vector<16x64xf32>
    %c0_24 = arith.constant 0 : index
    %c0_25 = arith.constant 0 : index
    %36 = vector.load %arg8[%c0_24, %c0_25] : memref<1x64xf32, #tpu.memory_space<vmem>>, vector<1x64xf32>
    %37 = vector.broadcast %36 : vector<1x64xf32> to vector<16x64xf32>
    %38 = arith.addf %35, %37 : vector<16x64xf32>
    %c0_26 = arith.constant 0 : index
    %c0_27 = arith.constant 0 : index
    %39 = vector.load %arg9[%c0_26, %c0_27] : memref<1x64xf32, #tpu.memory_space<vmem>>, vector<1x64xf32>
    %c0_28 = arith.constant 0 : index
    %c0_29 = arith.constant 0 : index
    %40 = vector.load %arg10[%c0_28, %c0_29] : memref<1x64xf32, #tpu.memory_space<vmem>>, vector<1x64xf32>
    %cst_30 = arith.constant dense<0.000000e+00> : vector<16xf32>
    %41 = vector.multi_reduction <add>, %38, %cst_30 [1] : vector<16x64xf32> to vector<16xf32>
    %42 = vector.shape_cast %41 : vector<16xf32> to vector<16x1xf32>
    %cst_31 = arith.constant 6.400000e+01 : f32
    %43 = vector.broadcast %cst_31 : f32 to vector<16x1xf32>
    %44 = arith.divf %42, %43 : vector<16x1xf32>
    %45 = vector.broadcast %44 : vector<16x1xf32> to vector<16x64xf32>
    %46 = arith.subf %38, %45 : vector<16x64xf32>
    %47 = arith.mulf %46, %46 : vector<16x64xf32>
    %cst_32 = arith.constant dense<0.000000e+00> : vector<16xf32>
    %48 = vector.multi_reduction <add>, %47, %cst_32 [1] : vector<16x64xf32> to vector<16xf32>
    %49 = vector.shape_cast %48 : vector<16xf32> to vector<16x1xf32>
    %cst_33 = arith.constant 6.400000e+01 : f32
    %50 = vector.broadcast %cst_33 : f32 to vector<16x1xf32>
    %51 = arith.divf %49, %50 : vector<16x1xf32>
    %cst_34 = arith.constant 9.99999997E-7 : f32
    %52 = vector.broadcast %cst_34 : f32 to vector<16x1xf32>
    %53 = arith.addf %51, %52 : vector<16x1xf32>
    %54 = math.rsqrt %53 : vector<16x1xf32>
    %55 = vector.broadcast %54 : vector<16x1xf32> to vector<16x64xf32>
    %56 = arith.mulf %46, %55 : vector<16x64xf32>
    %57 = vector.broadcast %39 : vector<1x64xf32> to vector<16x64xf32>
    %58 = arith.mulf %56, %57 : vector<16x64xf32>
    %59 = vector.broadcast %40 : vector<1x64xf32> to vector<16x64xf32>
    %60 = arith.addf %58, %59 : vector<16x64xf32>
    %c0_35 = arith.constant 0 : index
    %c0_36 = arith.constant 0 : index
    %c0_37 = arith.constant 0 : index
    %61 = vector.load %arg12[%c0_35, %c0_36, %c0_37] : memref<1x16x64xf32, #tpu.memory_space<vmem>>, vector<1x16x64xf32>
    %62 = vector.shape_cast %61 : vector<1x16x64xf32> to vector<16x64xf32>
    %63 = vector.shape_cast %60 : vector<16x64xf32> to vector<1x16x64xf32>
    tpu.vector_store %arg12[%c0_35, %c0_36, %c0_37], %63 {strides = array<i32>} : memref<1x16x64xf32, #tpu.memory_space<vmem>>, vector<1x16x64xf32>,
    return
  }
  func.func @transform_0(%arg0: i32) -> (i32, i32, i32) {
    %c0_i32 = arith.constant 0 : i32
    %c0_i32_0 = arith.constant 0 : i32
    %c0_i32_1 = arith.constant 0 : i32
    return %arg0, %c0_i32, %c0_i32_0 : i32, i32, i32
  }
  func.func @transform_1(%arg0: i32) -> (i32, i32, i32) {
    %c0_i32 = arith.constant 0 : i32
    %c0_i32_0 = arith.constant 0 : i32
    %c0_i32_1 = arith.constant 0 : i32
    return %arg0, %c0_i32, %c0_i32_0 : i32, i32, i32
  }
  func.func @transform_2(%arg0: i32) -> (i32, i32) {
    %c0_i32 = arith.constant 0 : i32
    %c0_i32_0 = arith.constant 0 : i32
    %c0_i32_1 = arith.constant 0 : i32
    return %c0_i32, %c0_i32_0 : i32, i32
  }
  func.func @transform_3(%arg0: i32) -> (i32, i32) {
    %c0_i32 = arith.constant 0 : i32
    %c0_i32_0 = arith.constant 0 : i32
    %c0_i32_1 = arith.constant 0 : i32
    return %c0_i32, %c0_i32_0 : i32, i32
  }
  func.func @transform_4(%arg0: i32) -> (i32, i32) {
    %c0_i32 = arith.constant 0 : i32
    %c0_i32_0 = arith.constant 0 : i32
    %c0_i32_1 = arith.constant 0 : i32
    return %c0_i32, %c0_i32_0 : i32, i32
  }
  func.func @transform_5(%arg0: i32) -> (i32, i32) {
    %c0_i32 = arith.constant 0 : i32
    %c0_i32_0 = arith.constant 0 : i32
    %c0_i32_1 = arith.constant 0 : i32
    return %c0_i32, %c0_i32_0 : i32, i32
  }
  func.func @transform_6(%arg0: i32) -> (i32, i32) {
    %c0_i32 = arith.constant 0 : i32
    %c0_i32_0 = arith.constant 0 : i32
    %c0_i32_1 = arith.constant 0 : i32
    return %c0_i32, %c0_i32_0 : i32, i32
  }
  func.func @transform_7(%arg0: i32) -> (i32, i32) {
    %c0_i32 = arith.constant 0 : i32
    %c0_i32_0 = arith.constant 0 : i32
    %c0_i32_1 = arith.constant 0 : i32
    return %c0_i32, %c0_i32_0 : i32, i32
  }
  func.func @transform_8(%arg0: i32) -> (i32, i32) {
    %c0_i32 = arith.constant 0 : i32
    %c0_i32_0 = arith.constant 0 : i32
    %c0_i32_1 = arith.constant 0 : i32
    return %c0_i32, %c0_i32_0 : i32, i32
  }
  func.func @transform_9(%arg0: i32) -> (i32, i32) {
    %c0_i32 = arith.constant 0 : i32
    %c0_i32_0 = arith.constant 0 : i32
    %c0_i32_1 = arith.constant 0 : i32
    return %c0_i32, %c0_i32_0 : i32, i32
  }
  func.func @transform_10(%arg0: i32) -> (i32, i32, i32) {
    %c0_i32 = arith.constant 0 : i32
    %c0_i32_0 = arith.constant 0 : i32
    %c0_i32_1 = arith.constant 0 : i32
    return %arg0, %c0_i32, %c0_i32_0 : i32, i32, i32
  }
  func.func @transform_11(%arg0: i32) -> (i32, i32, i32) {
    %c0_i32 = arith.constant 0 : i32
    %c0_i32_0 = arith.constant 0 : i32
    %c0_i32_1 = arith.constant 0 : i32
    return %arg0, %c0_i32, %c0_i32_0 : i32, i32, i32
  }
}

module attributes {stable_mosaic.version = 11 : i64} {
  func.func @layers_kernel(%arg0: i32, %arg1: i32, %arg2: memref<1x16x64xf32, #tpu.memory_space<vmem>>, %arg3: memref<1x16x64xf32, #tpu.memory_space<vmem>>, %arg4: memref<1x7x64xf32, #tpu.memory_space<vmem>>, %arg5: memref<1x1x64xf32, #tpu.memory_space<vmem>>, %arg6: memref<1x64x192xbf16, #tpu.memory_space<vmem>>, %arg7: memref<1x1x192xf32, #tpu.memory_space<vmem>>, %arg8: memref<1x192x64xbf16, #tpu.memory_space<vmem>>, %arg9: memref<1x1x64xf32, #tpu.memory_space<vmem>>, %arg10: memref<1x7x64xf32, #tpu.memory_space<vmem>>, %arg11: memref<1x1x64xf32, #tpu.memory_space<vmem>>, %arg12: memref<1x64x192xbf16, #tpu.memory_space<vmem>>, %arg13: memref<1x1x192xf32, #tpu.memory_space<vmem>>, %arg14: memref<1x192x64xbf16, #tpu.memory_space<vmem>>, %arg15: memref<1x1x64xf32, #tpu.memory_space<vmem>>, %arg16: memref<1x16x64xf32, #tpu.memory_space<vmem>>, %arg17: memref<1x16x64xf32, #tpu.memory_space<vmem>>) attributes {dimension_semantics = [#tpu.dimension_semantics<parallel>, #tpu.dimension_semantics<arbitrary>], iteration_bounds = array<i64: 2, 2>, scalar_prefetch = 0 : i64, scratch_operands = 0 : i64, tpu.core_type = #tpu.core_type<tc>, window_params = [{transform_indices = @transform_0, window_bounds = array<i64: 1, 16, 64>}, {transform_indices = @transform_1, window_bounds = array<i64: 1, 16, 64>}, {transform_indices = @transform_2, window_bounds = array<i64: 1, 7, 64>}, {transform_indices = @transform_3, window_bounds = array<i64: 1, 1, 64>}, {transform_indices = @transform_4, window_bounds = array<i64: 1, 64, 192>}, {transform_indices = @transform_5, window_bounds = array<i64: 1, 1, 192>}, {transform_indices = @transform_6, window_bounds = array<i64: 1, 192, 64>}, {transform_indices = @transform_7, window_bounds = array<i64: 1, 1, 64>}, {transform_indices = @transform_8, window_bounds = array<i64: 1, 7, 64>}, {transform_indices = @transform_9, window_bounds = array<i64: 1, 1, 64>}, {transform_indices = @transform_10, window_bounds = array<i64: 1, 64, 192>}, {transform_indices = @transform_11, window_bounds = array<i64: 1, 1, 192>}, {transform_indices = @transform_12, window_bounds = array<i64: 1, 192, 64>}, {transform_indices = @transform_13, window_bounds = array<i64: 1, 1, 64>}, {transform_indices = @transform_14, window_bounds = array<i64: 1, 16, 64>}, {transform_indices = @transform_15, window_bounds = array<i64: 1, 16, 64>}]} {
    %c0_i32 = arith.constant 0 : i32
    %0 = arith.cmpi eq, %arg1, %c0_i32 : i32
    %1 = arith.extui %0 : i1 to i32
    %c0_i32_0 = arith.constant 0 : i32
    %2 = arith.cmpi ne, %1, %c0_i32_0 : i32
    scf.if %2 {
      %c0_108 = arith.constant 0 : index
      %c0_109 = arith.constant 0 : index
      %c0_110 = arith.constant 0 : index
      %325 = vector.load %arg2[%c0_108, %c0_109, %c0_110] : memref<1x16x64xf32, #tpu.memory_space<vmem>>, vector<1x16x64xf32>
      %326 = vector.shape_cast %325 : vector<1x16x64xf32> to vector<16x64xf32>
      %c0_111 = arith.constant 0 : index
      %c0_112 = arith.constant 0 : index
      %c0_113 = arith.constant 0 : index
      %327 = vector.load %arg16[%c0_111, %c0_112, %c0_113] : memref<1x16x64xf32, #tpu.memory_space<vmem>>, vector<1x16x64xf32>
      %328 = vector.shape_cast %327 : vector<1x16x64xf32> to vector<16x64xf32>
      %329 = vector.shape_cast %326 : vector<16x64xf32> to vector<1x16x64xf32>
      tpu.vector_store %arg16[%c0_111, %c0_112, %c0_113], %329 {strides = array<i32>} : memref<1x16x64xf32, #tpu.memory_space<vmem>>, vector<1x16x64xf32>,
      %c0_114 = arith.constant 0 : index
      %c0_115 = arith.constant 0 : index
      %c0_116 = arith.constant 0 : index
      %330 = vector.load %arg3[%c0_114, %c0_115, %c0_116] : memref<1x16x64xf32, #tpu.memory_space<vmem>>, vector<1x16x64xf32>
      %331 = vector.shape_cast %330 : vector<1x16x64xf32> to vector<16x64xf32>
      %c0_117 = arith.constant 0 : index
      %c0_118 = arith.constant 0 : index
      %c0_119 = arith.constant 0 : index
      %332 = vector.load %arg17[%c0_117, %c0_118, %c0_119] : memref<1x16x64xf32, #tpu.memory_space<vmem>>, vector<1x16x64xf32>
      %333 = vector.shape_cast %332 : vector<1x16x64xf32> to vector<16x64xf32>
      %334 = vector.shape_cast %331 : vector<16x64xf32> to vector<1x16x64xf32>
      tpu.vector_store %arg17[%c0_117, %c0_118, %c0_119], %334 {strides = array<i32>} : memref<1x16x64xf32, #tpu.memory_space<vmem>>, vector<1x16x64xf32>,
    } else {
    }
    %c0 = arith.constant 0 : index
    %c0_1 = arith.constant 0 : index
    %c0_2 = arith.constant 0 : index
    %3 = vector.load %arg16[%c0, %c0_1, %c0_2] : memref<1x16x64xf32, #tpu.memory_space<vmem>>, vector<1x16x64xf32>
    %4 = vector.shape_cast %3 : vector<1x16x64xf32> to vector<16x64xf32>
    %c0_3 = arith.constant 0 : index
    %c0_4 = arith.constant 0 : index
    %c0_5 = arith.constant 0 : index
    %5 = vector.load %arg17[%c0_3, %c0_4, %c0_5] : memref<1x16x64xf32, #tpu.memory_space<vmem>>, vector<1x16x64xf32>
    %6 = vector.shape_cast %5 : vector<1x16x64xf32> to vector<16x64xf32>
    %7 = arith.addf %4, %6 : vector<16x64xf32>
    %c0_6 = arith.constant 0 : index
    %c0_7 = arith.constant 0 : index
    %c0_8 = arith.constant 0 : index
    %8 = vector.load %arg17[%c0_6, %c0_7, %c0_8] : memref<1x16x64xf32, #tpu.memory_space<vmem>>, vector<1x16x64xf32>
    %9 = vector.shape_cast %8 : vector<1x16x64xf32> to vector<16x64xf32>
    %10 = arith.addf %9, %7 : vector<16x64xf32>
    %c0_9 = arith.constant 0 : index
    %c0_10 = arith.constant 0 : index
    %c0_11 = arith.constant 0 : index
    %11 = vector.load %arg4[%c0_9, %c0_10, %c0_11] : memref<1x7x64xf32, #tpu.memory_space<vmem>>, vector<1x7x64xf32>
    %12 = vector.shape_cast %11 : vector<1x7x64xf32> to vector<7x64xf32>
    %c0_12 = arith.constant 0 : index
    %c0_13 = arith.constant 0 : index
    %c0_14 = arith.constant 0 : index
    %13 = vector.load %arg5[%c0_12, %c0_13, %c0_14] : memref<1x1x64xf32, #tpu.memory_space<vmem>>, vector<1x1x64xf32>
    %14 = vector.shape_cast %13 : vector<1x1x64xf32> to vector<1x64xf32>
    %c0_15 = arith.constant 0 : index
    %c0_16 = arith.constant 0 : index
    %c0_17 = arith.constant 0 : index
    %15 = vector.load %arg6[%c0_15, %c0_16, %c0_17] : memref<1x64x192xbf16, #tpu.memory_space<vmem>>, vector<1x64x192xbf16>
    %16 = vector.shape_cast %15 : vector<1x64x192xbf16> to vector<64x192xbf16>
    %c0_18 = arith.constant 0 : index
    %c0_19 = arith.constant 0 : index
    %c0_20 = arith.constant 0 : index
    %17 = vector.load %arg7[%c0_18, %c0_19, %c0_20] : memref<1x1x192xf32, #tpu.memory_space<vmem>>, vector<1x1x192xf32>
    %18 = vector.shape_cast %17 : vector<1x1x192xf32> to vector<1x192xf32>
    %c0_21 = arith.constant 0 : index
    %c0_22 = arith.constant 0 : index
    %c0_23 = arith.constant 0 : index
    %19 = vector.load %arg8[%c0_21, %c0_22, %c0_23] : memref<1x192x64xbf16, #tpu.memory_space<vmem>>, vector<1x192x64xbf16>
    %20 = vector.shape_cast %19 : vector<1x192x64xbf16> to vector<192x64xbf16>
    %c0_24 = arith.constant 0 : index
    %c0_25 = arith.constant 0 : index
    %c0_26 = arith.constant 0 : index
    %21 = vector.load %arg9[%c0_24, %c0_25, %c0_26] : memref<1x1x64xf32, #tpu.memory_space<vmem>>, vector<1x1x64xf32>
    %22 = vector.shape_cast %21 : vector<1x1x64xf32> to vector<1x64xf32>
    %23 = tpu.iota {dimensions = array<i32: 0>} : vector<16x1xi32>
    %24 = vector.extract_strided_slice %12 {offsets = [3, 0], sizes = [1, 64], strides = [1, 1]} : vector<7x64xf32> to vector<1x64xf32>
    %25 = vector.shape_cast %24 : vector<1x64xf32> to vector<64xf32>
    %26 = vector.shape_cast %25 : vector<64xf32> to vector<1x64xf32>
    %27 = vector.broadcast %26 : vector<1x64xf32> to vector<16x64xf32>
    %28 = arith.mulf %7, %27 : vector<16x64xf32>
    %c3_i32 = arith.constant 3 : i32
    %29 = tpu.dynamic_rotate %7 by %c3_i32 dim 0 : vector<16x64xf32>, i32 -> vector<16x64xf32>
    %c3_i32_27 = arith.constant 3 : i32
    %30 = vector.broadcast %c3_i32_27 : i32 to vector<16x1xi32>
    %31 = arith.cmpi sge, %23, %30 : vector<16x1xi32>
    %c19_i32 = arith.constant 19 : i32
    %32 = vector.broadcast %c19_i32 : i32 to vector<16x1xi32>
    %33 = arith.cmpi slt, %23, %32 : vector<16x1xi32>
    %34 = arith.andi %31, %33 : vector<16x1xi1>
    %cst = arith.constant 0.000000e+00 : f32
    %35 = vector.shape_cast %34 : vector<16x1xi1> to vector<16x1xi1>
    %36 = vector.broadcast %35 : vector<16x1xi1> to vector<16x64xi1>
    %37 = vector.broadcast %cst : f32 to vector<16x64xf32>
    %38 = arith.select %36, %29, %37 : vector<16x64xi1>, vector<16x64xf32>
    %39 = vector.extract_strided_slice %12 {offsets = [0, 0], sizes = [1, 64], strides = [1, 1]} : vector<7x64xf32> to vector<1x64xf32>
    %40 = vector.shape_cast %39 : vector<1x64xf32> to vector<64xf32>
    %41 = vector.shape_cast %40 : vector<64xf32> to vector<1x64xf32>
    %42 = vector.broadcast %41 : vector<1x64xf32> to vector<16x64xf32>
    %43 = arith.mulf %38, %42 : vector<16x64xf32>
    %44 = arith.addf %28, %43 : vector<16x64xf32>
    %c2_i32 = arith.constant 2 : i32
    %45 = tpu.dynamic_rotate %7 by %c2_i32 dim 0 : vector<16x64xf32>, i32 -> vector<16x64xf32>
    %c2_i32_28 = arith.constant 2 : i32
    %46 = vector.broadcast %c2_i32_28 : i32 to vector<16x1xi32>
    %47 = arith.cmpi sge, %23, %46 : vector<16x1xi32>
    %c18_i32 = arith.constant 18 : i32
    %48 = vector.broadcast %c18_i32 : i32 to vector<16x1xi32>
    %49 = arith.cmpi slt, %23, %48 : vector<16x1xi32>
    %50 = arith.andi %47, %49 : vector<16x1xi1>
    %cst_29 = arith.constant 0.000000e+00 : f32
    %51 = vector.shape_cast %50 : vector<16x1xi1> to vector<16x1xi1>
    %52 = vector.broadcast %51 : vector<16x1xi1> to vector<16x64xi1>
    %53 = vector.broadcast %cst_29 : f32 to vector<16x64xf32>
    %54 = arith.select %52, %45, %53 : vector<16x64xi1>, vector<16x64xf32>
    %55 = vector.extract_strided_slice %12 {offsets = [1, 0], sizes = [1, 64], strides = [1, 1]} : vector<7x64xf32> to vector<1x64xf32>
    %56 = vector.shape_cast %55 : vector<1x64xf32> to vector<64xf32>
    %57 = vector.shape_cast %56 : vector<64xf32> to vector<1x64xf32>
    %58 = vector.broadcast %57 : vector<1x64xf32> to vector<16x64xf32>
    %59 = arith.mulf %54, %58 : vector<16x64xf32>
    %60 = arith.addf %44, %59 : vector<16x64xf32>
    %c1_i32 = arith.constant 1 : i32
    %61 = tpu.dynamic_rotate %7 by %c1_i32 dim 0 : vector<16x64xf32>, i32 -> vector<16x64xf32>
    %c1_i32_30 = arith.constant 1 : i32
    %62 = vector.broadcast %c1_i32_30 : i32 to vector<16x1xi32>
    %63 = arith.cmpi sge, %23, %62 : vector<16x1xi32>
    %c17_i32 = arith.constant 17 : i32
    %64 = vector.broadcast %c17_i32 : i32 to vector<16x1xi32>
    %65 = arith.cmpi slt, %23, %64 : vector<16x1xi32>
    %66 = arith.andi %63, %65 : vector<16x1xi1>
    %cst_31 = arith.constant 0.000000e+00 : f32
    %67 = vector.shape_cast %66 : vector<16x1xi1> to vector<16x1xi1>
    %68 = vector.broadcast %67 : vector<16x1xi1> to vector<16x64xi1>
    %69 = vector.broadcast %cst_31 : f32 to vector<16x64xf32>
    %70 = arith.select %68, %61, %69 : vector<16x64xi1>, vector<16x64xf32>
    %71 = vector.extract_strided_slice %12 {offsets = [2, 0], sizes = [1, 64], strides = [1, 1]} : vector<7x64xf32> to vector<1x64xf32>
    %72 = vector.shape_cast %71 : vector<1x64xf32> to vector<64xf32>
    %73 = vector.shape_cast %72 : vector<64xf32> to vector<1x64xf32>
    %74 = vector.broadcast %73 : vector<1x64xf32> to vector<16x64xf32>
    %75 = arith.mulf %70, %74 : vector<16x64xf32>
    %76 = arith.addf %60, %75 : vector<16x64xf32>
    %c15_i32 = arith.constant 15 : i32
    %77 = tpu.dynamic_rotate %7 by %c15_i32 dim 0 : vector<16x64xf32>, i32 -> vector<16x64xf32>
    %c-1_i32 = arith.constant -1 : i32
    %78 = vector.broadcast %c-1_i32 : i32 to vector<16x1xi32>
    %79 = arith.cmpi sge, %23, %78 : vector<16x1xi32>
    %c15_i32_32 = arith.constant 15 : i32
    %80 = vector.broadcast %c15_i32_32 : i32 to vector<16x1xi32>
    %81 = arith.cmpi slt, %23, %80 : vector<16x1xi32>
    %82 = arith.andi %79, %81 : vector<16x1xi1>
    %cst_33 = arith.constant 0.000000e+00 : f32
    %83 = vector.shape_cast %82 : vector<16x1xi1> to vector<16x1xi1>
    %84 = vector.broadcast %83 : vector<16x1xi1> to vector<16x64xi1>
    %85 = vector.broadcast %cst_33 : f32 to vector<16x64xf32>
    %86 = arith.select %84, %77, %85 : vector<16x64xi1>, vector<16x64xf32>
    %87 = vector.extract_strided_slice %12 {offsets = [4, 0], sizes = [1, 64], strides = [1, 1]} : vector<7x64xf32> to vector<1x64xf32>
    %88 = vector.shape_cast %87 : vector<1x64xf32> to vector<64xf32>
    %89 = vector.shape_cast %88 : vector<64xf32> to vector<1x64xf32>
    %90 = vector.broadcast %89 : vector<1x64xf32> to vector<16x64xf32>
    %91 = arith.mulf %86, %90 : vector<16x64xf32>
    %92 = arith.addf %76, %91 : vector<16x64xf32>
    %c14_i32 = arith.constant 14 : i32
    %93 = tpu.dynamic_rotate %7 by %c14_i32 dim 0 : vector<16x64xf32>, i32 -> vector<16x64xf32>
    %c-2_i32 = arith.constant -2 : i32
    %94 = vector.broadcast %c-2_i32 : i32 to vector<16x1xi32>
    %95 = arith.cmpi sge, %23, %94 : vector<16x1xi32>
    %c14_i32_34 = arith.constant 14 : i32
    %96 = vector.broadcast %c14_i32_34 : i32 to vector<16x1xi32>
    %97 = arith.cmpi slt, %23, %96 : vector<16x1xi32>
    %98 = arith.andi %95, %97 : vector<16x1xi1>
    %cst_35 = arith.constant 0.000000e+00 : f32
    %99 = vector.shape_cast %98 : vector<16x1xi1> to vector<16x1xi1>
    %100 = vector.broadcast %99 : vector<16x1xi1> to vector<16x64xi1>
    %101 = vector.broadcast %cst_35 : f32 to vector<16x64xf32>
    %102 = arith.select %100, %93, %101 : vector<16x64xi1>, vector<16x64xf32>
    %103 = vector.extract_strided_slice %12 {offsets = [5, 0], sizes = [1, 64], strides = [1, 1]} : vector<7x64xf32> to vector<1x64xf32>
    %104 = vector.shape_cast %103 : vector<1x64xf32> to vector<64xf32>
    %105 = vector.shape_cast %104 : vector<64xf32> to vector<1x64xf32>
    %106 = vector.broadcast %105 : vector<1x64xf32> to vector<16x64xf32>
    %107 = arith.mulf %102, %106 : vector<16x64xf32>
    %108 = arith.addf %92, %107 : vector<16x64xf32>
    %c13_i32 = arith.constant 13 : i32
    %109 = tpu.dynamic_rotate %7 by %c13_i32 dim 0 : vector<16x64xf32>, i32 -> vector<16x64xf32>
    %c-3_i32 = arith.constant -3 : i32
    %110 = vector.broadcast %c-3_i32 : i32 to vector<16x1xi32>
    %111 = arith.cmpi sge, %23, %110 : vector<16x1xi32>
    %c13_i32_36 = arith.constant 13 : i32
    %112 = vector.broadcast %c13_i32_36 : i32 to vector<16x1xi32>
    %113 = arith.cmpi slt, %23, %112 : vector<16x1xi32>
    %114 = arith.andi %111, %113 : vector<16x1xi1>
    %cst_37 = arith.constant 0.000000e+00 : f32
    %115 = vector.shape_cast %114 : vector<16x1xi1> to vector<16x1xi1>
    %116 = vector.broadcast %115 : vector<16x1xi1> to vector<16x64xi1>
    %117 = vector.broadcast %cst_37 : f32 to vector<16x64xf32>
    %118 = arith.select %116, %109, %117 : vector<16x64xi1>, vector<16x64xf32>
    %119 = vector.extract_strided_slice %12 {offsets = [6, 0], sizes = [1, 64], strides = [1, 1]} : vector<7x64xf32> to vector<1x64xf32>
    %120 = vector.shape_cast %119 : vector<1x64xf32> to vector<64xf32>
    %121 = vector.shape_cast %120 : vector<64xf32> to vector<1x64xf32>
    %122 = vector.broadcast %121 : vector<1x64xf32> to vector<16x64xf32>
    %123 = arith.mulf %118, %122 : vector<16x64xf32>
    %124 = arith.addf %108, %123 : vector<16x64xf32>
    %125 = vector.broadcast %14 : vector<1x64xf32> to vector<16x64xf32>
    %126 = arith.addf %124, %125 : vector<16x64xf32>
    %cst_38 = arith.constant dense<0.000000e+00> : vector<16xf32>
    %127 = vector.multi_reduction <add>, %126, %cst_38 [1] : vector<16x64xf32> to vector<16xf32>
    %128 = vector.shape_cast %127 : vector<16xf32> to vector<16x1xf32>
    %cst_39 = arith.constant 6.400000e+01 : f32
    %129 = vector.broadcast %cst_39 : f32 to vector<16x1xf32>
    %130 = arith.divf %128, %129 : vector<16x1xf32>
    %131 = vector.broadcast %130 : vector<16x1xf32> to vector<16x64xf32>
    %132 = arith.subf %126, %131 : vector<16x64xf32>
    %133 = arith.mulf %132, %132 : vector<16x64xf32>
    %cst_40 = arith.constant dense<0.000000e+00> : vector<16xf32>
    %134 = vector.multi_reduction <add>, %133, %cst_40 [1] : vector<16x64xf32> to vector<16xf32>
    %135 = vector.shape_cast %134 : vector<16xf32> to vector<16x1xf32>
    %cst_41 = arith.constant 6.400000e+01 : f32
    %136 = vector.broadcast %cst_41 : f32 to vector<16x1xf32>
    %137 = arith.divf %135, %136 : vector<16x1xf32>
    %cst_42 = arith.constant 9.99999997E-7 : f32
    %138 = vector.broadcast %cst_42 : f32 to vector<16x1xf32>
    %139 = arith.addf %137, %138 : vector<16x1xf32>
    %140 = math.rsqrt %139 : vector<16x1xf32>
    %141 = vector.broadcast %140 : vector<16x1xf32> to vector<16x64xf32>
    %142 = arith.mulf %132, %141 : vector<16x64xf32>
    %143 = arith.truncf %142 : vector<16x64xf32> to vector<16x64xbf16>
    %cst_43 = arith.constant dense<0.000000e+00> : vector<16x192xf32>
    %144 = tpu.matmul %143, %16, %cst_43 {dimension_numbers = #tpu.dot_dimension_numbers<[1], [0], [0], [1], [0, 0, 1, 1], [], []>} : vector<16x64xbf16>, vector<64x192xbf16>, vector<16x192xf32> -> vector<16x192xf32>
    %145 = vector.broadcast %18 : vector<1x192xf32> to vector<16x192xf32>
    %146 = arith.addf %144, %145 : vector<16x192xf32>
    %cst_44 = arith.constant 5.000000e-01 : f32
    %147 = vector.broadcast %cst_44 : f32 to vector<16x192xf32>
    %148 = arith.mulf %147, %146 : vector<16x192xf32>
    %cst_45 = arith.constant 4.471500e-02 : f32
    %149 = vector.broadcast %cst_45 : f32 to vector<16x192xf32>
    %150 = arith.mulf %149, %146 : vector<16x192xf32>
    %151 = arith.mulf %150, %146 : vector<16x192xf32>
    %152 = arith.mulf %151, %146 : vector<16x192xf32>
    %153 = arith.addf %146, %152 : vector<16x192xf32>
    %cst_46 = arith.constant 0.797884583 : f32
    %154 = vector.broadcast %cst_46 : f32 to vector<16x192xf32>
    %155 = arith.mulf %154, %153 : vector<16x192xf32>
    %156 = math.tanh %155 : vector<16x192xf32>
    %cst_47 = arith.constant 1.000000e+00 : f32
    %157 = vector.broadcast %cst_47 : f32 to vector<16x192xf32>
    %158 = arith.addf %157, %156 : vector<16x192xf32>
    %159 = arith.mulf %148, %158 : vector<16x192xf32>
    %160 = arith.truncf %159 : vector<16x192xf32> to vector<16x192xbf16>
    %cst_48 = arith.constant dense<0.000000e+00> : vector<16x64xf32>
    %161 = tpu.matmul %160, %20, %cst_48 {dimension_numbers = #tpu.dot_dimension_numbers<[1], [0], [0], [1], [0, 0, 1, 1], [], []>} : vector<16x192xbf16>, vector<192x64xbf16>, vector<16x64xf32> -> vector<16x64xf32>
    %162 = vector.broadcast %22 : vector<1x64xf32> to vector<16x64xf32>
    %163 = arith.addf %161, %162 : vector<16x64xf32>
    %164 = arith.addf %7, %163 : vector<16x64xf32>
    %c0_49 = arith.constant 0 : index
    %c0_50 = arith.constant 0 : index
    %c0_51 = arith.constant 0 : index
    %165 = vector.load %arg16[%c0_49, %c0_50, %c0_51] : memref<1x16x64xf32, #tpu.memory_space<vmem>>, vector<1x16x64xf32>
    %166 = vector.shape_cast %165 : vector<1x16x64xf32> to vector<16x64xf32>
    %167 = vector.shape_cast %164 : vector<16x64xf32> to vector<1x16x64xf32>
    tpu.vector_store %arg16[%c0_49, %c0_50, %c0_51], %167 {strides = array<i32>} : memref<1x16x64xf32, #tpu.memory_space<vmem>>, vector<1x16x64xf32>,
    %c0_52 = arith.constant 0 : index
    %c0_53 = arith.constant 0 : index
    %c0_54 = arith.constant 0 : index
    %168 = vector.load %arg10[%c0_52, %c0_53, %c0_54] : memref<1x7x64xf32, #tpu.memory_space<vmem>>, vector<1x7x64xf32>
    %169 = vector.shape_cast %168 : vector<1x7x64xf32> to vector<7x64xf32>
    %c0_55 = arith.constant 0 : index
    %c0_56 = arith.constant 0 : index
    %c0_57 = arith.constant 0 : index
    %170 = vector.load %arg11[%c0_55, %c0_56, %c0_57] : memref<1x1x64xf32, #tpu.memory_space<vmem>>, vector<1x1x64xf32>
    %171 = vector.shape_cast %170 : vector<1x1x64xf32> to vector<1x64xf32>
    %c0_58 = arith.constant 0 : index
    %c0_59 = arith.constant 0 : index
    %c0_60 = arith.constant 0 : index
    %172 = vector.load %arg12[%c0_58, %c0_59, %c0_60] : memref<1x64x192xbf16, #tpu.memory_space<vmem>>, vector<1x64x192xbf16>
    %173 = vector.shape_cast %172 : vector<1x64x192xbf16> to vector<64x192xbf16>
    %c0_61 = arith.constant 0 : index
    %c0_62 = arith.constant 0 : index
    %c0_63 = arith.constant 0 : index
    %174 = vector.load %arg13[%c0_61, %c0_62, %c0_63] : memref<1x1x192xf32, #tpu.memory_space<vmem>>, vector<1x1x192xf32>
    %175 = vector.shape_cast %174 : vector<1x1x192xf32> to vector<1x192xf32>
    %c0_64 = arith.constant 0 : index
    %c0_65 = arith.constant 0 : index
    %c0_66 = arith.constant 0 : index
    %176 = vector.load %arg14[%c0_64, %c0_65, %c0_66] : memref<1x192x64xbf16, #tpu.memory_space<vmem>>, vector<1x192x64xbf16>
    %177 = vector.shape_cast %176 : vector<1x192x64xbf16> to vector<192x64xbf16>
    %c0_67 = arith.constant 0 : index
    %c0_68 = arith.constant 0 : index
    %c0_69 = arith.constant 0 : index
    %178 = vector.load %arg15[%c0_67, %c0_68, %c0_69] : memref<1x1x64xf32, #tpu.memory_space<vmem>>, vector<1x1x64xf32>
    %179 = vector.shape_cast %178 : vector<1x1x64xf32> to vector<1x64xf32>
    %180 = tpu.iota {dimensions = array<i32: 0>} : vector<16x1xi32>
    %181 = vector.extract_strided_slice %169 {offsets = [3, 0], sizes = [1, 64], strides = [1, 1]} : vector<7x64xf32> to vector<1x64xf32>
    %182 = vector.shape_cast %181 : vector<1x64xf32> to vector<64xf32>
    %183 = vector.shape_cast %182 : vector<64xf32> to vector<1x64xf32>
    %184 = vector.broadcast %183 : vector<1x64xf32> to vector<16x64xf32>
    %185 = arith.mulf %10, %184 : vector<16x64xf32>
    %c3_i32_70 = arith.constant 3 : i32
    %186 = tpu.dynamic_rotate %10 by %c3_i32_70 dim 0 : vector<16x64xf32>, i32 -> vector<16x64xf32>
    %c3_i32_71 = arith.constant 3 : i32
    %187 = vector.broadcast %c3_i32_71 : i32 to vector<16x1xi32>
    %188 = arith.cmpi sge, %180, %187 : vector<16x1xi32>
    %c19_i32_72 = arith.constant 19 : i32
    %189 = vector.broadcast %c19_i32_72 : i32 to vector<16x1xi32>
    %190 = arith.cmpi slt, %180, %189 : vector<16x1xi32>
    %191 = arith.andi %188, %190 : vector<16x1xi1>
    %cst_73 = arith.constant 0.000000e+00 : f32
    %192 = vector.shape_cast %191 : vector<16x1xi1> to vector<16x1xi1>
    %193 = vector.broadcast %192 : vector<16x1xi1> to vector<16x64xi1>
    %194 = vector.broadcast %cst_73 : f32 to vector<16x64xf32>
    %195 = arith.select %193, %186, %194 : vector<16x64xi1>, vector<16x64xf32>
    %196 = vector.extract_strided_slice %169 {offsets = [0, 0], sizes = [1, 64], strides = [1, 1]} : vector<7x64xf32> to vector<1x64xf32>
    %197 = vector.shape_cast %196 : vector<1x64xf32> to vector<64xf32>
    %198 = vector.shape_cast %197 : vector<64xf32> to vector<1x64xf32>
    %199 = vector.broadcast %198 : vector<1x64xf32> to vector<16x64xf32>
    %200 = arith.mulf %195, %199 : vector<16x64xf32>
    %201 = arith.addf %185, %200 : vector<16x64xf32>
    %c2_i32_74 = arith.constant 2 : i32
    %202 = tpu.dynamic_rotate %10 by %c2_i32_74 dim 0 : vector<16x64xf32>, i32 -> vector<16x64xf32>
    %c2_i32_75 = arith.constant 2 : i32
    %203 = vector.broadcast %c2_i32_75 : i32 to vector<16x1xi32>
    %204 = arith.cmpi sge, %180, %203 : vector<16x1xi32>
    %c18_i32_76 = arith.constant 18 : i32
    %205 = vector.broadcast %c18_i32_76 : i32 to vector<16x1xi32>
    %206 = arith.cmpi slt, %180, %205 : vector<16x1xi32>
    %207 = arith.andi %204, %206 : vector<16x1xi1>
    %cst_77 = arith.constant 0.000000e+00 : f32
    %208 = vector.shape_cast %207 : vector<16x1xi1> to vector<16x1xi1>
    %209 = vector.broadcast %208 : vector<16x1xi1> to vector<16x64xi1>
    %210 = vector.broadcast %cst_77 : f32 to vector<16x64xf32>
    %211 = arith.select %209, %202, %210 : vector<16x64xi1>, vector<16x64xf32>
    %212 = vector.extract_strided_slice %169 {offsets = [1, 0], sizes = [1, 64], strides = [1, 1]} : vector<7x64xf32> to vector<1x64xf32>
    %213 = vector.shape_cast %212 : vector<1x64xf32> to vector<64xf32>
    %214 = vector.shape_cast %213 : vector<64xf32> to vector<1x64xf32>
    %215 = vector.broadcast %214 : vector<1x64xf32> to vector<16x64xf32>
    %216 = arith.mulf %211, %215 : vector<16x64xf32>
    %217 = arith.addf %201, %216 : vector<16x64xf32>
    %c1_i32_78 = arith.constant 1 : i32
    %218 = tpu.dynamic_rotate %10 by %c1_i32_78 dim 0 : vector<16x64xf32>, i32 -> vector<16x64xf32>
    %c1_i32_79 = arith.constant 1 : i32
    %219 = vector.broadcast %c1_i32_79 : i32 to vector<16x1xi32>
    %220 = arith.cmpi sge, %180, %219 : vector<16x1xi32>
    %c17_i32_80 = arith.constant 17 : i32
    %221 = vector.broadcast %c17_i32_80 : i32 to vector<16x1xi32>
    %222 = arith.cmpi slt, %180, %221 : vector<16x1xi32>
    %223 = arith.andi %220, %222 : vector<16x1xi1>
    %cst_81 = arith.constant 0.000000e+00 : f32
    %224 = vector.shape_cast %223 : vector<16x1xi1> to vector<16x1xi1>
    %225 = vector.broadcast %224 : vector<16x1xi1> to vector<16x64xi1>
    %226 = vector.broadcast %cst_81 : f32 to vector<16x64xf32>
    %227 = arith.select %225, %218, %226 : vector<16x64xi1>, vector<16x64xf32>
    %228 = vector.extract_strided_slice %169 {offsets = [2, 0], sizes = [1, 64], strides = [1, 1]} : vector<7x64xf32> to vector<1x64xf32>
    %229 = vector.shape_cast %228 : vector<1x64xf32> to vector<64xf32>
    %230 = vector.shape_cast %229 : vector<64xf32> to vector<1x64xf32>
    %231 = vector.broadcast %230 : vector<1x64xf32> to vector<16x64xf32>
    %232 = arith.mulf %227, %231 : vector<16x64xf32>
    %233 = arith.addf %217, %232 : vector<16x64xf32>
    %c15_i32_82 = arith.constant 15 : i32
    %234 = tpu.dynamic_rotate %10 by %c15_i32_82 dim 0 : vector<16x64xf32>, i32 -> vector<16x64xf32>
    %c-1_i32_83 = arith.constant -1 : i32
    %235 = vector.broadcast %c-1_i32_83 : i32 to vector<16x1xi32>
    %236 = arith.cmpi sge, %180, %235 : vector<16x1xi32>
    %c15_i32_84 = arith.constant 15 : i32
    %237 = vector.broadcast %c15_i32_84 : i32 to vector<16x1xi32>
    %238 = arith.cmpi slt, %180, %237 : vector<16x1xi32>
    %239 = arith.andi %236, %238 : vector<16x1xi1>
    %cst_85 = arith.constant 0.000000e+00 : f32
    %240 = vector.shape_cast %239 : vector<16x1xi1> to vector<16x1xi1>
    %241 = vector.broadcast %240 : vector<16x1xi1> to vector<16x64xi1>
    %242 = vector.broadcast %cst_85 : f32 to vector<16x64xf32>
    %243 = arith.select %241, %234, %242 : vector<16x64xi1>, vector<16x64xf32>
    %244 = vector.extract_strided_slice %169 {offsets = [4, 0], sizes = [1, 64], strides = [1, 1]} : vector<7x64xf32> to vector<1x64xf32>
    %245 = vector.shape_cast %244 : vector<1x64xf32> to vector<64xf32>
    %246 = vector.shape_cast %245 : vector<64xf32> to vector<1x64xf32>
    %247 = vector.broadcast %246 : vector<1x64xf32> to vector<16x64xf32>
    %248 = arith.mulf %243, %247 : vector<16x64xf32>
    %249 = arith.addf %233, %248 : vector<16x64xf32>
    %c14_i32_86 = arith.constant 14 : i32
    %250 = tpu.dynamic_rotate %10 by %c14_i32_86 dim 0 : vector<16x64xf32>, i32 -> vector<16x64xf32>
    %c-2_i32_87 = arith.constant -2 : i32
    %251 = vector.broadcast %c-2_i32_87 : i32 to vector<16x1xi32>
    %252 = arith.cmpi sge, %180, %251 : vector<16x1xi32>
    %c14_i32_88 = arith.constant 14 : i32
    %253 = vector.broadcast %c14_i32_88 : i32 to vector<16x1xi32>
    %254 = arith.cmpi slt, %180, %253 : vector<16x1xi32>
    %255 = arith.andi %252, %254 : vector<16x1xi1>
    %cst_89 = arith.constant 0.000000e+00 : f32
    %256 = vector.shape_cast %255 : vector<16x1xi1> to vector<16x1xi1>
    %257 = vector.broadcast %256 : vector<16x1xi1> to vector<16x64xi1>
    %258 = vector.broadcast %cst_89 : f32 to vector<16x64xf32>
    %259 = arith.select %257, %250, %258 : vector<16x64xi1>, vector<16x64xf32>
    %260 = vector.extract_strided_slice %169 {offsets = [5, 0], sizes = [1, 64], strides = [1, 1]} : vector<7x64xf32> to vector<1x64xf32>
    %261 = vector.shape_cast %260 : vector<1x64xf32> to vector<64xf32>
    %262 = vector.shape_cast %261 : vector<64xf32> to vector<1x64xf32>
    %263 = vector.broadcast %262 : vector<1x64xf32> to vector<16x64xf32>
    %264 = arith.mulf %259, %263 : vector<16x64xf32>
    %265 = arith.addf %249, %264 : vector<16x64xf32>
    %c13_i32_90 = arith.constant 13 : i32
    %266 = tpu.dynamic_rotate %10 by %c13_i32_90 dim 0 : vector<16x64xf32>, i32 -> vector<16x64xf32>
    %c-3_i32_91 = arith.constant -3 : i32
    %267 = vector.broadcast %c-3_i32_91 : i32 to vector<16x1xi32>
    %268 = arith.cmpi sge, %180, %267 : vector<16x1xi32>
    %c13_i32_92 = arith.constant 13 : i32
    %269 = vector.broadcast %c13_i32_92 : i32 to vector<16x1xi32>
    %270 = arith.cmpi slt, %180, %269 : vector<16x1xi32>
    %271 = arith.andi %268, %270 : vector<16x1xi1>
    %cst_93 = arith.constant 0.000000e+00 : f32
    %272 = vector.shape_cast %271 : vector<16x1xi1> to vector<16x1xi1>
    %273 = vector.broadcast %272 : vector<16x1xi1> to vector<16x64xi1>
    %274 = vector.broadcast %cst_93 : f32 to vector<16x64xf32>
    %275 = arith.select %273, %266, %274 : vector<16x64xi1>, vector<16x64xf32>
    %276 = vector.extract_strided_slice %169 {offsets = [6, 0], sizes = [1, 64], strides = [1, 1]} : vector<7x64xf32> to vector<1x64xf32>
    %277 = vector.shape_cast %276 : vector<1x64xf32> to vector<64xf32>
    %278 = vector.shape_cast %277 : vector<64xf32> to vector<1x64xf32>
    %279 = vector.broadcast %278 : vector<1x64xf32> to vector<16x64xf32>
    %280 = arith.mulf %275, %279 : vector<16x64xf32>
    %281 = arith.addf %265, %280 : vector<16x64xf32>
    %282 = vector.broadcast %171 : vector<1x64xf32> to vector<16x64xf32>
    %283 = arith.addf %281, %282 : vector<16x64xf32>
    %cst_94 = arith.constant dense<0.000000e+00> : vector<16xf32>
    %284 = vector.multi_reduction <add>, %283, %cst_94 [1] : vector<16x64xf32> to vector<16xf32>
    %285 = vector.shape_cast %284 : vector<16xf32> to vector<16x1xf32>
    %cst_95 = arith.constant 6.400000e+01 : f32
    %286 = vector.broadcast %cst_95 : f32 to vector<16x1xf32>
    %287 = arith.divf %285, %286 : vector<16x1xf32>
    %288 = vector.broadcast %287 : vector<16x1xf32> to vector<16x64xf32>
    %289 = arith.subf %283, %288 : vector<16x64xf32>
    %290 = arith.mulf %289, %289 : vector<16x64xf32>
    %cst_96 = arith.constant dense<0.000000e+00> : vector<16xf32>
    %291 = vector.multi_reduction <add>, %290, %cst_96 [1] : vector<16x64xf32> to vector<16xf32>
    %292 = vector.shape_cast %291 : vector<16xf32> to vector<16x1xf32>
    %cst_97 = arith.constant 6.400000e+01 : f32
    %293 = vector.broadcast %cst_97 : f32 to vector<16x1xf32>
    %294 = arith.divf %292, %293 : vector<16x1xf32>
    %cst_98 = arith.constant 9.99999997E-7 : f32
    %295 = vector.broadcast %cst_98 : f32 to vector<16x1xf32>
    %296 = arith.addf %294, %295 : vector<16x1xf32>
    %297 = math.rsqrt %296 : vector<16x1xf32>
    %298 = vector.broadcast %297 : vector<16x1xf32> to vector<16x64xf32>
    %299 = arith.mulf %289, %298 : vector<16x64xf32>
    %300 = arith.truncf %299 : vector<16x64xf32> to vector<16x64xbf16>
    %cst_99 = arith.constant dense<0.000000e+00> : vector<16x192xf32>
    %301 = tpu.matmul %300, %173, %cst_99 {dimension_numbers = #tpu.dot_dimension_numbers<[1], [0], [0], [1], [0, 0, 1, 1], [], []>} : vector<16x64xbf16>, vector<64x192xbf16>, vector<16x192xf32> -> vector<16x192xf32>
    %302 = vector.broadcast %175 : vector<1x192xf32> to vector<16x192xf32>
    %303 = arith.addf %301, %302 : vector<16x192xf32>
    %cst_100 = arith.constant 5.000000e-01 : f32
    %304 = vector.broadcast %cst_100 : f32 to vector<16x192xf32>
    %305 = arith.mulf %304, %303 : vector<16x192xf32>
    %cst_101 = arith.constant 4.471500e-02 : f32
    %306 = vector.broadcast %cst_101 : f32 to vector<16x192xf32>
    %307 = arith.mulf %306, %303 : vector<16x192xf32>
    %308 = arith.mulf %307, %303 : vector<16x192xf32>
    %309 = arith.mulf %308, %303 : vector<16x192xf32>
    %310 = arith.addf %303, %309 : vector<16x192xf32>
    %cst_102 = arith.constant 0.797884583 : f32
    %311 = vector.broadcast %cst_102 : f32 to vector<16x192xf32>
    %312 = arith.mulf %311, %310 : vector<16x192xf32>
    %313 = math.tanh %312 : vector<16x192xf32>
    %cst_103 = arith.constant 1.000000e+00 : f32
    %314 = vector.broadcast %cst_103 : f32 to vector<16x192xf32>
    %315 = arith.addf %314, %313 : vector<16x192xf32>
    %316 = arith.mulf %305, %315 : vector<16x192xf32>
    %317 = arith.truncf %316 : vector<16x192xf32> to vector<16x192xbf16>
    %cst_104 = arith.constant dense<0.000000e+00> : vector<16x64xf32>
    %318 = tpu.matmul %317, %177, %cst_104 {dimension_numbers = #tpu.dot_dimension_numbers<[1], [0], [0], [1], [0, 0, 1, 1], [], []>} : vector<16x192xbf16>, vector<192x64xbf16>, vector<16x64xf32> -> vector<16x64xf32>
    %319 = vector.broadcast %179 : vector<1x64xf32> to vector<16x64xf32>
    %320 = arith.addf %318, %319 : vector<16x64xf32>
    %321 = arith.addf %10, %320 : vector<16x64xf32>
    %c0_105 = arith.constant 0 : index
    %c0_106 = arith.constant 0 : index
    %c0_107 = arith.constant 0 : index
    %322 = vector.load %arg17[%c0_105, %c0_106, %c0_107] : memref<1x16x64xf32, #tpu.memory_space<vmem>>, vector<1x16x64xf32>
    %323 = vector.shape_cast %322 : vector<1x16x64xf32> to vector<16x64xf32>
    %324 = vector.shape_cast %321 : vector<16x64xf32> to vector<1x16x64xf32>
    tpu.vector_store %arg17[%c0_105, %c0_106, %c0_107], %324 {strides = array<i32>} : memref<1x16x64xf32, #tpu.memory_space<vmem>>, vector<1x16x64xf32>,
    return
  }
  func.func @transform_0(%arg0: i32, %arg1: i32) -> (i32, i32, i32) {
    %c0_i32 = arith.constant 0 : i32
    %c0_i32_0 = arith.constant 0 : i32
    %c0_i32_1 = arith.constant 0 : i32
    return %arg0, %c0_i32, %c0_i32_0 : i32, i32, i32
  }
  func.func @transform_1(%arg0: i32, %arg1: i32) -> (i32, i32, i32) {
    %c0_i32 = arith.constant 0 : i32
    %c0_i32_0 = arith.constant 0 : i32
    %c0_i32_1 = arith.constant 0 : i32
    return %arg0, %c0_i32, %c0_i32_0 : i32, i32, i32
  }
  func.func @transform_2(%arg0: i32, %arg1: i32) -> (i32, i32, i32) {
    %c0_i32 = arith.constant 0 : i32
    %c0_i32_0 = arith.constant 0 : i32
    %c0_i32_1 = arith.constant 0 : i32
    return %arg1, %c0_i32, %c0_i32_0 : i32, i32, i32
  }
  func.func @transform_3(%arg0: i32, %arg1: i32) -> (i32, i32, i32) {
    %c0_i32 = arith.constant 0 : i32
    %c0_i32_0 = arith.constant 0 : i32
    %c0_i32_1 = arith.constant 0 : i32
    return %arg1, %c0_i32, %c0_i32_0 : i32, i32, i32
  }
  func.func @transform_4(%arg0: i32, %arg1: i32) -> (i32, i32, i32) {
    %c0_i32 = arith.constant 0 : i32
    %c0_i32_0 = arith.constant 0 : i32
    %c0_i32_1 = arith.constant 0 : i32
    return %arg1, %c0_i32, %c0_i32_0 : i32, i32, i32
  }
  func.func @transform_5(%arg0: i32, %arg1: i32) -> (i32, i32, i32) {
    %c0_i32 = arith.constant 0 : i32
    %c0_i32_0 = arith.constant 0 : i32
    %c0_i32_1 = arith.constant 0 : i32
    return %arg1, %c0_i32, %c0_i32_0 : i32, i32, i32
  }
  func.func @transform_6(%arg0: i32, %arg1: i32) -> (i32, i32, i32) {
    %c0_i32 = arith.constant 0 : i32
    %c0_i32_0 = arith.constant 0 : i32
    %c0_i32_1 = arith.constant 0 : i32
    return %arg1, %c0_i32, %c0_i32_0 : i32, i32, i32
  }
  func.func @transform_7(%arg0: i32, %arg1: i32) -> (i32, i32, i32) {
    %c0_i32 = arith.constant 0 : i32
    %c0_i32_0 = arith.constant 0 : i32
    %c0_i32_1 = arith.constant 0 : i32
    return %arg1, %c0_i32, %c0_i32_0 : i32, i32, i32
  }
  func.func @transform_8(%arg0: i32, %arg1: i32) -> (i32, i32, i32) {
    %c0_i32 = arith.constant 0 : i32
    %c0_i32_0 = arith.constant 0 : i32
    %c0_i32_1 = arith.constant 0 : i32
    return %arg1, %c0_i32, %c0_i32_0 : i32, i32, i32
  }
  func.func @transform_9(%arg0: i32, %arg1: i32) -> (i32, i32, i32) {
    %c0_i32 = arith.constant 0 : i32
    %c0_i32_0 = arith.constant 0 : i32
    %c0_i32_1 = arith.constant 0 : i32
    return %arg1, %c0_i32, %c0_i32_0 : i32, i32, i32
  }
  func.func @transform_10(%arg0: i32, %arg1: i32) -> (i32, i32, i32) {
    %c0_i32 = arith.constant 0 : i32
    %c0_i32_0 = arith.constant 0 : i32
    %c0_i32_1 = arith.constant 0 : i32
    return %arg1, %c0_i32, %c0_i32_0 : i32, i32, i32
  }
  func.func @transform_11(%arg0: i32, %arg1: i32) -> (i32, i32, i32) {
    %c0_i32 = arith.constant 0 : i32
    %c0_i32_0 = arith.constant 0 : i32
    %c0_i32_1 = arith.constant 0 : i32
    return %arg1, %c0_i32, %c0_i32_0 : i32, i32, i32
  }
  func.func @transform_12(%arg0: i32, %arg1: i32) -> (i32, i32, i32) {
    %c0_i32 = arith.constant 0 : i32
    %c0_i32_0 = arith.constant 0 : i32
    %c0_i32_1 = arith.constant 0 : i32
    return %arg1, %c0_i32, %c0_i32_0 : i32, i32, i32
  }
  func.func @transform_13(%arg0: i32, %arg1: i32) -> (i32, i32, i32) {
    %c0_i32 = arith.constant 0 : i32
    %c0_i32_0 = arith.constant 0 : i32
    %c0_i32_1 = arith.constant 0 : i32
    return %arg1, %c0_i32, %c0_i32_0 : i32, i32, i32
  }
  func.func @transform_14(%arg0: i32, %arg1: i32) -> (i32, i32, i32) {
    %c0_i32 = arith.constant 0 : i32
    %c0_i32_0 = arith.constant 0 : i32
    %c0_i32_1 = arith.constant 0 : i32
    return %arg0, %c0_i32, %c0_i32_0 : i32, i32, i32
  }
  func.func @transform_15(%arg0: i32, %arg1: i32) -> (i32, i32, i32) {
    %c0_i32 = arith.constant 0 : i32
    %c0_i32_0 = arith.constant 0 : i32
    %c0_i32_1 = arith.constant 0 : i32
    return %arg0, %c0_i32, %c0_i32_0 : i32, i32, i32
  }
}

module attributes {stable_mosaic.version = 11 : i64} {
  func.func @post_kernel(%arg0: i32, %arg1: memref<1x16x64xf32, #tpu.memory_space<vmem>>, %arg2: memref<1x16x64xf32, #tpu.memory_space<vmem>>, %arg3: memref<1x16x128xf32, #tpu.memory_space<vmem>>, %arg4: memref<1x64xf32, #tpu.memory_space<vmem>>, %arg5: memref<1x64xf32, #tpu.memory_space<vmem>>, %arg6: memref<1x64xf32, #tpu.memory_space<vmem>>, %arg7: memref<1x64xf32, #tpu.memory_space<vmem>>, %arg8: memref<64x128xbf16, #tpu.memory_space<vmem>>, %arg9: memref<1x128xf32, #tpu.memory_space<vmem>>, %arg10: memref<64x256xbf16, #tpu.memory_space<vmem>>, %arg11: memref<1x256xf32, #tpu.memory_space<vmem>>, %arg12: memref<1x16x128xf32, #tpu.memory_space<vmem>>, %arg13: memref<1x16x128xf32, #tpu.memory_space<vmem>>, %arg14: memref<1x16x128xf32, #tpu.memory_space<vmem>>, %arg15: memref<1x16x128xf32, #tpu.memory_space<vmem>>) attributes {dimension_semantics = [#tpu.dimension_semantics<parallel>], iteration_bounds = array<i64: 2>, scalar_prefetch = 0 : i64, scratch_operands = 0 : i64, tpu.core_type = #tpu.core_type<tc>, window_params = [{transform_indices = @transform_0, window_bounds = array<i64: 1, 16, 64>}, {transform_indices = @transform_1, window_bounds = array<i64: 1, 16, 64>}, {transform_indices = @transform_2, window_bounds = array<i64: 1, 16, 128>}, {pipeline_mode = #tpu.pipeline_mode<synchronous>, transform_indices = @transform_3, window_bounds = array<i64: 1, 64>}, {pipeline_mode = #tpu.pipeline_mode<synchronous>, transform_indices = @transform_4, window_bounds = array<i64: 1, 64>}, {pipeline_mode = #tpu.pipeline_mode<synchronous>, transform_indices = @transform_5, window_bounds = array<i64: 1, 64>}, {pipeline_mode = #tpu.pipeline_mode<synchronous>, transform_indices = @transform_6, window_bounds = array<i64: 1, 64>}, {pipeline_mode = #tpu.pipeline_mode<synchronous>, transform_indices = @transform_7, window_bounds = array<i64: 64, 128>}, {pipeline_mode = #tpu.pipeline_mode<synchronous>, transform_indices = @transform_8, window_bounds = array<i64: 1, 128>}, {pipeline_mode = #tpu.pipeline_mode<synchronous>, transform_indices = @transform_9, window_bounds = array<i64: 64, 256>}, {pipeline_mode = #tpu.pipeline_mode<synchronous>, transform_indices = @transform_10, window_bounds = array<i64: 1, 256>}, {transform_indices = @transform_11, window_bounds = array<i64: 1, 16, 128>}, {transform_indices = @transform_12, window_bounds = array<i64: 1, 16, 128>}, {transform_indices = @transform_13, window_bounds = array<i64: 1, 16, 128>}, {transform_indices = @transform_14, window_bounds = array<i64: 1, 16, 128>}]} {
    %c0 = arith.constant 0 : index
    %c0_0 = arith.constant 0 : index
    %c0_1 = arith.constant 0 : index
    %0 = vector.load %arg1[%c0, %c0_0, %c0_1] : memref<1x16x64xf32, #tpu.memory_space<vmem>>, vector<1x16x64xf32>
    %1 = vector.shape_cast %0 : vector<1x16x64xf32> to vector<16x64xf32>
    %c0_2 = arith.constant 0 : index
    %c0_3 = arith.constant 0 : index
    %2 = vector.load %arg4[%c0_2, %c0_3] : memref<1x64xf32, #tpu.memory_space<vmem>>, vector<1x64xf32>
    %c0_4 = arith.constant 0 : index
    %c0_5 = arith.constant 0 : index
    %3 = vector.load %arg5[%c0_4, %c0_5] : memref<1x64xf32, #tpu.memory_space<vmem>>, vector<1x64xf32>
    %cst = arith.constant dense<0.000000e+00> : vector<16xf32>
    %4 = vector.multi_reduction <add>, %1, %cst [1] : vector<16x64xf32> to vector<16xf32>
    %5 = vector.shape_cast %4 : vector<16xf32> to vector<16x1xf32>
    %cst_6 = arith.constant 6.400000e+01 : f32
    %6 = vector.broadcast %cst_6 : f32 to vector<16x1xf32>
    %7 = arith.divf %5, %6 : vector<16x1xf32>
    %8 = vector.broadcast %7 : vector<16x1xf32> to vector<16x64xf32>
    %9 = arith.subf %1, %8 : vector<16x64xf32>
    %10 = arith.mulf %9, %9 : vector<16x64xf32>
    %cst_7 = arith.constant dense<0.000000e+00> : vector<16xf32>
    %11 = vector.multi_reduction <add>, %10, %cst_7 [1] : vector<16x64xf32> to vector<16xf32>
    %12 = vector.shape_cast %11 : vector<16xf32> to vector<16x1xf32>
    %cst_8 = arith.constant 6.400000e+01 : f32
    %13 = vector.broadcast %cst_8 : f32 to vector<16x1xf32>
    %14 = arith.divf %12, %13 : vector<16x1xf32>
    %cst_9 = arith.constant 9.99999997E-7 : f32
    %15 = vector.broadcast %cst_9 : f32 to vector<16x1xf32>
    %16 = arith.addf %14, %15 : vector<16x1xf32>
    %17 = math.rsqrt %16 : vector<16x1xf32>
    %18 = vector.broadcast %17 : vector<16x1xf32> to vector<16x64xf32>
    %19 = arith.mulf %9, %18 : vector<16x64xf32>
    %20 = vector.broadcast %2 : vector<1x64xf32> to vector<16x64xf32>
    %21 = arith.mulf %19, %20 : vector<16x64xf32>
    %22 = vector.broadcast %3 : vector<1x64xf32> to vector<16x64xf32>
    %23 = arith.addf %21, %22 : vector<16x64xf32>
    %c0_10 = arith.constant 0 : index
    %c0_11 = arith.constant 0 : index
    %c0_12 = arith.constant 0 : index
    %24 = vector.load %arg2[%c0_10, %c0_11, %c0_12] : memref<1x16x64xf32, #tpu.memory_space<vmem>>, vector<1x16x64xf32>
    %25 = vector.shape_cast %24 : vector<1x16x64xf32> to vector<16x64xf32>
    %c0_13 = arith.constant 0 : index
    %c0_14 = arith.constant 0 : index
    %26 = vector.load %arg6[%c0_13, %c0_14] : memref<1x64xf32, #tpu.memory_space<vmem>>, vector<1x64xf32>
    %c0_15 = arith.constant 0 : index
    %c0_16 = arith.constant 0 : index
    %27 = vector.load %arg7[%c0_15, %c0_16] : memref<1x64xf32, #tpu.memory_space<vmem>>, vector<1x64xf32>
    %cst_17 = arith.constant dense<0.000000e+00> : vector<16xf32>
    %28 = vector.multi_reduction <add>, %25, %cst_17 [1] : vector<16x64xf32> to vector<16xf32>
    %29 = vector.shape_cast %28 : vector<16xf32> to vector<16x1xf32>
    %cst_18 = arith.constant 6.400000e+01 : f32
    %30 = vector.broadcast %cst_18 : f32 to vector<16x1xf32>
    %31 = arith.divf %29, %30 : vector<16x1xf32>
    %32 = vector.broadcast %31 : vector<16x1xf32> to vector<16x64xf32>
    %33 = arith.subf %25, %32 : vector<16x64xf32>
    %34 = arith.mulf %33, %33 : vector<16x64xf32>
    %cst_19 = arith.constant dense<0.000000e+00> : vector<16xf32>
    %35 = vector.multi_reduction <add>, %34, %cst_19 [1] : vector<16x64xf32> to vector<16xf32>
    %36 = vector.shape_cast %35 : vector<16xf32> to vector<16x1xf32>
    %cst_20 = arith.constant 6.400000e+01 : f32
    %37 = vector.broadcast %cst_20 : f32 to vector<16x1xf32>
    %38 = arith.divf %36, %37 : vector<16x1xf32>
    %cst_21 = arith.constant 9.99999997E-7 : f32
    %39 = vector.broadcast %cst_21 : f32 to vector<16x1xf32>
    %40 = arith.addf %38, %39 : vector<16x1xf32>
    %41 = math.rsqrt %40 : vector<16x1xf32>
    %42 = vector.broadcast %41 : vector<16x1xf32> to vector<16x64xf32>
    %43 = arith.mulf %33, %42 : vector<16x64xf32>
    %44 = vector.broadcast %26 : vector<1x64xf32> to vector<16x64xf32>
    %45 = arith.mulf %43, %44 : vector<16x64xf32>
    %46 = vector.broadcast %27 : vector<1x64xf32> to vector<16x64xf32>
    %47 = arith.addf %45, %46 : vector<16x64xf32>
    %c0_22 = arith.constant 0 : index
    %c0_23 = arith.constant 0 : index
    %c0_24 = arith.constant 0 : index
    %48 = vector.load %arg3[%c0_22, %c0_23, %c0_24] : memref<1x16x128xf32, #tpu.memory_space<vmem>>, vector<1x16x128xf32>
    %49 = vector.shape_cast %48 : vector<1x16x128xf32> to vector<16x128xf32>
    %50 = arith.truncf %23 : vector<16x64xf32> to vector<16x64xbf16>
    %c0_25 = arith.constant 0 : index
    %c0_26 = arith.constant 0 : index
    %51 = vector.load %arg8[%c0_25, %c0_26] : memref<64x128xbf16, #tpu.memory_space<vmem>>, vector<64x128xbf16>
    %cst_27 = arith.constant dense<0.000000e+00> : vector<16x128xf32>
    %52 = tpu.matmul %50, %51, %cst_27 {dimension_numbers = #tpu.dot_dimension_numbers<[1], [0], [0], [1], [0, 0, 1, 1], [], []>} : vector<16x64xbf16>, vector<64x128xbf16>, vector<16x128xf32> -> vector<16x128xf32>
    %53 = arith.addf %49, %52 : vector<16x128xf32>
    %c0_28 = arith.constant 0 : index
    %c0_29 = arith.constant 0 : index
    %54 = vector.load %arg9[%c0_28, %c0_29] : memref<1x128xf32, #tpu.memory_space<vmem>>, vector<1x128xf32>
    %55 = vector.broadcast %54 : vector<1x128xf32> to vector<16x128xf32>
    %56 = arith.addf %53, %55 : vector<16x128xf32>
    %57 = arith.truncf %47 : vector<16x64xf32> to vector<16x64xbf16>
    %c0_30 = arith.constant 0 : index
    %c0_31 = arith.constant 0 : index
    %58 = vector.load %arg10[%c0_30, %c0_31] : memref<64x256xbf16, #tpu.memory_space<vmem>>, vector<64x256xbf16>
    %cst_32 = arith.constant dense<0.000000e+00> : vector<16x256xf32>
    %59 = tpu.matmul %57, %58, %cst_32 {dimension_numbers = #tpu.dot_dimension_numbers<[1], [0], [0], [1], [0, 0, 1, 1], [], []>} : vector<16x64xbf16>, vector<64x256xbf16>, vector<16x256xf32> -> vector<16x256xf32>
    %c0_33 = arith.constant 0 : index
    %c0_34 = arith.constant 0 : index
    %60 = vector.load %arg11[%c0_33, %c0_34] : memref<1x256xf32, #tpu.memory_space<vmem>>, vector<1x256xf32>
    %61 = vector.broadcast %60 : vector<1x256xf32> to vector<16x256xf32>
    %62 = arith.addf %59, %61 : vector<16x256xf32>
    %63 = vector.extract_strided_slice %62 {offsets = [0, 0], sizes = [16, 128], strides = [1, 1]} : vector<16x256xf32> to vector<16x128xf32>
    %64 = vector.extract_strided_slice %62 {offsets = [0, 128], sizes = [16, 128], strides = [1, 1]} : vector<16x256xf32> to vector<16x128xf32>
    %65 = arith.mulf %63, %63 : vector<16x128xf32>
    %66 = arith.mulf %64, %64 : vector<16x128xf32>
    %67 = arith.addf %65, %66 : vector<16x128xf32>
    %cst_35 = arith.constant 0.000000e+00 : f32
    %68 = vector.broadcast %cst_35 : f32 to vector<16x128xf32>
    %69 = arith.cmpf ogt, %67, %68 : vector<16x128xf32>
    %70 = math.rsqrt %67 : vector<16x128xf32>
    %cst_36 = arith.constant 0.000000e+00 : f32
    %71 = vector.broadcast %cst_36 : f32 to vector<16x128xf32>
    %72 = arith.select %69, %70, %71 : vector<16x128xi1>, vector<16x128xf32>
    %73 = arith.mulf %63, %72 : vector<16x128xf32>
    %cst_37 = arith.constant 1.000000e+00 : f32
    %74 = vector.broadcast %cst_37 : f32 to vector<16x128xf32>
    %75 = arith.select %69, %73, %74 : vector<16x128xi1>, vector<16x128xf32>
    %76 = arith.mulf %64, %72 : vector<16x128xf32>
    %77 = math.exp %56 : vector<16x128xf32>
    %c0_38 = arith.constant 0 : index
    %c0_39 = arith.constant 0 : index
    %c0_40 = arith.constant 0 : index
    %78 = vector.load %arg12[%c0_38, %c0_39, %c0_40] : memref<1x16x128xf32, #tpu.memory_space<vmem>>, vector<1x16x128xf32>
    %79 = vector.shape_cast %78 : vector<1x16x128xf32> to vector<16x128xf32>
    %80 = vector.shape_cast %56 : vector<16x128xf32> to vector<1x16x128xf32>
    tpu.vector_store %arg12[%c0_38, %c0_39, %c0_40], %80 {strides = array<i32>} : memref<1x16x128xf32, #tpu.memory_space<vmem>>, vector<1x16x128xf32>,
    %81 = math.absf %63 : vector<16x128xf32>
    %82 = math.absf %64 : vector<16x128xf32>
    %83 = arith.maximumf %81, %82 : vector<16x128xf32>
    %84 = arith.minimumf %81, %82 : vector<16x128xf32>
    %cst_41 = arith.constant 1.000000e-30 : f32
    %85 = vector.broadcast %cst_41 : f32 to vector<16x128xf32>
    %86 = arith.maximumf %83, %85 : vector<16x128xf32>
    %87 = arith.divf %84, %86 : vector<16x128xf32>
    %88 = arith.mulf %87, %87 : vector<16x128xf32>
    %cst_42 = arith.constant -1.172120e-02 : f32
    %89 = vector.broadcast %cst_42 : f32 to vector<16x128xf32>
    %90 = arith.mulf %89, %88 : vector<16x128xf32>
    %cst_43 = arith.constant 0.0526533201 : f32
    %91 = vector.broadcast %cst_43 : f32 to vector<16x128xf32>
    %92 = arith.addf %90, %91 : vector<16x128xf32>
    %93 = arith.mulf %92, %88 : vector<16x128xf32>
    %cst_44 = arith.constant 0.116432868 : f32
    %94 = vector.broadcast %cst_44 : f32 to vector<16x128xf32>
    %95 = arith.subf %93, %94 : vector<16x128xf32>
    %96 = arith.mulf %95, %88 : vector<16x128xf32>
    %cst_45 = arith.constant 0.193543464 : f32
    %97 = vector.broadcast %cst_45 : f32 to vector<16x128xf32>
    %98 = arith.addf %96, %97 : vector<16x128xf32>
    %99 = arith.mulf %98, %88 : vector<16x128xf32>
    %cst_46 = arith.constant 0.332623482 : f32
    %100 = vector.broadcast %cst_46 : f32 to vector<16x128xf32>
    %101 = arith.subf %99, %100 : vector<16x128xf32>
    %102 = arith.mulf %101, %88 : vector<16x128xf32>
    %cst_47 = arith.constant 0.999977231 : f32
    %103 = vector.broadcast %cst_47 : f32 to vector<16x128xf32>
    %104 = arith.addf %102, %103 : vector<16x128xf32>
    %105 = arith.mulf %87, %104 : vector<16x128xf32>
    %106 = arith.cmpf ogt, %82, %81 : vector<16x128xf32>
    %cst_48 = arith.constant 1.57079637 : f32
    %107 = vector.broadcast %cst_48 : f32 to vector<16x128xf32>
    %108 = arith.subf %107, %105 : vector<16x128xf32>
    %109 = arith.select %106, %108, %105 : vector<16x128xi1>, vector<16x128xf32>
    %cst_49 = arith.constant 0.000000e+00 : f32
    %110 = vector.broadcast %cst_49 : f32 to vector<16x128xf32>
    %111 = arith.cmpf olt, %63, %110 : vector<16x128xf32>
    %cst_50 = arith.constant 3.14159274 : f32
    %112 = vector.broadcast %cst_50 : f32 to vector<16x128xf32>
    %113 = arith.subf %112, %109 : vector<16x128xf32>
    %114 = arith.select %111, %113, %109 : vector<16x128xi1>, vector<16x128xf32>
    %cst_51 = arith.constant 0.000000e+00 : f32
    %115 = vector.broadcast %cst_51 : f32 to vector<16x128xf32>
    %116 = arith.cmpf olt, %64, %115 : vector<16x128xf32>
    %cst_52 = arith.constant 0.000000e+00 : f32
    %117 = vector.broadcast %cst_52 : f32 to vector<16x128xf32>
    %118 = arith.subf %117, %114 : vector<16x128xf32>
    %119 = arith.select %116, %118, %114 : vector<16x128xi1>, vector<16x128xf32>
    %c0_53 = arith.constant 0 : index
    %c0_54 = arith.constant 0 : index
    %c0_55 = arith.constant 0 : index
    %120 = vector.load %arg13[%c0_53, %c0_54, %c0_55] : memref<1x16x128xf32, #tpu.memory_space<vmem>>, vector<1x16x128xf32>
    %121 = vector.shape_cast %120 : vector<1x16x128xf32> to vector<16x128xf32>
    %122 = vector.shape_cast %119 : vector<16x128xf32> to vector<1x16x128xf32>
    tpu.vector_store %arg13[%c0_53, %c0_54, %c0_55], %122 {strides = array<i32>} : memref<1x16x128xf32, #tpu.memory_space<vmem>>, vector<1x16x128xf32>,
    %123 = arith.mulf %77, %75 : vector<16x128xf32>
    %c0_56 = arith.constant 0 : index
    %c0_57 = arith.constant 0 : index
    %c0_58 = arith.constant 0 : index
    %124 = vector.load %arg14[%c0_56, %c0_57, %c0_58] : memref<1x16x128xf32, #tpu.memory_space<vmem>>, vector<1x16x128xf32>
    %125 = vector.shape_cast %124 : vector<1x16x128xf32> to vector<16x128xf32>
    %126 = vector.shape_cast %123 : vector<16x128xf32> to vector<1x16x128xf32>
    tpu.vector_store %arg14[%c0_56, %c0_57, %c0_58], %126 {strides = array<i32>} : memref<1x16x128xf32, #tpu.memory_space<vmem>>, vector<1x16x128xf32>,
    %127 = arith.mulf %77, %76 : vector<16x128xf32>
    %c0_59 = arith.constant 0 : index
    %c0_60 = arith.constant 0 : index
    %c0_61 = arith.constant 0 : index
    %128 = vector.load %arg15[%c0_59, %c0_60, %c0_61] : memref<1x16x128xf32, #tpu.memory_space<vmem>>, vector<1x16x128xf32>
    %129 = vector.shape_cast %128 : vector<1x16x128xf32> to vector<16x128xf32>
    %130 = vector.shape_cast %127 : vector<16x128xf32> to vector<1x16x128xf32>
    tpu.vector_store %arg15[%c0_59, %c0_60, %c0_61], %130 {strides = array<i32>} : memref<1x16x128xf32, #tpu.memory_space<vmem>>, vector<1x16x128xf32>,
    return
  }
  func.func @transform_0(%arg0: i32) -> (i32, i32, i32) {
    %c0_i32 = arith.constant 0 : i32
    %c0_i32_0 = arith.constant 0 : i32
    %c0_i32_1 = arith.constant 0 : i32
    return %arg0, %c0_i32, %c0_i32_0 : i32, i32, i32
  }
  func.func @transform_1(%arg0: i32) -> (i32, i32, i32) {
    %c0_i32 = arith.constant 0 : i32
    %c0_i32_0 = arith.constant 0 : i32
    %c0_i32_1 = arith.constant 0 : i32
    return %arg0, %c0_i32, %c0_i32_0 : i32, i32, i32
  }
  func.func @transform_2(%arg0: i32) -> (i32, i32, i32) {
    %c0_i32 = arith.constant 0 : i32
    %c0_i32_0 = arith.constant 0 : i32
    %c0_i32_1 = arith.constant 0 : i32
    return %arg0, %c0_i32, %c0_i32_0 : i32, i32, i32
  }
  func.func @transform_3(%arg0: i32) -> (i32, i32) {
    %c0_i32 = arith.constant 0 : i32
    %c0_i32_0 = arith.constant 0 : i32
    %c0_i32_1 = arith.constant 0 : i32
    return %c0_i32, %c0_i32_0 : i32, i32
  }
  func.func @transform_4(%arg0: i32) -> (i32, i32) {
    %c0_i32 = arith.constant 0 : i32
    %c0_i32_0 = arith.constant 0 : i32
    %c0_i32_1 = arith.constant 0 : i32
    return %c0_i32, %c0_i32_0 : i32, i32
  }
  func.func @transform_5(%arg0: i32) -> (i32, i32) {
    %c0_i32 = arith.constant 0 : i32
    %c0_i32_0 = arith.constant 0 : i32
    %c0_i32_1 = arith.constant 0 : i32
    return %c0_i32, %c0_i32_0 : i32, i32
  }
  func.func @transform_6(%arg0: i32) -> (i32, i32) {
    %c0_i32 = arith.constant 0 : i32
    %c0_i32_0 = arith.constant 0 : i32
    %c0_i32_1 = arith.constant 0 : i32
    return %c0_i32, %c0_i32_0 : i32, i32
  }
  func.func @transform_7(%arg0: i32) -> (i32, i32) {
    %c0_i32 = arith.constant 0 : i32
    %c0_i32_0 = arith.constant 0 : i32
    %c0_i32_1 = arith.constant 0 : i32
    return %c0_i32, %c0_i32_0 : i32, i32
  }
  func.func @transform_8(%arg0: i32) -> (i32, i32) {
    %c0_i32 = arith.constant 0 : i32
    %c0_i32_0 = arith.constant 0 : i32
    %c0_i32_1 = arith.constant 0 : i32
    return %c0_i32, %c0_i32_0 : i32, i32
  }
  func.func @transform_9(%arg0: i32) -> (i32, i32) {
    %c0_i32 = arith.constant 0 : i32
    %c0_i32_0 = arith.constant 0 : i32
    %c0_i32_1 = arith.constant 0 : i32
    return %c0_i32, %c0_i32_0 : i32, i32
  }
  func.func @transform_10(%arg0: i32) -> (i32, i32) {
    %c0_i32 = arith.constant 0 : i32
    %c0_i32_0 = arith.constant 0 : i32
    %c0_i32_1 = arith.constant 0 : i32
    return %c0_i32, %c0_i32_0 : i32, i32
  }
  func.func @transform_11(%arg0: i32) -> (i32, i32, i32) {
    %c0_i32 = arith.constant 0 : i32
    %c0_i32_0 = arith.constant 0 : i32
    %c0_i32_1 = arith.constant 0 : i32
    return %arg0, %c0_i32, %c0_i32_0 : i32, i32, i32
  }
  func.func @transform_12(%arg0: i32) -> (i32, i32, i32) {
    %c0_i32 = arith.constant 0 : i32
    %c0_i32_0 = arith.constant 0 : i32
    %c0_i32_1 = arith.constant 0 : i32
    return %arg0, %c0_i32, %c0_i32_0 : i32, i32, i32
  }
  func.func @transform_13(%arg0: i32) -> (i32, i32, i32) {
    %c0_i32 = arith.constant 0 : i32
    %c0_i32_0 = arith.constant 0 : i32
    %c0_i32_1 = arith.constant 0 : i32
    return %arg0, %c0_i32, %c0_i32_0 : i32, i32, i32
  }
  func.func @transform_14(%arg0: i32) -> (i32, i32, i32) {
    %c0_i32 = arith.constant 0 : i32
    %c0_i32_0 = arith.constant 0 : i32
    %c0_i32_1 = arith.constant 0 : i32
    return %arg0, %c0_i32, %c0_i32_0 : i32, i32, i32
  }
}

</mosaic_0001>

<bundles_post_ra>
// kernel: apnet_bwe_forward.5
= control target key start
LH: loop header
LB: loop body
LE: loop exit
PB: predicated region body
PF: predicated region fallthrough
CT: control target
= control target key end

     0   :  { %s1306_s29 = smov 0   ;;  %s1479_s0 = inlined_call_operand.vmem [shape: f32[2,16,64], index: 0, kind: input, shape index: {}]   ;;  %s1480_s1 = inlined_call_operand.vmem [shape: f32[2,16,64], index: 1, kind: input, shape index: {}]   ;;  %s1481_s2 = inlined_call_operand.vmem [shape: f32[2,16,128], index: 2, kind: input, shape index: {}]   ;;  %s1482_s3 = inlined_call_operand.vmem [shape: f32[1,64], index: 3, kind: input, shape index: {}]   ;;  %s1483_s4 = inlined_call_operand.vmem [shape: f32[1,64], index: 4, kind: input, shape index: {}]   ;;  %s1484_s5 = inlined_call_operand.vmem [shape: f32[1,64], index: 5, kind: input, shape index: {}]   ;;  %s1485_s6 = inlined_call_operand.vmem [shape: f32[1,64], index: 6, kind: input, shape index: {}]   ;;  %s1486_s7 = inlined_call_operand.vmem [shape: bf16[64,128], index: 7, kind: input, shape index: {}]   ;;  %s1487_s8 = inlined_call_operand.vmem [shape: f32[1,128], index: 8, kind: input, shape index: {}]   ;;  %s1488_s9 = inlined_call_operand.vmem [shape: bf16[64,256], index: 9, kind: input, shape index: {}]   ;;  %s1489_s10 = inlined_call_operand.vmem [shape: f32[1,256], index: 10, kind: input, shape index: {}]   ;;  %s1490_s11 = inlined_call_operand.vmem [shape: f32[2,16,128], index: 11, kind: output, shape index: {0}]   ;;  %s1491_s12 = inlined_call_operand.vmem [shape: f32[2,16,128], index: 12, kind: output, shape index: {1}]   ;;  %s1492_s13 = inlined_call_operand.vmem [shape: f32[2,16,128], index: 13, kind: output, shape index: {2}]   ;;  %s1493_s14 = inlined_call_operand.vmem [shape: f32[2,16,128], index: 14, kind: output, shape index: {3}]  }
   0x1 LB: > { %s1105_s30 = sadd.s32 4294967295, %s1226_s29   ;;  %p1109_p0 = scmp.ge.s32.totalorder %s1226_s29, 1  ;;  %s1226_s29 = sphi %s1306_s29, %s25_s29  }
   0x2   : > { %p439_p1 = scmp.lt.s32.totalorder %s1226_s29, 3 }
   0x4   : > { %p440_p2 = pnand %p1109_p0, %p439_p1 }
   0x5   : > { %p510_p3 = scmp.lt.s32.totalorder (!%p440_p2), %s1105_s30, 1 }
   0x6   : > { %443 = sbr.rel (%p440_p2) target bundleno = 587 (0x24b), region = 64 }
   0xb   : > { %s1495_s30 = smov (!%p510_p3, %s1105_s30), 1  ;;  %vm550_vm0 = vcmask 523264   ;;  %v1184_v28 = vld [vmem:[%s1488_s9 + $0x34] ss:$8 sps:$4 sm:$0xff]   ;;  %v1186_v29 = vld [vmem:[%s1488_s9 + $0x30] ss:$8 sps:$4 sm:$0xff]  }
   0xc   : > { %s1314_s15 = sshll.u32 %s1495_s30, 4  ;;  %v1189_v30 = vld [vmem:[%s1486_s7 + $0x18] sm:$0xff]   ;;  %v1228_v31 = vmov 0.0   ;;  %v1187_v32 = vld [vmem:[%s1488_s9 + $0x24] ss:$8 sps:$4 sm:$0xff]   ;;  %802 = vmatprep.subr.bf16.mxu1 %v1184_v28  ;;  %v1193_v33 = vld [vmem:[%s1486_s7 + $0x10] sm:$0xff]  }
   0xd   : > { %s519_s18 = scalar_lea.vmem %s1480_s1, %s1314_s15  ;;  %s514_s21 = scalar_lea.vmem %s1479_s0, %s1314_s15  ;;  %1161 = vmatprep.subr.bf16.mxu0 %v1228_v31  ;;  %803 = vmatpush1.bf16.msra.mxu1 %v1186_v29  ;;  %v1190_v34 = vld [vmem:[%s1488_s9 + $0x20] ss:$8 sps:$4 sm:$0xff]   ;;  %v1191_v35 = vld [vmem:[%s1488_s9 + $0x14] ss:$8 sps:$4 sm:$0xff]   ;;  %v1229_v36 = vmov 0   ;;  %vm1230_vm1 = vmmov 0  }
   0xe   : > { %v594_v0 = vld [vmem:[%s519_s18] sm:$0xff]  ;;  %v595_v1 = vld [vmem:[%s519_s18 + $0x8] sm:$0xff]  ;;  %1162 = vmatpush3.bf16.msra.mxu0 %v1189_v30  ;;  %804 = vmatprep.subr.bf16.mxu1 %v1187_v32  ;;  %v1194_v38 = vld [vmem:[%s1488_s9 + $0x10] ss:$8 sps:$4 sm:$0xff]   ;;  %s524_s16 = scalar_lea.vmem %s1481_s2, %s1314_s15  ;;  %s544_s24 = scalar_lea.vmem %s1493_s14, %s1314_s15 }
   0xf   : > { %v546_v2 = vld [vmem:[%s514_s21] sm:$0xff]  ;;  %v598_v3 = vsel %vm550_vm0, %v594_v0, 0.0  ;;  %v547_v5 = vld [vmem:[%s514_s21 + $0x8] sm:$0xff]  ;;  %v601_v6 = vsel %vm550_vm0, %v595_v1, 0.0  ;;  %1163 = vmatprep.subr.bf16.mxu0 %v1228_v31  ;;  %826 = vmatprep.mubr.bf16.mxu1 %v1229_v36  ;;  %s529_s21 = scalar_lea.vmem %s1490_s11, %s1314_s15  ;;  %s539_s27 = scalar_lea.vmem %s1492_s13, %s1314_s15 }
  0x10   : > { %v551_v4 = vsel %vm550_vm0, %v546_v2, 0.0  ;;  %599 = vadd.xlane.f32.xlu0 %v598_v3  ;;  %v554_v7 = vsel %vm550_vm0, %v547_v5, 0.0  ;;  %v1197_v37 = vld [vmem:[%s1486_s7 + $0x8] sm:$0xff]   ;;  %v1199_v41 = vld [vmem:[%s1486_s7] sm:$0xff]   ;;  %1169 = vmatprep.mubr.msk.bf16.mxu0 %vm1230_vm1, %v1228_v31 }
  0x11   : > { %552 = vadd.xlane.f32.xlu1 %v551_v4  ;;  %805 = vmatpush1.bf16.msra.mxu1 %v1190_v34  ;;  %v1195_v39 = vld [vmem:[%s1488_s9 + $0x4] ss:$8 sps:$4 sm:$0xff]   ;;  %v1198_v40 = vld [vmem:[%s1488_s9] ss:$8 sps:$4 sm:$0xff]  }
  0x12   : > { %1164 = vmatpush3.bf16.msra.mxu0 %v1193_v33  ;;  %806 = vmatprep.subr.bf16.mxu1 %v1191_v35  ;;  %v1126_v56 = vld [vmem:[%s1484_s5] ss:$0 sm:$0xff] }
  0x13   : > { %1165 = vmatprep.subr.bf16.mxu0 %v1228_v31  ;;  %v1124_v62 = vld [vmem:[%s1482_s3] ss:$0 sm:$0xff] }
  0x14   : > { %602 = vadd.xlane.f32.xlu0 %v601_v6  ;;  %v1127_v63 = vld [vmem:[%s1485_s6] ss:$0 sm:$0xff] }
  0x15   : > { %555 = vadd.xlane.f32.xlu1 %v554_v7  ;;  %807 = vmatpush1.bf16.msra.mxu1 %v1194_v38  ;;  %v1125_v6 = vld [vmem:[%s1483_s4] ss:$0 sm:$0xff]  ;;  %v641_v38 = vld [vmem:[%s524_s16 + $0x8] sm:$0xff] }
  0x16   : > { %1166 = vmatpush3.bf16.msra.mxu0 %v1197_v37  ;;  %808 = vmatprep.subr.bf16.mxu1 %v1195_v39 }
  0x17   : > { %1167 = vmatprep.subr.bf16.mxu0 %v1228_v31 }
  0x19   : > { %809 = vmatpush1.bf16.msra.mxu1 %v1198_v40 }
  0x1a   : > { %1168 = vmatpush3.bf16.msra.mxu0 %v1199_v41 }
  0x99   : > { %v600_v8 = vpop.xlane.xlu0 %599 }
  0x9a   : > { %v553_v9 = vpop.xlane.xlu1 %552  ;;  %v604_v10 = vmul.f32 0.015625, %v600_v8 }
  0x9b   : > { %v558_v11 = vmul.f32 0.015625, %v553_v9 }
  0x9c   : > { %v1328_v12 = vsub.f32 %v594_v0, %v604_v10 }
  0x9d   : > { %v1330_v13 = vsub.f32 %v546_v2, %v558_v11  ;;  %v603_v14 = vpop.xlane.xlu0 %602 }
  0x9e   : > { %v556_v15 = vpop.xlane.xlu1 %555  ;;  %v605_v16 = vmul.f32 0.015625, %v603_v14  ;;  %v608_v17 = vmul.f32 %v1328_v12, %v1328_v12 }
  0x9f   : > { %v559_v18 = vmul.f32 0.015625, %v556_v15  ;;  %v562_v19 = vmul.f32 %v1330_v13, %v1330_v13  ;;  %v739_v15 = vld [vmem:[%s1489_s10] sm:$0x3] }
  0xa0   : > { %v1336_v20 = vsub.f32 %v595_v1, %v605_v16  ;;  %v610_v21 = vsel %vm550_vm0, %v608_v17, 0.0 }
  0xa1   : > { %v1339_v22 = vsub.f32 %v547_v5, %v559_v18  ;;  %611 = vadd.xlane.f32.xlu0 %v610_v21  ;;  %v564_v24 = vsel %vm550_vm0, %v562_v19, 0.0  ;;  %v640_v21 = vld [vmem:[%s524_s16] sm:$0xff]  ;;  %s534_s16 = scalar_lea.vmem %s1491_s12, %s1314_s15 }
  0xa2   : > { %v609_v23 = vmul.f32 %v1336_v20, %v1336_v20 }
  0xa3   : > { %v563_v25 = vmul.f32 %v1339_v22, %v1339_v22 }
  0xa4   : > { %v613_v26 = vsel %vm550_vm0, %v609_v23, 0.0 }
  0xa5   : > { %614 = vadd.xlane.f32.xlu1 %v613_v26  ;;  %565 = vadd.xlane.f32.xlu0 %v564_v24  ;;  %v567_v27 = vsel %vm550_vm0, %v563_v25, 0.0  ;;  %v1133_v25 = vld [vmem:[%s1487_s8] ss:$0 sm:$0xff] }
  0xa9   : > { %568 = vadd.xlane.f32.xlu1 %v567_v27 }
 0x12a   : > { %v612_v42 = vpop.xlane.xlu0 %611 }
 0x12b   : > { %v616_v43 = vmul.f32 0.015625, %v612_v42 }
 0x12d   : > { %v618_v44 = vadd.f32 1e-06, %v616_v43 }
 0x12e   : > { %v566_v45 = vpop.xlane.xlu0 %565  ;;  %v615_v46 = vpop.xlane.xlu1 %614 }
 0x12f   : > { %1200 = vrsqrt.f32 %v618_v44  ;;  %v570_v47 = vmul.f32 0.015625, %v566_v45  ;;  %v617_v48 = vmul.f32 0.015625, %v615_v46 }
 0x131   : > { %v572_v49 = vadd.f32 1e-06, %v570_v47  ;;  %v619_v50 = vadd.f32 1e-06, %v617_v48 }
 0x132   : > { %v569_v51 = vpop.xlane.xlu1 %568 }
 0x133   : > { %1202 = vrsqrt.f32 %v572_v49  ;;  %v571_v52 = vmul.f32 0.015625, %v569_v51 }
 0x134   : > { %1204 = vrsqrt.f32 %v619_v50 }
 0x135   : > { %v573_v53 = vadd.f32 1e-06, %v571_v52 }
 0x137   : > { %1206 = vrsqrt.f32 %v573_v53 }
 0x13c   : > { %v1201_v54 = vpop.eup %1200 }
 0x13d   : > { %v622_v55 = vmul.f32 %v1201_v54, %v1328_v12  ;;  %v741_v12 = vlaneseq }
 0x13f   : > { %v630_v61 = vmul.f32 %v1126_v56, %v622_v55 }
 0x140   : > { %v1203_v57 = vpop.eup %1202 }
 0x141   : > { %v1205_v58 = vpop.eup %1204  ;;  %v576_v59 = vmul.f32 %v1203_v57, %v1330_v13  ;;  %v638_v4 = vadd.f32 %v1127_v63, %v630_v61  ;;  %v742_v13 = vshrl.u32 %v741_v12, 7 }
 0x142   : > { %v623_v60 = vmul.f32 %v1205_v58, %v1336_v20 }
 0x143   : > { %v584_v3 = vmul.f32 %v1124_v62, %v576_v59  ;;  %v743_v14 = vsub.s32 0, %v742_v13  ;;  %v747_v16 = vsub.s32 1, %v742_v13 }
 0x144   : > { %v1207_v0 = vpop.eup %1206  ;;  %v631_v1 = vmul.f32 %v1126_v56, %v623_v60 }
 0x145   : > { %v577_v2 = vmul.f32 %v1207_v0, %v1339_v22  ;;  %v592_v9 = vadd.f32 %v1125_v6, %v584_v3  ;;  %v744_v17 = vrot.slane %v739_v15, %v743_v14  ;;  %v748_v18 = vrot.slane %v739_v15, %v747_v16 }
 0x146   : > { %v639_v5 = vadd.f32 %v1127_v63, %v631_v1 }
 0x147   : > { %v585_v7 = vmul.f32 %v1124_v62, %v577_v2 }
 0x148   : > { %v730_v8 = vpack.c.bf16 %v639_v5, %v638_v4 }
 0x149   : > { %v593_v10 = vadd.f32 %v1125_v6, %v585_v7 }
 0x14a   : > { %1142 = vmatmul.mubr.msk.bf16.vlgmr.msra.gmra.mxu1 %vm550_vm0, %v730_v8 }
 0x14b   : > { %v642_v11 = vpack.c.bf16 %v593_v10, %v592_v9 }
 0x14d   : > { %1170 = vmatmul.mubr.msk.bf16.vlgmr.msra.gmra.mxu0 %vm550_vm0, %v642_v11 }
 0x20a   : > { %v828_v19 = vpop.f32.mrf.mxu1 }
 0x20b   : > { %v1409_v20 = vadd.f32 %v828_v19, %v744_v17 }
 0x20c   : > { %v830_v22 = vpop.f32.mrf.mxu1 }
 0x20d   : > { %v1411_v23 = vadd.f32 %v830_v22, %v748_v18  ;;  %v712_v24 = vpop.f32.mrf.mxu0  ;;  %v837_v28 = vmul.f32 %v1409_v20, %v1409_v20  ;;  %v1419_v29 = vand.u32 2147483647, %v1409_v20  ;;  %vm905_vm5 = vcmp.lt.f32.partialorder %v1409_v20, 0.0 }
 0x20e   : > { %v719_v26 = vadd.f32 %v712_v24, %v640_v21  ;;  %v832_v27 = vpop.f32.mrf.mxu1 }
 0x20f   : > { %v839_v30 = vmul.f32 %v1411_v23, %v1411_v23  ;;  %v1424_v31 = vand.u32 2147483647, %v1411_v23  ;;  %v1171_v32 = vpop.f32.mrf.mxu0  ;;  %v1430_v34 = vadd.f32 %v832_v27, %v744_v17  ;;  %vm911_vm6 = vcmp.lt.f32.partialorder %v1411_v23, 0.0 }
 0x210   : > { %v728_v33 = vadd.f32 %v1133_v25, %v719_v26  ;;  %v834_v35 = vpop.f32.mrf.mxu1 }
 0x211   : > { %v841_v36 = vadd.f32 %v839_v30, %v837_v28  ;;  %v865_v37 = vmax.f32 %v1419_v29, %v1424_v31  ;;  %v715_v39 = vpop.f32.mrf.mxu0  ;;  %v1434_v42 = vadd.f32 %v834_v35, %v748_v18  ;;  %v838_v44 = vmul.f32 %v1430_v34, %v1430_v34 }
 0x212   : > { %v855_v40 = vmul.f32 1.442695, %v728_v33  ;;  %859 = vst [vmem:[%s529_s21] sm:$0xff] %v728_v33  ;;  %v720_v45 = vadd.f32 %v715_v39, %v641_v38  ;;  %v1439_v46 = vand.u32 2147483647, %v1430_v34  ;;  %v867_v57 = vmin.f32 %v1419_v29, %v1424_v31 }
 0x213   : > { %1208 = vrsqrt.f32 %v841_v36  ;;  %v869_v41 = vmax.f32 %v865_v37, 1e-30  ;;  %v1172_v43 = vpop.f32.mrf.mxu0  ;;  %v840_v47 = vmul.f32 %v1434_v42, %v1434_v42  ;;  %v1444_v48 = vand.u32 2147483647, %v1434_v42 }
 0x214   : > { %1210 = vpow2.f32 %v855_v40  ;;  %v729_v49 = vadd.f32 %v1133_v25, %v720_v45  ;;  %vm843_vm2 = vcmp.gt.f32.partialorder %v841_v36, 0.0  ;;  %vm899_vm4 = vcmp.gt.f32.partialorder %v1424_v31, %v1419_v29 }
 0x215   : > { %1212 = vrcp.f32 %v869_v41  ;;  %v842_v50 = vadd.f32 %v840_v47, %v838_v44  ;;  %v866_v51 = vmax.f32 %v1439_v46, %v1444_v48  ;;  %v868_v6 = vmin.f32 %v1439_v46, %v1444_v48 }
 0x216   : > { %v857_v52 = vmul.f32 1.442695, %v729_v49  ;;  %860 = vst [vmem:[%s529_s21 + $0x8] sm:$0xff] %v729_v49  ;;  %vm900_vm7 = vcmp.gt.f32.partialorder %v1444_v48, %v1439_v46  ;;  %vm906_vm8 = vcmp.lt.f32.partialorder %v1430_v34, 0.0  ;;  %vm912_vm9 = vcmp.lt.f32.partialorder %v1434_v42, 0.0 }
 0x217   : > { %1214 = vrsqrt.f32 %v842_v50  ;;  %v870_v53 = vmax.f32 %v866_v51, 1e-30  ;;  %vm844_vm3 = vcmp.gt.f32.partialorder %v842_v50, 0.0 }
 0x218   : > { %1216 = vpow2.f32 %v857_v52 }
 0x219   : > { %1218 = vrcp.f32 %v870_v53 }
 0x220   : > { %v1209_v54 = vpop.eup %1208 }
 0x221   : > { %v1211_v55 = vpop.eup %1210  ;;  %v847_v56 = vsel %vm843_vm2, %v1209_v54, 0.0 }
 0x222   : > { %v1213_v58 = vpop.eup %1212  ;;  %v849_v59 = vmul.f32 %v847_v56, %v1409_v20  ;;  %v853_v60 = vmul.f32 %v847_v56, %v1411_v23 }
 0x223   : > { %v872_v61 = vmul.f32 %v1213_v58, %v867_v57 }
 0x224   : > { %v851_v62 = vsel %vm843_vm2, %v849_v59, 1.0  ;;  %v923_v63 = vmul.f32 %v1211_v55, %v853_v60  ;;  %v1215_v2 = vpop.eup %1214 }
 0x225   : > { %v875_v0 = vmul.f32 %v872_v61, %v872_v61  ;;  %v919_v1 = vmul.f32 %v1211_v55, %v851_v62  ;;  %v1217_v3 = vpop.eup %1216  ;;  %v848_v5 = vsel %vm844_vm3, %v1215_v2, 0.0 }
 0x226   : > { %925 = vst [vmem:[%s544_s24] sm:$0xff] %v923_v63  ;;  %v1219_v7 = vpop.eup %1218  ;;  %v850_v8 = vmul.f32 %v848_v5, %v1430_v34  ;;  %v854_v9 = vmul.f32 %v848_v5, %v1434_v42 }
 0x227   : > { %v877_v4 = vmul.f32 -0.0117212, %v875_v0  ;;  %921 = vst [vmem:[%s539_s27] sm:$0xff] %v919_v1  ;;  %v874_v11 = vmul.f32 %v1219_v7, %v868_v6 }
 0x228   : > { %v852_v12 = vsel %vm844_vm3, %v850_v8, 1.0  ;;  %v924_v13 = vmul.f32 %v1217_v3, %v854_v9 }
 0x229   : > { %v879_v10 = vadd.f32 0.05265332, %v877_v4  ;;  %v876_v15 = vmul.f32 %v874_v11, %v874_v11  ;;  %v920_v16 = vmul.f32 %v1217_v3, %v852_v12 }
 0x22a   : > { %926 = vst [vmem:[%s544_s24 + $0x8] sm:$0xff] %v924_v13 }
 0x22b   : > { %v881_v14 = vmul.f32 %v879_v10, %v875_v0  ;;  %v878_v18 = vmul.f32 -0.0117212, %v876_v15  ;;  %922 = vst [vmem:[%s539_s27 + $0x8] sm:$0xff] %v920_v16 }
 0x22d   : > { %v1143_v17 = vadd.f32 -0.11643287, %v881_v14  ;;  %v880_v21 = vadd.f32 0.05265332, %v878_v18 }
 0x22f   : > { %v885_v19 = vmul.f32 %v1143_v17, %v875_v0  ;;  %v882_v24 = vmul.f32 %v880_v21, %v876_v15 }
 0x231   : > { %v887_v22 = vadd.f32 0.19354346, %v885_v19  ;;  %v1144_v26 = vadd.f32 -0.11643287, %v882_v24 }
 0x233   : > { %v889_v25 = vmul.f32 %v887_v22, %v875_v0  ;;  %v886_v28 = vmul.f32 %v1144_v26, %v876_v15 }
 0x235   : > { %v1145_v27 = vadd.f32 -0.33262348, %v889_v25  ;;  %v888_v32 = vadd.f32 0.19354346, %v886_v28 }
 0x237   : > { %v893_v30 = vmul.f32 %v1145_v27, %v875_v0  ;;  %v890_v35 = vmul.f32 %v888_v32, %v876_v15 }
 0x239   : > { %v895_v33 = vadd.f32 0.99997723, %v893_v30  ;;  %v1146_v37 = vadd.f32 -0.33262348, %v890_v35 }
 0x23b   : > { %v897_v36 = vmul.f32 %v895_v33, %v872_v61  ;;  %v894_v39 = vmul.f32 %v1146_v37, %v876_v15 }
 0x23d   : > { %v901_v38 = vsub.f32 1.5707964, %v897_v36  ;;  %v896_v41 = vadd.f32 0.99997723, %v894_v39 }
 0x23f   : > { %v903_v40 = vsel %vm899_vm4, %v901_v38, %v897_v36  ;;  %v898_v44 = vmul.f32 %v896_v41, %v874_v11 }
 0x240   : > { %v907_v43 = vsub.f32 3.1415927, %v903_v40 }
 0x241   : > { %v902_v49 = vsub.f32 1.5707964, %v898_v44 }
 0x242   : > { %v909_v45 = vsel %vm905_vm5, %v907_v43, %v903_v40 }
 0x243   : > { %v913_v47 = vsub.f32 0.0, %v909_v45  ;;  %v904_v29 = vsel %vm900_vm7, %v902_v49, %v898_v44 }
 0x244   : > { %v908_v31 = vsub.f32 3.1415927, %v904_v29 }
 0x245   : > { %v915_v50 = vsel %vm911_vm6, %v913_v47, %v909_v45 }
 0x246   : > { %917 = vst [vmem:[%s534_s16] sm:$0xff] %v915_v50  ;;  %v910_v20 = vsel %vm906_vm8, %v908_v31, %v904_v29 }
 0x247   : > { %v914_v51 = vsub.f32 0.0, %v910_v20 }
 0x249   : > { %v916_v52 = vsel %vm912_vm9, %v914_v51, %v910_v20 }
 0x24a   : > { %918 = vst [vmem:[%s534_s16 + $0x8] sm:$0xff] %v916_v52 }
 0x24b PF: > { %s25_s29 = sadd.s32 1, %s1226_s29  }
 0x24c   : > { %p22_p4 = scmp.ge.s32.totalorder %s25_s29, 4  }
 0x24e   :  { %24 = sbr.rel (!%p22_p4) target bundleno = 1 (0x1), region = 136 }

// kernel: apnet_bwe_forward.3
= control target key start
LH: loop header
LB: loop body
LE: loop exit
PB: predicated region body
PF: predicated region fallthrough
CT: control target
= control target key end

     0   :  { %s1218_s17 = smov 0   ;;  %s1377_s0 = inlined_call_operand.vmem [shape: bf16[2,16,256], index: 0, kind: input, shape index: {}]   ;;  %s1378_s1 = inlined_call_operand.vmem [shape: bf16[2,16,256], index: 1, kind: input, shape index: {}]   ;;  %s1379_s2 = inlined_call_operand.vmem [shape: bf16[256,64], index: 2, kind: input, shape index: {}]   ;;  %s1380_s3 = inlined_call_operand.vmem [shape: f32[1,64], index: 3, kind: input, shape index: {}]   ;;  %s1381_s4 = inlined_call_operand.vmem [shape: f32[1,64], index: 4, kind: input, shape index: {}]   ;;  %s1382_s5 = inlined_call_operand.vmem [shape: f32[1,64], index: 5, kind: input, shape index: {}]   ;;  %s1383_s6 = inlined_call_operand.vmem [shape: bf16[256,64], index: 6, kind: input, shape index: {}]   ;;  %s1384_s7 = inlined_call_operand.vmem [shape: f32[1,64], index: 7, kind: input, shape index: {}]   ;;  %s1385_s8 = inlined_call_operand.vmem [shape: f32[1,64], index: 8, kind: input, shape index: {}]   ;;  %s1386_s9 = inlined_call_operand.vmem [shape: f32[1,64], index: 9, kind: input, shape index: {}]   ;;  %s1387_s10 = inlined_call_operand.vmem [shape: f32[2,16,64], index: 10, kind: output, shape index: {0}]   ;;  %s1388_s11 = inlined_call_operand.vmem [shape: f32[2,16,64], index: 11, kind: output, shape index: {1}]  }
   0x1 LB: > { %s991_s18 = sadd.s32 4294967295, %s1156_s17   ;;  %p995_p0 = scmp.ge.s32.totalorder %s1156_s17, 1  ;;  %s1156_s17 = sphi %s1218_s17, %s22_s17  }
   0x2   : > { %p350_p1 = scmp.lt.s32.totalorder %s1156_s17, 3 }
   0x4   : > { %p351_p2 = pnand %p995_p0, %p350_p1 }
   0x5   : > { %p400_p3 = scmp.lt.s32.totalorder (!%p351_p2), %s991_s18, 1 }
   0x6   : > { %354 = sbr.rel (%p351_p2) target bundleno = 561 (0x231), region = 60 }
   0xb   : > { %v1104_v0 = vld [vmem:[%s1379_s2 + $0x78] sm:$0xff]   ;;  %v1108_v4 = vld [vmem:[%s1379_s2 + $0x70] sm:$0xff]   ;;  %v1112_v8 = vld [vmem:[%s1379_s2 + $0x68] sm:$0xff]   ;;  %s1390_s18 = smov (!%p400_p3, %s991_s18), 1  ;;  %vm611_vm0 = vcmask 523264  }
   0xc   : > { %v1105_v1 = vld [vmem:[%s1383_s6 + $0x78] sm:$0xff]   ;;  %1052 = vmatprep.subr.bf16.mxu0 %v1104_v0  ;;  %v1109_v5 = vld [vmem:[%s1383_s6 + $0x70] sm:$0xff]   ;;  %v1113_v9 = vld [vmem:[%s1383_s6 + $0x68] sm:$0xff]   ;;  %s1311_s22 = sshll.u32 %s1390_s18, 4 }
   0xd   : > { %v1106_v2 = vld [vmem:[%s1379_s2 + $0x38] sm:$0xff]   ;;  %1074 = vmatprep.subr.bf16.mxu1 %v1105_v1  ;;  %v1110_v6 = vld [vmem:[%s1379_s2 + $0x30] sm:$0xff]   ;;  %v1114_v10 = vld [vmem:[%s1379_s2 + $0x28] sm:$0xff]   ;;  %s404_s30 = scalar_lea.vmem %s1377_s0, %s1311_s22  ;;  %s409_s20 = scalar_lea.vmem %s1378_s1, %s1311_s22 }
   0xe   : > { %v1107_v3 = vld [vmem:[%s1383_s6 + $0x38] sm:$0xff]   ;;  %1053 = vmatpush3.bf16.msra.mxu0 %v1106_v2  ;;  %v1111_v7 = vld [vmem:[%s1383_s6 + $0x30] sm:$0xff]   ;;  %v1115_v11 = vld [vmem:[%s1383_s6 + $0x28] sm:$0xff]   ;;  %s414_s12 = scalar_lea.vmem %s1387_s10, %s1311_s22  ;;  %s419_s21 = scalar_lea.vmem %s1388_s11, %s1311_s22 }
   0xf   : > { %1075 = vmatpush3.bf16.msra.mxu1 %v1107_v3  ;;  %1054 = vmatprep.subr.bf16.mxu0 %v1108_v4  ;;  %v1116_v12 = vld [vmem:[%s1379_s2 + $0x60] sm:$0xff]   ;;  %v1120_v16 = vld [vmem:[%s1379_s2 + $0x58] sm:$0xff]   ;;  %v1124_v20 = vld [vmem:[%s1379_s2 + $0x50] sm:$0xff]  }
  0x10   : > { %1076 = vmatprep.subr.bf16.mxu1 %v1109_v5  ;;  %v1117_v13 = vld [vmem:[%s1383_s6 + $0x60] sm:$0xff]   ;;  %v1121_v17 = vld [vmem:[%s1383_s6 + $0x58] sm:$0xff]   ;;  %v1125_v21 = vld [vmem:[%s1383_s6 + $0x50] sm:$0xff]  }
  0x11   : > { %v1118_v14 = vld [vmem:[%s1379_s2 + $0x20] sm:$0xff]   ;;  %v1122_v18 = vld [vmem:[%s1379_s2 + $0x18] sm:$0xff]   ;;  %v1126_v22 = vld [vmem:[%s1379_s2 + $0x10] sm:$0xff]  }
  0x12   : > { %1055 = vmatpush3.bf16.msra.mxu0 %v1110_v6  ;;  %v1119_v15 = vld [vmem:[%s1383_s6 + $0x20] sm:$0xff]   ;;  %v1123_v19 = vld [vmem:[%s1383_s6 + $0x18] sm:$0xff]   ;;  %v1127_v23 = vld [vmem:[%s1383_s6 + $0x10] sm:$0xff]  }
  0x13   : > { %1077 = vmatpush3.bf16.msra.mxu1 %v1111_v7  ;;  %1056 = vmatprep.subr.bf16.mxu0 %v1112_v8  ;;  %v1128_v24 = vld [vmem:[%s1379_s2 + $0x48] sm:$0xff]   ;;  %v1132_v28 = vld [vmem:[%s1379_s2 + $0x40] sm:$0xff]  }
  0x14   : > { %1078 = vmatprep.subr.bf16.mxu1 %v1113_v9  ;;  %v1129_v25 = vld [vmem:[%s1383_s6 + $0x48] sm:$0xff]   ;;  %v1133_v29 = vld [vmem:[%s1383_s6 + $0x40] sm:$0xff]  }
  0x15   : > { %v1130_v26 = vld [vmem:[%s1379_s2 + $0x8] sm:$0xff]   ;;  %v1134_v30 = vld [vmem:[%s1379_s2] sm:$0xff]  }
  0x16   : > { %1057 = vmatpush3.bf16.msra.mxu0 %v1114_v10  ;;  %v1131_v27 = vld [vmem:[%s1383_s6 + $0x8] sm:$0xff]   ;;  %v1135_v31 = vld [vmem:[%s1383_s6] sm:$0xff]  }
  0x17   : > { %1079 = vmatpush3.bf16.msra.mxu1 %v1115_v11  ;;  %1058 = vmatprep.subr.bf16.mxu0 %v1116_v12  ;;  %v1136_v32 = vld [vmem:[%s404_s30] ss:$8 sps:$4 sm:$0xff]   ;;  %v1138_v33 = vld [vmem:[%s404_s30 + $0x4] ss:$8 sps:$4 sm:$0xff]  }
  0x18   : > { %1080 = vmatprep.subr.bf16.mxu1 %v1117_v13  ;;  %v1139_v34 = vld [vmem:[%s409_s20] ss:$8 sps:$4 sm:$0xff]   ;;  %v1141_v35 = vld [vmem:[%s409_s20 + $0x4] ss:$8 sps:$4 sm:$0xff]   ;;  %600 = vmatprep.mubr.bf16.mxu0 %v1138_v33 }
  0x19   : > { %836 = vmatprep.mubr.bf16.mxu1 %v1141_v35  ;;  %v1004_v39 = vld [vmem:[%s1380_s3] ss:$0 sm:$0xff] }
  0x1a   : > { %1059 = vmatpush3.bf16.msra.mxu0 %v1118_v14  ;;  %v1025_v42 = vld [vmem:[%s1384_s7] ss:$0 sm:$0xff] }
  0x1b   : > { %1081 = vmatpush3.bf16.msra.mxu1 %v1119_v15  ;;  %1060 = vmatprep.subr.bf16.mxu0 %v1120_v16  ;;  %v1044_v35 = vld [vmem:[%s1385_s8] ss:$0 sm:$0xff] }
  0x1c   : > { %1082 = vmatprep.subr.bf16.mxu1 %v1121_v17 }
  0x1e   : > { %1061 = vmatpush3.bf16.msra.mxu0 %v1122_v18 }
  0x1f   : > { %1083 = vmatpush3.bf16.msra.mxu1 %v1123_v19  ;;  %1062 = vmatprep.subr.bf16.mxu0 %v1124_v20 }
  0x20   : > { %1084 = vmatprep.subr.bf16.mxu1 %v1125_v21 }
  0x22   : > { %1063 = vmatpush3.bf16.msra.mxu0 %v1126_v22 }
  0x23   : > { %1085 = vmatpush3.bf16.msra.mxu1 %v1127_v23  ;;  %1064 = vmatprep.subr.bf16.mxu0 %v1128_v24 }
  0x24   : > { %1086 = vmatprep.subr.bf16.mxu1 %v1129_v25 }
  0x26   : > { %1065 = vmatpush3.bf16.msra.mxu0 %v1130_v26 }
  0x27   : > { %1087 = vmatpush3.bf16.msra.mxu1 %v1131_v27  ;;  %1066 = vmatprep.subr.bf16.mxu0 %v1132_v28  ;;  %v1023_v27 = vld [vmem:[%s1381_s4] ss:$0 sm:$0xff] }
  0x28   : > { %1088 = vmatprep.subr.bf16.mxu1 %v1133_v29  ;;  %v1024_v29 = vld [vmem:[%s1382_s5] ss:$0 sm:$0xff] }
  0x2a   : > { %1067 = vmatpush3.bf16.msra.mxu0 %v1134_v30 }
  0x2b   : > { %1089 = vmatpush3.bf16.msra.mxu1 %v1135_v31 }
  0x2d   : > { %601 = vmatmul.mubr.bf16.vlgmr.msra.gmra.mxu0 %v1136_v32 }
  0x2e   : > { %837 = vmatmul.mubr.bf16.vlgmr.msra.gmra.mxu1 %v1139_v34 }
  0xed   : > { %v1068_v36 = vpop.f32.mrf.mxu0 }
  0xee   : > { %v1090_v37 = vpop.f32.mrf.mxu1 }
  0xef   : > { %v1069_v38 = vpop.f32.mrf.mxu0 }
  0xf0   : > { %v1070_v40 = vadd.f32 %v1069_v38, %v1068_v36  ;;  %v1091_v41 = vpop.f32.mrf.mxu1  ;;  %v1045_v38 = vld [vmem:[%s1386_s9] ss:$0 sm:$0xff] }
  0xf1   : > { %v1092_v43 = vadd.f32 %v1091_v41, %v1090_v37  ;;  %v1071_v44 = vpop.f32.mrf.mxu0 }
  0xf2   : > { %v1093_v45 = vpop.f32.mrf.mxu1  ;;  %v603_v46 = vadd.f32 %v1070_v40, %v1004_v39 }
  0xf3   : > { %v1072_v47 = vpop.f32.mrf.mxu0  ;;  %v839_v48 = vadd.f32 %v1092_v43, %v1025_v42 }
  0xf4   : > { %v1073_v49 = vadd.f32 %v1072_v47, %v1071_v44  ;;  %v1094_v50 = vpop.f32.mrf.mxu1  ;;  %v612_v51 = vsel %vm611_vm0, %v603_v46, 0.0 }
  0xf5   : > { %v1095_v52 = vadd.f32 %v1094_v50, %v1093_v45  ;;  %v847_v53 = vsel %vm611_vm0, %v839_v48, 0.0  ;;  %613 = vadd.xlane.f32.xlu0 %v612_v51 }
  0xf6   : > { %848 = vadd.xlane.f32.xlu1 %v847_v53  ;;  %v606_v54 = vadd.f32 %v1073_v49, %v1004_v39 }
  0xf7   : > { %v842_v55 = vadd.f32 %v1095_v52, %v1025_v42 }
  0xf8   : > { %v615_v56 = vsel %vm611_vm0, %v606_v54, 0.0 }
  0xf9   : > { %v850_v57 = vsel %vm611_vm0, %v842_v55, 0.0  ;;  %616 = vadd.xlane.f32.xlu0 %v615_v56 }
  0xfa   : > { %851 = vadd.xlane.f32.xlu1 %v850_v57 }
 0x17e   : > { %v614_v58 = vpop.xlane.xlu0 %613 }
 0x17f   : > { %v849_v59 = vpop.xlane.xlu1 %848  ;;  %v619_v60 = vmul.f32 0.015625, %v614_v58 }
 0x180   : > { %v853_v61 = vmul.f32 0.015625, %v849_v59 }
 0x181   : > { %v621_v62 = vsub.f32 %v603_v46, %v619_v60 }
 0x182   : > { %v855_v63 = vsub.f32 %v839_v48, %v853_v61  ;;  %v617_v0 = vpop.xlane.xlu0 %616 }
 0x183   : > { %v852_v1 = vpop.xlane.xlu1 %851  ;;  %v620_v2 = vmul.f32 0.015625, %v617_v0  ;;  %v623_v3 = vmul.f32 %v621_v62, %v621_v62 }
 0x184   : > { %v854_v4 = vmul.f32 0.015625, %v852_v1  ;;  %v857_v7 = vmul.f32 %v855_v63, %v855_v63 }
 0x185   : > { %v622_v5 = vsub.f32 %v606_v54, %v620_v2  ;;  %v625_v6 = vsel %vm611_vm0, %v623_v3, 0.0 }
 0x186   : > { %v856_v8 = vsub.f32 %v842_v55, %v854_v4  ;;  %626 = vadd.xlane.f32.xlu0 %v625_v6  ;;  %v859_v10 = vsel %vm611_vm0, %v857_v7, 0.0 }
 0x187   : > { %v624_v9 = vmul.f32 %v622_v5, %v622_v5 }
 0x188   : > { %v858_v12 = vmul.f32 %v856_v8, %v856_v8 }
 0x189   : > { %v628_v11 = vsel %vm611_vm0, %v624_v9, 0.0 }
 0x18a   : > { %860 = vadd.xlane.f32.xlu0 %v859_v10  ;;  %629 = vadd.xlane.f32.xlu1 %v628_v11  ;;  %v862_v13 = vsel %vm611_vm0, %v858_v12, 0.0 }
 0x18e   : > { %863 = vadd.xlane.f32.xlu1 %v862_v13 }
 0x20f   : > { %v627_v14 = vpop.xlane.xlu0 %626 }
 0x210   : > { %v631_v15 = vmul.f32 0.015625, %v627_v14 }
 0x212   : > { %v633_v16 = vadd.f32 1e-06, %v631_v15 }
 0x213   : > { %v630_v17 = vpop.xlane.xlu1 %629  ;;  %v861_v18 = vpop.xlane.xlu0 %860 }
 0x214   : > { %1142 = vrsqrt.f32 %v633_v16  ;;  %v632_v19 = vmul.f32 0.015625, %v630_v17  ;;  %v865_v20 = vmul.f32 0.015625, %v861_v18 }
 0x216   : > { %v634_v21 = vadd.f32 1e-06, %v632_v19  ;;  %v867_v22 = vadd.f32 1e-06, %v865_v20 }
 0x217   : > { %v864_v23 = vpop.xlane.xlu1 %863 }
 0x218   : > { %1144 = vrsqrt.f32 %v634_v21  ;;  %v866_v24 = vmul.f32 0.015625, %v864_v23 }
 0x219   : > { %1146 = vrsqrt.f32 %v867_v22 }
 0x21a   : > { %v868_v25 = vadd.f32 1e-06, %v866_v24 }
 0x21c   : > { %1148 = vrsqrt.f32 %v868_v25 }
 0x221   : > { %v1143_v26 = vpop.eup %1142 }
 0x222   : > { %v637_v28 = vmul.f32 %v1143_v26, %v621_v62 }
 0x224   : > { %v645_v30 = vmul.f32 %v1023_v27, %v637_v28 }
 0x225   : > { %v1145_v31 = vpop.eup %1144 }
 0x226   : > { %v1147_v32 = vpop.eup %1146  ;;  %v653_v33 = vadd.f32 %v1024_v29, %v645_v30  ;;  %v638_v34 = vmul.f32 %v1145_v31, %v622_v5 }
 0x227   : > { %v871_v36 = vmul.f32 %v1147_v32, %v855_v63 }
 0x228   : > { %655 = vst.msk [vmem:[%s414_s12] sm:$0xff] %vm611_vm0, %v653_v33  ;;  %v646_v37 = vmul.f32 %v1023_v27, %v638_v34 }
 0x229   : > { %v1149_v39 = vpop.eup %1148  ;;  %v879_v40 = vmul.f32 %v1044_v35, %v871_v36 }
 0x22a   : > { %v654_v41 = vadd.f32 %v1024_v29, %v646_v37  ;;  %v872_v42 = vmul.f32 %v1149_v39, %v856_v8 }
 0x22b   : > { %v887_v43 = vadd.f32 %v1045_v38, %v879_v40 }
 0x22c   : > { %656 = vst.msk [vmem:[%s414_s12 + $0x8] sm:$0xff] %vm611_vm0, %v654_v41  ;;  %v880_v44 = vmul.f32 %v1044_v35, %v872_v42 }
 0x22d   : > { %889 = vst.msk [vmem:[%s419_s21] sm:$0xff] %vm611_vm0, %v887_v43 }
 0x22e   : > { %v888_v45 = vadd.f32 %v1045_v38, %v880_v44 }
 0x230   : > { %890 = vst.msk [vmem:[%s419_s21 + $0x8] sm:$0xff] %vm611_vm0, %v888_v45 }
 0x231 PF: > { %s22_s17 = sadd.s32 1, %s1156_s17  }
 0x232   : > { %p19_p4 = scmp.ge.s32.totalorder %s22_s17, 4  }
 0x234   :  { %21 = sbr.rel (!%p19_p4) target bundleno = 1 (0x1), region = 105 }

// kernel: apnet_bwe_forward.4
= control target key start
LH: loop header
LB: loop body
LE: loop exit
PB: predicated region body
PF: predicated region fallthrough
CT: control target
= control target key end

     0   :  { %s2239_s18 = smov 0   ;;  %s2241_s19 = smov 0   ;;  %s2694_s0 = inlined_call_operand.vmem [shape: f32[2,16,64], index: 0, kind: input, shape index: {}]   ;;  %s2695_s1 = inlined_call_operand.vmem [shape: f32[2,16,64], index: 1, kind: input, shape index: {}]   ;;  %s2696_s2 = inlined_call_operand.vmem [shape: f32[2,7,64], index: 2, kind: input, shape index: {}]   ;;  %s2697_s3 = inlined_call_operand.vmem [shape: f32[2,1,64], index: 3, kind: input, shape index: {}]   ;;  %s2698_s4 = inlined_call_operand.vmem [shape: bf16[2,64,192], index: 4, kind: input, shape index: {}]   ;;  %s2699_s5 = inlined_call_operand.vmem [shape: f32[2,1,192], index: 5, kind: input, shape index: {}]   ;;  %s2700_s6 = inlined_call_operand.vmem [shape: bf16[2,192,64], index: 6, kind: input, shape index: {}]   ;;  %s2701_s7 = inlined_call_operand.vmem [shape: f32[2,1,64], index: 7, kind: input, shape index: {}]   ;;  %s2702_s8 = inlined_call_operand.vmem [shape: f32[2,7,64], index: 8, kind: input, shape index: {}]   ;;  %s2703_s9 = inlined_call_operand.vmem [shape: f32[2,1,64], index: 9, kind: input, shape index: {}]   ;;  %s2704_s10 = inlined_call_operand.vmem [shape: bf16[2,64,192], index: 10, kind: input, shape index: {}]   ;;  %s2705_s11 = inlined_call_operand.vmem [shape: f32[2,1,192], index: 11, kind: input, shape index: {}]   ;;  %s2706_s12 = inlined_call_operand.vmem [shape: bf16[2,192,64], index: 12, kind: input, shape index: {}]   ;;  %s2707_s13 = inlined_call_operand.vmem [shape: f32[2,1,64], index: 13, kind: input, shape index: {}]   ;;  %s2708_s14 = inlined_call_operand.vmem [shape: f32[2,16,64], index: 14, kind: output, shape index: {0}]   ;;  %s2709_s15 = inlined_call_operand.vmem [shape: f32[2,16,64], index: 15, kind: output, shape index: {1}]  }
   0x1   :  { %2715 = sst [smem:[#allocation10_spill]] %s2694_s0  ;;  %s2243_s20 = smov 0  }
   0x2   :  { %2716 = sst [smem:[#allocation11_spill]] %s2695_s1  ;;  %s2245_s21 = smov 0  }
   0x3   :  { %2717 = sst [smem:[#allocation12_spill]] %s2696_s2  ;;  %s2247_s22 = smov 0  }
   0x4   :  { %2718 = sst [smem:[#allocation13_spill]] %s2697_s3 }
   0x5   :  { %2719 = sst [smem:[#allocation14_spill]] %s2698_s4 }
   0x6   :  { %2720 = sst [smem:[#allocation15_spill]] %s2699_s5 }
   0x7   :  { %2721 = sst [smem:[#allocation16_spill]] %s2700_s6 }
   0x8   :  { %2722 = sst [smem:[#allocation17_spill]] %s2702_s8 }
   0x9   :  { %2723 = sst [smem:[#allocation18_spill]] %s2704_s10 }
   0xa   :  { %2724 = sst [smem:[#allocation19_spill]] %s2707_s13 }
   0xb   :  { %2725 = sst [smem:[#allocation20_spill]] %s2708_s14 }
   0xc   :  { %2726 = sst [smem:[#allocation21_spill]] %s2709_s15 }
   0xd LB: > { %2727 = sst [smem:[#allocation2_spill]] %s2140_s18  ;;  %s35_s23 = sadd.s32 1, %s2148_s20  ;;  %s2156_s22 = sphi %s2247_s22, %s26_s22   ;;  %s2152_s21 = sphi %s2245_s21, %s2759_s21   ;;  %s2148_s20 = sphi %s2243_s20, %s2758_s20   ;;  %s2144_s19 = sphi %s2241_s19, %s2757_s19   ;;  %s2140_s18 = sphi %s2239_s18, %s2756_s18  }
   0xe   : > { %2728 = sst [smem:[#allocation3_spill]] %s2148_s20  ;;  %s38_s24 = sadd.s32 1, %s2152_s21 }
   0xf   : > { %2729 = sst [smem:[#allocation4_spill]] %s2152_s21  ;;  %p36_p0 = scmp.ge.s32.totalorder %s35_s23, 2 }
  0x10   : > { %2730 = sst [smem:[#allocation5_spill]] %s2156_s22  ;;  %p1928_p1 = scmp.ge.s32.totalorder %s2156_s22, 1 }
  0x11   : > { %p570_p2 = scmp.lt.s32.totalorder %s2156_s22, 5  ;;  %s2761_s23 = smov (%p36_p0, %s35_s23), 0 }
  0x12   : > { %2731 = sst [smem:[#allocation6_spill]] %s2761_s23  ;;  %s2763_s24 = smov (!%p36_p0, %s38_s24), %s2152_s21 }
  0x13   : > { %p571_p3 = pnand %p1928_p1, %p570_p2  ;;  %p40_p4 = scmp.ge.s32.totalorder %s2763_s24, 2 }
  0x15   : > { %s2765_s24 = smov (%p40_p4, %s2763_s24), 0  ;;  %574 = sbr.rel (%p571_p3) target bundleno = 853 (0x355), region = 76 }
  0x16   : > { %2732 = sst [smem:[#allocation7_spill]] %s2765_s24 }
  0x1a   : > { %p676_p5 = scmp.lt.s32.totalorder %s2144_s19, 1  ;;  %p686_p6 = scmp.lt.s32.totalorder %s2140_s18, 1 }
  0x1b   : > { %s2733_s0 = sld [smem:[#allocation10_spill]] }
  0x1c   : > { %s2767_s19 = smov (!%p676_p5, %s2144_s19), 1  ;;  %s2734_s1 = sld [smem:[#allocation11_spill]] }
  0x1d   : > { %s2273_s25 = scalar_select %p686_p6, %s2140_s18, 1 }
  0x1e   : > { %s1998_s26 = sshll.u32 %s2767_s19, 4  ;;  %s2736_s2 = sld [smem:[#allocation12_spill]] }
  0x1f   : > { %s1933_s24 = sshll.u32 %s2273_s25, 3  ;;  %s2000_s19 = sshll.u32 %s2273_s25, 6 }
  0x20   : > { %s2737_s4 = sld [smem:[#allocation14_spill]]  ;;  %s1936_s28 = sshll.u32 %s2273_s25, 1 }
  0x21   : > { %s680_s29 = scalar_lea.vmem %s2733_s0, %s1998_s26  ;;  %s2739_s5 = sld [smem:[#allocation15_spill]] }
  0x22   : > { %s685_s17 = scalar_lea.vmem %s2734_s1, %s1998_s26  ;;  %s2004_s1 = smul.u32 96, %s2273_s25 }
  0x23   : > { %s2741_s8 = sld [smem:[#allocation17_spill]]  ;;  %s2330_s18 = scalar_lea.vmem %s2705_s11, %s1936_s28 }
  0x24   : > { %s2289_s15 = scalar_lea.vmem %s2736_s2, %s1933_s24  ;;  %s2742_s6 = sld [smem:[#allocation16_spill]] }
  0x25   : > { %s2743_s10 = sld [smem:[#allocation18_spill]]  ;;  %s2335_s3 = scalar_lea.vmem %s2706_s12, %s2004_s1 }
  0x26   : > { %s2295_s27 = scalar_lea.vmem %s2737_s4, %s2000_s19 }
  0x27   : > { %2738 = sst [smem:[#allocation8_spill]] %s2295_s27  ;;  %s2301_s0 = scalar_lea.vmem %s2739_s5, %s1936_s28 }
  0x28   : > { %2740 = sst [smem:[#allocation9_spill]] %s2301_s0 }
  0x29   : > { %s2311_s2 = scalar_lea.vmem %s2741_s8, %s1933_s24  ;;  %s2745_s8 = sld [smem:[#allocation20_spill]] }
  0x2a   : > { %s2316_s14 = scalar_lea.vmem %s2742_s6, %s2004_s1  ;;  %s2744_s6 = sld [smem:[#allocation19_spill]] }
  0x2b   : > { %s2325_s0 = scalar_lea.vmem %s2743_s10, %s2000_s19  ;;  %s2746_s10 = sld [smem:[#allocation21_spill]] }
  0x2c   : > { %s2747_s28 = sld [smem:[#allocation2_spill]] }
  0x2f   : > { %s2344_s5 = scalar_lea.vmem %s2745_s8, %s1998_s26 }
  0x30   : > { %s733_s4 = scalar_lea.vmem %s2744_s6, %s2273_s25 }
  0x31   : > { %s2349_s21 = scalar_lea.vmem %s2746_s10, %s1998_s26 }
  0x32   : > { %p1947_p7 = scmp.ne.s32.totalorder %s2747_s28, 0 }
  0x34   : > { %748 = sbr.rel (%p1947_p7) target bundleno = 60 (0x3c), region = 80 }
  0x39   : > { %v749_v0 = vld [vmem:[%s680_s29] sm:$0xff]  ;;  %vm751_vm0 = vcmask 523264   ;;  %v750_v1 = vld [vmem:[%s680_s29 + $0x8] sm:$0xff] }
  0x3a   : > { %v754_v2 = vld [vmem:[%s685_s17] sm:$0xff]  ;;  %752 = vst.msk [vmem:[%s2344_s5] sm:$0xff] %vm751_vm0, %v749_v0  ;;  %753 = vst.msk [vmem:[%s2344_s5 + $0x8] sm:$0xff] %vm751_vm0, %v750_v1  ;;  %v755_v3 = vld [vmem:[%s685_s17 + $0x8] sm:$0xff] }
  0x3b   : > { %756 = vst.msk [vmem:[%s2349_s21] sm:$0xff] %vm751_vm0, %v754_v2  ;;  %757 = vst.msk [vmem:[%s2349_s21 + $0x8] sm:$0xff] %vm751_vm0, %v755_v3 }
  0x3c PF: > { %v802_v7 = vlaneseq  ;;  %v766_v11 = vld [vmem:[%s2289_s15] sm:$0x7f]  ;;  %vm969_vm10 = vcmask 523264   ;;  %s2748_s8 = sld [smem:[#allocation13_spill]]  ;;  %s2750_s20 = scalar_lea.vmem %s2703_s9, %s2273_s25 }
  0x3d   : > { %s2751_s26 = sld [smem:[#allocation8_spill]] }
  0x3e   : > { %v2371_v12 = vshrl.u32 %v802_v7, 7 }
  0x40   : > { %v807_v17 = vsub.s32 3, %v2371_v12  ;;  %vm813_vm1 = vcmp.lt.s32.totalorder %v2371_v12, 3  ;;  %vm816_vm2 = vcmp.ge.s32.totalorder %v2371_v12, 3  ;;  %v2382_v19 = vsub.s32 0, %v2371_v12 }
  0x41   : > { %v758_v4 = vld [vmem:[%s2344_s5] sm:$0xff]  ;;  %v759_v5 = vld [vmem:[%s2344_s5 + $0x8] sm:$0xff]  ;;  %vm838_vm3 = vcmp.lt.s32.totalorder %v2371_v12, 2  ;;  %vm841_vm4 = vcmp.ge.s32.totalorder %v2371_v12, 2  ;;  %v2392_v23 = vsub.s32 1, %v2371_v12  ;;  %vm863_vm5 = vcmp.lt.s32.totalorder %v2371_v12, 1 }
  0x42   : > { %v2359_v6 = vld [vmem:[%s2349_s21] sm:$0xff]  ;;  %v2362_v8 = vld [vmem:[%s2349_s21 + $0x8] sm:$0xff]  ;;  %v808_v21 = vrot.slane %v766_v11, %v807_v17  ;;  %v831_v26 = vrot.slane %v766_v11, %v2382_v19  ;;  %vm866_vm6 = vcmp.ge.s32.totalorder %v2371_v12, 1  ;;  %v880_v33 = vsub.s32 2, %v2371_v12  ;;  %s2749_s10 = scalar_lea.vmem %s2748_s8, %s2273_s25 }
  0x43   : > { %v2365_v9 = vadd.f32 %v2359_v6, %v758_v4  ;;  %v2368_v10 = vadd.f32 %v2362_v8, %v759_v5  ;;  %v856_v30 = vrot.slane %v766_v11, %v2392_v23  ;;  %vm888_vm7 = vcmp.lt.s32.totalorder %v2371_v12, 7  ;;  %v1948_v0 = vld [vmem:[%s2749_s10] ss:$0 sm:$0xff] }
  0x44   : > { %v905_v37 = vsub.s32 4, %v2371_v12  ;;  %v881_v39 = vrot.slane %v766_v11, %v880_v33  ;;  %vm913_vm8 = vcmp.lt.s32.totalorder %v2371_v12, 6  ;;  %v930_v44 = vsub.s32 5, %v2371_v12  ;;  %v1259_v4 = vld [vmem:[%s2311_s2] sm:$0x7f] }
  0x45   : > { %v811_v13 = vrot.slane %v2365_v9, 5  ;;  %v836_v14 = vrot.slane %v2365_v9, 6  ;;  %v861_v15 = vrot.slane %v2365_v9, 7  ;;  %v886_v16 = vrot.slane %v2365_v9, 1 }
  0x46   : > { %v812_v18 = vrot.slane %v2368_v10, 5  ;;  %v837_v20 = vrot.slane %v2368_v10, 6  ;;  %v862_v24 = vrot.slane %v2368_v10, 7  ;;  %v809_v28 = vmul.f32 %v808_v21, %v2365_v9 }
  0x47   : > { %v887_v34 = vrot.slane %v2368_v10, 1  ;;  %v911_v41 = vrot.slane %v2365_v9, 2  ;;  %v906_v42 = vrot.slane %v766_v11, %v905_v37  ;;  %v912_v43 = vrot.slane %v2368_v10, 2 }
  0x48   : > { %v815_v22 = vsel %vm813_vm1, %v812_v18, %v811_v13  ;;  %v840_v27 = vsel %vm838_vm3, %v837_v20, %v836_v14  ;;  %v865_v31 = vsel %vm863_vm5, %v862_v24, %v861_v15  ;;  %v936_v47 = vrot.slane %v2365_v9, 3 }
  0x49   : > { %v826_v25 = vsel %vm816_vm2, %v815_v22, 0.0  ;;  %v851_v29 = vsel %vm841_vm4, %v840_v27, 0.0  ;;  %v876_v36 = vsel %vm866_vm6, %v865_v31, 0.0  ;;  %v889_v40 = vsel %vm888_vm7, %v886_v16, %v887_v34 }
  0x4a   : > { %v832_v32 = vmul.f32 %v831_v26, %v826_v25  ;;  %v857_v35 = vmul.f32 %v856_v30, %v851_v29  ;;  %v882_v46 = vmul.f32 %v881_v39, %v876_v36  ;;  %v937_v48 = vrot.slane %v2368_v10, 3 }
  0x4b   : > { %v907_v49 = vmul.f32 %v906_v42, %v889_v40  ;;  %v914_v50 = vsel %vm913_vm8, %v911_v41, %v912_v43  ;;  %v931_v51 = vrot.slane %v766_v11, %v930_v44  ;;  %vm938_vm9 = vcmp.lt.s32.totalorder %v2371_v12, 5 }
  0x4c   : > { %v834_v38 = vadd.f32 %v832_v32, %v809_v28  ;;  %v939_v53 = vsel %vm938_vm9, %v936_v47, %v937_v48  ;;  %v955_v54 = vsub.s32 6, %v2371_v12  ;;  %v2435_v55 = vadd.s32 8, %v2371_v12 }
  0x4d   : > { %v932_v56 = vmul.f32 %v931_v51, %v914_v50  ;;  %v810_v57 = vmul.f32 %v808_v21, %v2368_v10  ;;  %v814_v58 = vsel %vm813_vm1, %v811_v13, %v812_v18  ;;  %v839_v59 = vsel %vm838_vm3, %v836_v14, %v837_v20 }
  0x4e   : > { %v859_v45 = vadd.f32 %v857_v35, %v834_v38  ;;  %v956_v61 = vrot.slane %v766_v11, %v955_v54  ;;  %v833_v62 = vmul.f32 %v831_v26, %v814_v58  ;;  %v858_v63 = vmul.f32 %v856_v30, %v839_v59 }
  0x4f   : > { %v864_v1 = vsel %vm863_vm5, %v861_v15, %v862_v24  ;;  %v890_v2 = vsel %vm888_vm7, %v887_v34, %v886_v16  ;;  %vm894_vm11 = vcmp.lt.s32.totalorder %v2435_v55, 15  ;;  %v915_v3 = vsel %vm913_vm8, %v912_v43, %v911_v41 }
  0x50   : > { %v884_v52 = vadd.f32 %v882_v46, %v859_v45  ;;  %v957_v7 = vmul.f32 %v956_v61, %v939_v53  ;;  %v835_v11 = vadd.f32 %v833_v62, %v810_v57  ;;  %v883_v13 = vmul.f32 %v881_v39, %v864_v1 }
  0x51   : > { %v902_v14 = vsel %vm894_vm11, %v890_v2, 0.0  ;;  %vm919_vm12 = vcmp.lt.s32.totalorder %v2435_v55, 14  ;;  %v940_v15 = vsel %vm938_vm9, %v937_v48, %v936_v47  ;;  %vm944_vm13 = vcmp.lt.s32.totalorder %v2435_v55, 13 }
  0x52   : > { %v909_v60 = vadd.f32 %v907_v49, %v884_v52  ;;  %v860_v18 = vadd.f32 %v858_v63, %v835_v11  ;;  %v908_v20 = vmul.f32 %v906_v42, %v902_v14  ;;  %v927_v21 = vsel %vm919_vm12, %v915_v3, 0.0 }
  0x53   : > { %v933_v22 = vmul.f32 %v931_v51, %v927_v21  ;;  %v952_v24 = vsel %vm944_vm13, %v940_v15, 0.0  ;;  %v2469_v25 = vadd.f32 %v2365_v9, %v2359_v6  ;;  %v2473_v26 = vadd.f32 %v2368_v10, %v2362_v8 }
  0x54   : > { %v934_v5 = vadd.f32 %v932_v56, %v909_v60  ;;  %v885_v28 = vadd.f32 %v883_v13, %v860_v18  ;;  %v958_v29 = vmul.f32 %v956_v61, %v952_v24  ;;  %v1298_v30 = vrot.slane %v1259_v4, %v807_v17 }
  0x55   : > { %v1301_v31 = vrot.slane %v2469_v25, 5  ;;  %v1302_v32 = vrot.slane %v2473_v26, 5  ;;  %v1310_v34 = vrot.slane %v1259_v4, %v2382_v19  ;;  %v1315_v6 = vrot.slane %v2469_v25, 6 }
  0x56   : > { %v959_v16 = vadd.f32 %v957_v7, %v934_v5  ;;  %v910_v8 = vadd.f32 %v908_v20, %v885_v28  ;;  %v1299_v36 = vmul.f32 %v1298_v30, %v2469_v25  ;;  %v1316_v38 = vrot.slane %v2473_v26, 6 }
  0x57   : > { %v1304_v17 = vsel %vm813_vm1, %v1302_v32, %v1301_v31  ;;  %v1324_v39 = vrot.slane %v1259_v4, %v2392_v23  ;;  %v1329_v40 = vrot.slane %v2469_v25, 7  ;;  %v1330_v41 = vrot.slane %v2473_v26, 7 }
  0x58   : > { %v2475_v27 = vadd.f32 %v1948_v0, %v959_v16  ;;  %v935_v42 = vadd.f32 %v933_v22, %v910_v8  ;;  %v1305_v43 = vsel %vm816_vm2, %v1304_v17, 0.0  ;;  %v1318_v45 = vsel %vm838_vm3, %v1316_v38, %v1315_v6 }
  0x59   : > { %v1338_v46 = vrot.slane %v1259_v4, %v880_v33  ;;  %v1311_v47 = vmul.f32 %v1310_v34, %v1305_v43  ;;  %v1319_v48 = vsel %vm841_vm4, %v1318_v45, 0.0  ;;  %v1332_v49 = vsel %vm863_vm5, %v1330_v41, %v1329_v40 }
  0x5a   : > { %v970_v35 = vsel %vm969_vm10, %v2475_v27, 0.0  ;;  %v1343_v50 = vrot.slane %v2469_v25, 1  ;;  %v960_v51 = vadd.f32 %v958_v29, %v935_v42  ;;  %v1325_v52 = vmul.f32 %v1324_v39, %v1319_v48 }
  0x5b   : > { %971 = vadd.xlane.f32.xlu0 %v970_v35  ;;  %v1333_v53 = vsel %vm866_vm6, %v1332_v49, 0.0  ;;  %v1344_v56 = vrot.slane %v2473_v26, 1  ;;  %v1313_v57 = vadd.f32 %v1311_v47, %v1299_v36  ;;  %v1352_v33 = vrot.slane %v1259_v4, %v905_v37 }
  0x5c   : > { %v1339_v58 = vmul.f32 %v1338_v46, %v1333_v53  ;;  %v1357_v59 = vrot.slane %v2469_v25, 2  ;;  %v968_v60 = vadd.f32 %v1948_v0, %v960_v51  ;;  %v1358_v62 = vrot.slane %v2473_v26, 2 }
  0x5d   : > { %v1345_v61 = vsel %vm888_vm7, %v1343_v50, %v1344_v56  ;;  %v1366_v63 = vrot.slane %v1259_v4, %v930_v44  ;;  %v1327_v1 = vadd.f32 %v1325_v52, %v1313_v57  ;;  %v1371_v3 = vrot.slane %v2469_v25, 3 }
  0x5e   : > { %v1353_v2 = vmul.f32 %v1352_v33, %v1345_v61  ;;  %v1372_v5 = vrot.slane %v2473_v26, 3  ;;  %v973_v7 = vsel %vm969_vm10, %v968_v60, 0.0  ;;  %v1359_v37 = vsel %vm913_vm8, %v1357_v59, %v1358_v62 }
  0x5f   : > { %v1380_v0 = vrot.slane %v1259_v4, %v955_v54  ;;  %v1300_v11 = vmul.f32 %v1298_v30, %v2473_v26  ;;  %974 = vadd.xlane.f32.xlu0 %v973_v7  ;;  %v1341_v13 = vadd.f32 %v1339_v58, %v1327_v1  ;;  %v1367_v14 = vmul.f32 %v1366_v63, %v1359_v37  ;;  %v2048_v7 = vld [vmem:[%s2751_s26 + $0x30] ss:$8 sps:$4 sm:$0xff]   ;;  %v2049_v37 = vld [vmem:[%s2751_s26 + $0x24] ss:$8 sps:$4 sm:$0xff]  }
  0x60   : > { %v1373_v44 = vsel %vm938_vm9, %v1371_v3, %v1372_v5  ;;  %v1303_v15 = vsel %vm813_vm1, %v1301_v31, %v1302_v32  ;;  %v1317_v20 = vsel %vm838_vm3, %v1315_v6, %v1316_v38  ;;  %v1331_v54 = vsel %vm863_vm5, %v1329_v40, %v1330_v41  ;;  %v1972_v6 = vld [vmem:[%s2750_s20] ss:$0 sm:$0xff] }
  0x61   : > { %v1381_v16 = vmul.f32 %v1380_v0, %v1373_v44  ;;  %v1312_v18 = vmul.f32 %v1310_v34, %v1303_v15  ;;  %v1355_v4 = vadd.f32 %v1353_v2, %v1341_v13  ;;  %v1326_v21 = vmul.f32 %v1324_v39, %v1317_v20  ;;  %v2054_v13 = vld [vmem:[%s2325_s0 + $0x30] ss:$8 sps:$4 sm:$0xff]   ;;  %v2057_v44 = vld [vmem:[%s2325_s0 + $0x24] ss:$8 sps:$4 sm:$0xff]   ;;  %v2063_v20 = vld [vmem:[%s2325_s0 + $0x14] ss:$8 sps:$4 sm:$0xff]  }
  0x62   : > { %v1340_v22 = vmul.f32 %v1338_v46, %v1331_v54  ;;  %v1346_v24 = vsel %vm888_vm7, %v1344_v56, %v1343_v50  ;;  %v1360_v30 = vsel %vm913_vm8, %v1358_v62, %v1357_v59  ;;  %v1374_v31 = vsel %vm938_vm9, %v1372_v5, %v1371_v3  ;;  %v2046_v5 = vld [vmem:[%s2751_s26 + $0x34] ss:$8 sps:$4 sm:$0xff]   ;;  %v2059_v15 = vld [vmem:[%s2751_s26 + $0x10] ss:$8 sps:$4 sm:$0xff]  }
  0x63   : > { %v1314_v28 = vadd.f32 %v1312_v18, %v1300_v11  ;;  %v1348_v29 = vsel %vm894_vm11, %v1346_v24, 0.0  ;;  %v1369_v32 = vadd.f32 %v1367_v14, %v1355_v4  ;;  %v1362_v34 = vsel %vm919_vm12, %v1360_v30, 0.0  ;;  %1060 = vmatprep.subr.bf16.mxu1 %v2046_v5  ;;  %v2053_v11 = vld [vmem:[%s2751_s26 + $0x20] ss:$8 sps:$4 sm:$0xff]   ;;  %v2055_v14 = vld [vmem:[%s2751_s26 + $0x14] ss:$8 sps:$4 sm:$0xff]  }
  0x64   : > { %v1354_v8 = vmul.f32 %v1352_v33, %v1348_v29  ;;  %v1376_v38 = vsel %vm944_vm13, %v1374_v31, 0.0  ;;  %v1368_v39 = vmul.f32 %v1366_v63, %v1362_v34  ;;  %1061 = vmatpush1.bf16.msra.mxu1 %v2048_v7  ;;  %v2061_v18 = vld [vmem:[%s2751_s26 + $0x4] ss:$8 sps:$4 sm:$0xff]   ;;  %v2158_v54 = vmov 0   ;;  %v2065_v4 = vld [vmem:[%s2751_s26] ss:$8 sps:$4 sm:$0xff]  }
  0x65   : > { %v1328_v35 = vadd.f32 %v1326_v21, %v1314_v28  ;;  %v1383_v36 = vadd.f32 %v1381_v16, %v1369_v32  ;;  %v1382_v41 = vmul.f32 %v1380_v0, %v1376_v38  ;;  %v2051_v0 = vld [vmem:[%s2325_s0 + $0x34] ss:$8 sps:$4 sm:$0xff]   ;;  %1062 = vmatprep.subr.bf16.mxu1 %v2049_v37  ;;  %v2060_v16 = vld [vmem:[%s2325_s0 + $0x20] ss:$8 sps:$4 sm:$0xff]   ;;  %1084 = vmatprep.mubr.bf16.mxu1 %v2158_v54  ;;  %v2066_v21 = vld [vmem:[%s2325_s0 + $0x10] ss:$8 sps:$4 sm:$0xff]  }
  0x66   : > { %1482 = vmatprep.subr.bf16.mxu0 %v2051_v0  ;;  %1506 = vmatprep.mubr.bf16.mxu0 %v2158_v54  ;;  %v2069_v24 = vld [vmem:[%s2325_s0] ss:$8 sps:$4 sm:$0xff]   ;;  %v2090_v7 = vld [vmem:[%s2335_s3 + $0x50] sm:$0xff]  }
  0x67   : > { %v1342_v17 = vadd.f32 %v1340_v22, %v1328_v35  ;;  %v1391_v40 = vadd.f32 %v1972_v6, %v1383_v36  ;;  %1483 = vmatpush1.bf16.msra.mxu0 %v2054_v13  ;;  %v2067_v22 = vld [vmem:[%s2325_s0 + $0x4] ss:$8 sps:$4 sm:$0xff]   ;;  %s2752_s0 = sld [smem:[#allocation9_spill]] }
  0x68   : > { %1063 = vmatpush1.bf16.msra.mxu1 %v2053_v11  ;;  %1484 = vmatprep.subr.bf16.mxu0 %v2057_v44  ;;  %v2089_v5 = vld [vmem:[%s2316_s14 + $0x48] sm:$0xff]   ;;  %v2091_v37 = vld [vmem:[%s2316_s14 + $0x40] sm:$0xff]  }
  0x69   : > { %v1356_v12 = vadd.f32 %v1354_v8, %v1342_v17  ;;  %v1393_v42 = vsel %vm969_vm10, %v1391_v40, 0.0  ;;  %1064 = vmatprep.subr.bf16.mxu1 %v2055_v14  ;;  %v2092_v0 = vld [vmem:[%s2335_s3 + $0x48] sm:$0xff]   ;;  %v2093_v11 = vld [vmem:[%s2335_s3 + $0x40] sm:$0xff]  }
  0x6a   : > { %1394 = vadd.xlane.f32.xlu1 %v1393_v42 }
  0x6b   : > { %v1370_v43 = vadd.f32 %v1368_v39, %v1356_v12  ;;  %1485 = vmatpush1.bf16.msra.mxu0 %v2060_v16 }
  0x6c   : > { %1065 = vmatpush1.bf16.msra.mxu1 %v2059_v15  ;;  %1486 = vmatprep.subr.bf16.mxu0 %v2063_v20 }
  0x6d   : > { %v1384_v45 = vadd.f32 %v1382_v41, %v1370_v43  ;;  %1066 = vmatprep.subr.bf16.mxu1 %v2061_v18  ;;  %v2070_v41 = vld [vmem:[%s2316_s14 + $0x38] sm:$0xff]   ;;  %v776_v13 = vld [vmem:[%s2752_s0] sm:$0x3] }
  0x6e   : > { %v1002_v14 = vrot.slane %v776_v13, %v2382_v19  ;;  %v1006_v44 = vrot.slane %v776_v13, %v2392_v23 }
  0x6f   : > { %v1392_v46 = vadd.f32 %v1972_v6, %v1384_v45  ;;  %1487 = vmatpush1.bf16.msra.mxu0 %v2066_v21  ;;  %v2071_v45 = vld [vmem:[%s2316_s14 + $0x30] sm:$0xff]  }
  0x70   : > { %1067 = vmatpush1.bf16.msra.mxu1 %v2065_v4  ;;  %1488 = vmatprep.subr.bf16.mxu0 %v2067_v22 }
  0x71   : > { %v1396_v47 = vsel %vm969_vm10, %v1392_v46, 0.0  ;;  %1214 = vmatprep.subr.bf16.mxu1 %v2158_v54 }
  0x72   : > { %1397 = vadd.xlane.f32.xlu1 %v1396_v47 }
  0x73   : > { %1489 = vmatpush1.bf16.msra.mxu0 %v2069_v24 }
  0x74   : > { %1636 = vmatprep.subr.bf16.mxu0 %v2158_v54 }
  0xe4   : > { %v972_v48 = vpop.xlane.xlu0 %971 }
  0xe5   : > { %v977_v49 = vmul.f32 0.015625, %v972_v48 }
  0xe7   : > { %v2550_v50 = vsub.f32 %v2475_v27, %v977_v49 }
  0xe8   : > { %v975_v52 = vpop.xlane.xlu0 %974 }
  0xe9   : > { %v981_v55 = vmul.f32 %v2550_v50, %v2550_v50  ;;  %v978_v53 = vmul.f32 0.015625, %v975_v52  ;;  %v2074_v52 = vld [vmem:[%s2335_s3 + $0x30] sm:$0xff]  }
  0xeb   : > { %v983_v51 = vsel %vm969_vm10, %v981_v55, 0.0  ;;  %v2555_v56 = vsub.f32 %v968_v60, %v978_v53  ;;  %v2075_v53 = vld [vmem:[%s2316_s14 + $0x20] sm:$0xff]  }
  0xec   : > { %984 = vadd.xlane.f32.xlu0 %v983_v51  ;;  %v2073_v51 = vld [vmem:[%s2316_s14 + $0x28] sm:$0xff]  }
  0xed   : > { %v982_v57 = vmul.f32 %v2555_v56, %v2555_v56 }
  0xef   : > { %v986_v58 = vsel %vm969_vm10, %v982_v57, 0.0  ;;  %v2077_v57 = vld [vmem:[%s2316_s14 + $0x18] sm:$0xff]  }
  0xf0   : > { %987 = vadd.xlane.f32.xlu1 %v986_v58  ;;  %v2078_v58 = vld [vmem:[%s2335_s3 + $0x20] sm:$0xff]  }
  0xf3   : > { %v1395_v27 = vpop.xlane.xlu1 %1394 }
  0xf4   : > { %v1399_v33 = vmul.f32 0.015625, %v1395_v27  ;;  %v2079_v27 = vld [vmem:[%s2316_s14 + $0x10] sm:$0xff]  }
  0xf6   : > { %v2560_v59 = vsub.f32 %v1391_v40, %v1399_v33  ;;  %v2080_v33 = vld [vmem:[%s2335_s3 + $0x18] sm:$0xff]  }
  0xf8   : > { %v1403_v61 = vmul.f32 %v2560_v59, %v2560_v59 }
  0xfa   : > { %v1405_v62 = vsel %vm969_vm10, %v1403_v61, 0.0  ;;  %v2082_v61 = vld [vmem:[%s2335_s3 + $0x10] sm:$0xff]  }
  0xfb   : > { %v1398_v60 = vpop.xlane.xlu1 %1397  ;;  %1406 = vadd.xlane.f32.xlu0 %v1405_v62  ;;  %v2084_v62 = vld [vmem:[%s2335_s3 + $0x8] sm:$0xff]  }
  0xfc   : > { %v1400_v63 = vmul.f32 0.015625, %v1398_v60  ;;  %v2083_v60 = vld [vmem:[%s2316_s14] sm:$0xff]  }
  0xfe   : > { %v2565_v1 = vsub.f32 %v1392_v46, %v1400_v63  ;;  %v2085_v63 = vld [vmem:[%s2316_s14 + $0x58] sm:$0xff]  }
 0x100   : > { %v1404_v2 = vmul.f32 %v2565_v1, %v2565_v1 }
 0x102   : > { %v1408_v3 = vsel %vm969_vm10, %v1404_v2, 0.0  ;;  %v2087_v2 = vld [vmem:[%s2316_s14 + $0x50] sm:$0xff]  }
 0x103   : > { %1409 = vadd.xlane.f32.xlu1 %v1408_v3  ;;  %v2088_v3 = vld [vmem:[%s2335_s3 + $0x58] sm:$0xff]  }
 0x175   : > { %v985_v28 = vpop.xlane.xlu0 %984 }
 0x176   : > { %v989_v29 = vmul.f32 0.015625, %v985_v28 }
 0x178   : > { %v991_v30 = vadd.f32 1e-06, %v989_v29 }
 0x179   : > { %v988_v31 = vpop.xlane.xlu1 %987 }
 0x17a   : > { %v990_v32 = vmul.f32 0.015625, %v988_v31  ;;  %2094 = vrsqrt.f32 %v991_v30 }
 0x17c   : > { %v992_v34 = vadd.f32 1e-06, %v990_v32 }
 0x17e   : > { %2096 = vrsqrt.f32 %v992_v34 }
 0x184   : > { %v1407_v6 = vpop.xlane.xlu0 %1406 }
 0x185   : > { %v1411_v35 = vmul.f32 0.015625, %v1407_v6 }
 0x187   : > { %v2095_v8 = vpop.eup %2094  ;;  %v1413_v36 = vadd.f32 1e-06, %v1411_v35 }
 0x188   : > { %v995_v40 = vmul.f32 %v2095_v8, %v2550_v50  ;;  %v2072_v50 = vld [vmem:[%s2335_s3 + $0x38] sm:$0xff]  }
 0x189   : > { %2098 = vrsqrt.f32 %v1413_v36 }
 0x18b   : > { %v2097_v38 = vpop.eup %2096 }
 0x18c   : > { %v1410_v17 = vpop.xlane.xlu1 %1409  ;;  %v996_v12 = vmul.f32 %v2097_v38, %v2555_v56  ;;  %v2076_v56 = vld [vmem:[%s2335_s3 + $0x28] sm:$0xff]  }
 0x18d   : > { %v1412_v39 = vmul.f32 0.015625, %v1410_v17 }
 0x18e   : > { %v997_v43 = vpack.c.bf16 %v996_v12, %v995_v40  ;;  %v1269_v40 = vld [vmem:[%s2330_s18] sm:$0x3] }
 0x18f   : > { %v1414_v42 = vadd.f32 1e-06, %v1412_v39 }
 0x190   : > { %1957 = vmatmul.mubr.msk.bf16.vlgmr.msra.gmra.mxu1 %vm969_vm10, %v997_v43 }
 0x191   : > { %2100 = vrsqrt.f32 %v1414_v42  ;;  %1215 = vmatpush1.bf16.msra.mxu1 %v2070_v41 }
 0x192   : > { %1216 = vmatprep.subr.bf16.mxu1 %v2158_v54 }
 0x195   : > { %1217 = vmatpush1.bf16.msra.mxu1 %v2071_v45  ;;  %v1424_v45 = vrot.slane %v1269_v40, %v2382_v19 }
 0x196   : > { %1218 = vmatprep.subr.bf16.mxu1 %v2158_v54  ;;  %v2099_v46 = vpop.eup %2098 }
 0x197   : > { %v1417_v48 = vmul.f32 %v2099_v46, %v2560_v59  ;;  %v2081_v59 = vld [vmem:[%s2316_s14 + $0x8] sm:$0xff]   ;;  %s2753_s14 = scalar_lea.vmem %s2701_s7, %s2273_s25 }
 0x199   : > { %1219 = vmatpush1.bf16.msra.mxu1 %v2073_v51 }
 0x19a   : > { %1220 = vmatprep.subr.bf16.mxu1 %v2158_v54 }
 0x19d   : > { %1221 = vmatpush1.bf16.msra.mxu1 %v2075_v53 }
 0x19e   : > { %v2101_v47 = vpop.eup %2100  ;;  %1222 = vmatprep.subr.bf16.mxu1 %v2158_v54 }
 0x19f   : > { %v1418_v49 = vmul.f32 %v2101_v47, %v2565_v1  ;;  %v2086_v1 = vld [vmem:[%s2335_s3] sm:$0xff]  }
 0x1a1   : > { %v1419_v55 = vpack.c.bf16 %v1418_v49, %v1417_v48  ;;  %1223 = vmatpush1.bf16.msra.mxu1 %v2077_v57  ;;  %v1428_v48 = vrot.slane %v1269_v40, %v2392_v23 }
 0x1a2   : > { %1224 = vmatprep.subr.bf16.mxu1 %v2158_v54 }
 0x1a3   : > { %1981 = vmatmul.mubr.msk.bf16.vlgmr.msra.gmra.mxu0 %vm969_vm10, %v1419_v55 }
 0x1a4   : > { %1637 = vmatpush1.bf16.msra.mxu0 %v2072_v50 }
 0x1a5   : > { %1638 = vmatprep.subr.bf16.mxu0 %v2158_v54  ;;  %1225 = vmatpush1.bf16.msra.mxu1 %v2079_v27 }
 0x1a6   : > { %1226 = vmatprep.subr.bf16.mxu1 %v2158_v54 }
 0x1a8   : > { %1639 = vmatpush1.bf16.msra.mxu0 %v2074_v52 }
 0x1a9   : > { %1640 = vmatprep.subr.bf16.mxu0 %v2158_v54  ;;  %1227 = vmatpush1.bf16.msra.mxu1 %v2081_v59 }
 0x1aa   : > { %1228 = vmatprep.subr.bf16.mxu1 %v2158_v54 }
 0x1ac   : > { %1641 = vmatpush1.bf16.msra.mxu0 %v2076_v56 }
 0x1ad   : > { %1642 = vmatprep.subr.bf16.mxu0 %v2158_v54  ;;  %1229 = vmatpush1.bf16.msra.mxu1 %v2083_v60 }
 0x1ae   : > { %1238 = vmatprep.subr.bf16.mxu1 %v2158_v54 }
 0x1b0   : > { %1643 = vmatpush1.bf16.msra.mxu0 %v2078_v58 }
 0x1b1   : > { %1644 = vmatprep.subr.bf16.mxu0 %v2158_v54  ;;  %1239 = vmatpush2.bf16.msra.mxu1 %v2085_v63 }
 0x1b2   : > { %1240 = vmatprep.subr.bf16.mxu1 %v2158_v54 }
 0x1b4   : > { %1645 = vmatpush1.bf16.msra.mxu0 %v2080_v33 }
 0x1b5   : > { %1646 = vmatprep.subr.bf16.mxu0 %v2158_v54  ;;  %1241 = vmatpush2.bf16.msra.mxu1 %v2087_v2 }
 0x1b6   : > { %1242 = vmatprep.subr.bf16.mxu1 %v2158_v54 }
 0x1b8   : > { %1647 = vmatpush1.bf16.msra.mxu0 %v2082_v61 }
 0x1b9   : > { %1648 = vmatprep.subr.bf16.mxu0 %v2158_v54  ;;  %1243 = vmatpush2.bf16.msra.mxu1 %v2089_v5 }
 0x1ba   : > { %1244 = vmatprep.subr.bf16.mxu1 %v2158_v54 }
 0x1bc   : > { %1649 = vmatpush1.bf16.msra.mxu0 %v2084_v62 }
 0x1bd   : > { %1650 = vmatprep.subr.bf16.mxu0 %v2158_v54  ;;  %1245 = vmatpush2.bf16.msra.mxu1 %v2091_v37 }
 0x1c0   : > { %1651 = vmatpush1.bf16.msra.mxu0 %v2086_v1 }
 0x1c1   : > { %1660 = vmatprep.subr.bf16.mxu0 %v2158_v54 }
 0x1c4   : > { %1661 = vmatpush2.bf16.msra.mxu0 %v2088_v3 }
 0x1c5   : > { %1662 = vmatprep.subr.bf16.mxu0 %v2158_v54 }
 0x1c8   : > { %1663 = vmatpush2.bf16.msra.mxu0 %v2090_v7 }
 0x1c9   : > { %1664 = vmatprep.subr.bf16.mxu0 %v2158_v54 }
 0x1cc   : > { %1665 = vmatpush2.bf16.msra.mxu0 %v2092_v0 }
 0x1cd   : > { %1666 = vmatprep.subr.bf16.mxu0 %v2158_v54 }
 0x1d0   : > { %1667 = vmatpush2.bf16.msra.mxu0 %v2093_v11 }
 0x250   : > { %v1086_v15 = vpop.f32.mrf.mxu1 }
 0x251   : > { %v2645_v16 = vadd.f32 %v1086_v15, %v1002_v14 }
 0x252   : > { %v1088_v18 = vpop.f32.mrf.mxu1 }
 0x253   : > { %v1099_v20 = vmul.f32 0.044715, %v2645_v16  ;;  %v1089_v4 = vadd.f32 %v1088_v18, %v1006_v44 }
 0x254   : > { %v1090_v21 = vpop.f32.mrf.mxu1 }
 0x255   : > { %v1103_v22 = vmul.f32 %v1099_v20, %v2645_v16  ;;  %v1100_v24 = vmul.f32 0.044715, %v1089_v4  ;;  %v1091_v28 = vadd.f32 %v1090_v21, %v1002_v14  ;;  %v1096_v11 = vmul.f32 0.5, %v1089_v4 }
 0x256   : > { %v1092_v54 = vpop.f32.mrf.mxu1 }
 0x257   : > { %v1107_v29 = vmul.f32 %v1103_v22, %v2645_v16  ;;  %v1104_v30 = vmul.f32 %v1100_v24, %v1089_v4  ;;  %v1101_v31 = vmul.f32 0.044715, %v1091_v28  ;;  %v1093_v32 = vadd.f32 %v1092_v54, %v1006_v44 }
 0x258   : > { %v1097_v21 = vmul.f32 0.5, %v1091_v28 }
 0x259   : > { %v1111_v34 = vadd.f32 %v1107_v29, %v2645_v16  ;;  %v1108_v6 = vmul.f32 %v1104_v30, %v1089_v4  ;;  %v1105_v35 = vmul.f32 %v1101_v31, %v1091_v28  ;;  %v1102_v8 = vmul.f32 0.044715, %v1093_v32 }
 0x25a   : > { %v1098_v20 = vmul.f32 0.5, %v1093_v32  ;;  %v1095_v31 = vmul.f32 0.5, %v2645_v16 }
 0x25b   : > { %v1112_v36 = vadd.f32 %v1108_v6, %v1089_v4  ;;  %v1109_v38 = vmul.f32 %v1105_v35, %v1091_v28  ;;  %v1106_v17 = vmul.f32 %v1102_v8, %v1093_v32  ;;  %v1115_v39 = vmul.f32 0.7978846, %v1111_v34 }
 0x25d   : > { %v1116_v12 = vmul.f32 0.7978846, %v1112_v36  ;;  %v1113_v41 = vadd.f32 %v1109_v38, %v1091_v28  ;;  %v1110_v42 = vmul.f32 %v1106_v17, %v1093_v32 }
 0x25f   : > { %2102 = vtanh.f32 %v1116_v12  ;;  %v1117_v43 = vmul.f32 0.7978846, %v1113_v41  ;;  %v1114_v46 = vadd.f32 %v1110_v42, %v1093_v32 }
 0x260   : > { %2104 = vtanh.f32 %v1115_v39 }
 0x261   : > { %2106 = vtanh.f32 %v1117_v43  ;;  %v1118_v47 = vmul.f32 0.7978846, %v1114_v46 }
 0x263   : > { %v1508_v49 = vpop.f32.mrf.mxu0  ;;  %2108 = vtanh.f32 %v1118_v47 }
 0x264   : > { %v1509_v50 = vadd.f32 %v1508_v49, %v1424_v45 }
 0x265   : > { %v1510_v55 = vpop.f32.mrf.mxu0 }
 0x266   : > { %v1521_v51 = vmul.f32 0.044715, %v1509_v50  ;;  %v1511_v52 = vadd.f32 %v1510_v55, %v1428_v48  ;;  %v1517_v46 = vmul.f32 0.5, %v1509_v50 }
 0x267   : > { %v1512_v53 = vpop.f32.mrf.mxu0 }
 0x268   : > { %v1525_v56 = vmul.f32 %v1521_v51, %v1509_v50  ;;  %v1522_v57 = vmul.f32 0.044715, %v1511_v52  ;;  %v1513_v58 = vadd.f32 %v1512_v53, %v1424_v45  ;;  %v1518_v42 = vmul.f32 0.5, %v1511_v52 }
 0x269   : > { %v1514_v27 = vpop.f32.mrf.mxu0 }
 0x26a   : > { %v1529_v33 = vmul.f32 %v1525_v56, %v1509_v50  ;;  %v1526_v59 = vmul.f32 %v1522_v57, %v1511_v52  ;;  %v1523_v19 = vmul.f32 0.044715, %v1513_v58  ;;  %v1515_v61 = vadd.f32 %v1514_v27, %v1428_v48 }
 0x26b   : > { %v1519_v16 = vmul.f32 0.5, %v1513_v58 }
 0x26c   : > { %v1533_v60 = vadd.f32 %v1529_v33, %v1509_v50  ;;  %v1530_v62 = vmul.f32 %v1526_v59, %v1511_v52  ;;  %v1527_v63 = vmul.f32 %v1523_v19, %v1513_v58  ;;  %v1524_v1 = vmul.f32 0.044715, %v1515_v61  ;;  %v2103_v23 = vpop.eup %2102 }
 0x26d   : > { %v2105_v2 = vpop.eup %2104  ;;  %v1124_v15 = vadd.f32 1.0, %v2103_v23  ;;  %v1520_v43 = vmul.f32 0.5, %v1515_v61 }
 0x26e   : > { %v1534_v3 = vadd.f32 %v1530_v62, %v1511_v52  ;;  %v1531_v5 = vmul.f32 %v1527_v63, %v1513_v58  ;;  %v1528_v7 = vmul.f32 %v1524_v1, %v1515_v61  ;;  %v2107_v37 = vpop.eup %2106  ;;  %v1537_v0 = vmul.f32 0.7978846, %v1533_v60  ;;  %v1958_v52 = vld [vmem:[%s2753_s14] ss:$0 sm:$0xff] }
 0x26f   : > { %v1123_v22 = vadd.f32 1.0, %v2105_v2  ;;  %v1125_v24 = vadd.f32 1.0, %v2107_v37  ;;  %v1128_v4 = vmul.f32 %v1124_v15, %v1096_v11 }
 0x270   : > { %v1538_v13 = vmul.f32 0.7978846, %v1534_v3  ;;  %v1535_v14 = vadd.f32 %v1531_v5, %v1513_v58  ;;  %v1532_v44 = vmul.f32 %v1528_v7, %v1515_v61  ;;  %v2109_v18 = vpop.eup %2108 }
 0x271   : > { %v1126_v30 = vadd.f32 1.0, %v2109_v18  ;;  %v1129_v34 = vmul.f32 %v1125_v24, %v1097_v21  ;;  %v1127_v8 = vmul.f32 %v1123_v22, %v1095_v31 }
 0x272   : > { %2110 = vtanh.f32 %v1538_v13  ;;  %v1539_v54 = vmul.f32 0.7978846, %v1535_v14  ;;  %v1536_v29 = vadd.f32 %v1532_v44, %v1515_v61  ;;  %v1982_v61 = vld [vmem:[%s733_s4] ss:$0 sm:$0xff] }
 0x273   : > { %2112 = vtanh.f32 %v1537_v0  ;;  %v1130_v35 = vmul.f32 %v1126_v30, %v1098_v20  ;;  %v1131_v38 = vpack.c.bf16 %v1129_v34, %v1127_v8 }
 0x274   : > { %2114 = vtanh.f32 %v1539_v54  ;;  %v1540_v6 = vmul.f32 0.7978846, %v1536_v29 }
 0x275   : > { %v1132_v36 = vpack.c.bf16 %v1130_v35, %v1128_v4 }
 0x276   : > { %2116 = vtanh.f32 %v1540_v6 }
 0x277   : > { %1971 = vmatprep.mubr.msk.bf16.mxu1 %vm969_vm10, %v1132_v36 }
 0x278   : > { %1247 = vmatmul.mubr.bf16.vlgmr.msra.gmra.mxu1 %v1131_v38 }
 0x27f   : > { %v2111_v28 = vpop.eup %2110 }
 0x280   : > { %v2113_v32 = vpop.eup %2112  ;;  %v1546_v39 = vadd.f32 1.0, %v2111_v28 }
 0x281   : > { %v2115_v17 = vpop.eup %2114  ;;  %v1545_v41 = vadd.f32 1.0, %v2113_v32 }
 0x282   : > { %v1547_v40 = vadd.f32 1.0, %v2115_v17  ;;  %v1550_v48 = vmul.f32 %v1546_v39, %v1518_v42 }
 0x283   : > { %v2117_v12 = vpop.eup %2116  ;;  %v1549_v55 = vmul.f32 %v1545_v41, %v1517_v46 }
 0x284   : > { %v1548_v45 = vadd.f32 1.0, %v2117_v12  ;;  %v1551_v47 = vmul.f32 %v1547_v40, %v1519_v16 }
 0x286   : > { %v1552_v49 = vmul.f32 %v1548_v45, %v1520_v43  ;;  %v1553_v53 = vpack.c.bf16 %v1551_v47, %v1549_v55 }
 0x288   : > { %v1554_v51 = vpack.c.bf16 %v1552_v49, %v1550_v48 }
 0x28a   : > { %1995 = vmatprep.mubr.msk.bf16.mxu0 %vm969_vm10, %v1554_v51 }
 0x28b   : > { %1669 = vmatmul.mubr.bf16.vlgmr.msra.gmra.mxu0 %v1553_v53 }
 0x338   : > { %v1248_v56 = vpop.f32.mrf.mxu1 }
 0x339   : > { %v1249_v57 = vadd.f32 %v1958_v52, %v1248_v56 }
 0x33a   : > { %v1250_v50 = vpop.f32.mrf.mxu1 }
 0x33b   : > { %v1255_v58 = vadd.f32 %v1249_v57, %v2365_v9 }
 0x33c   : > { %v1251_v27 = vpop.f32.mrf.mxu1 }
 0x33d   : > { %1257 = vst.msk [vmem:[%s2344_s5] sm:$0xff] %vm969_vm10, %v1255_v58  ;;  %v1252_v33 = vadd.f32 %v1958_v52, %v1251_v27 }
 0x33e   : > { %v1253_v59 = vpop.f32.mrf.mxu1 }
 0x33f   : > { %v1256_v19 = vadd.f32 %v1252_v33, %v2368_v10 }
 0x341   : > { %1258 = vst.msk [vmem:[%s2344_s5 + $0x8] sm:$0xff] %vm969_vm10, %v1256_v19 }
 0x34b   : > { %v1670_v60 = vpop.f32.mrf.mxu0 }
 0x34c   : > { %v1671_v62 = vadd.f32 %v1982_v61, %v1670_v60 }
 0x34d   : > { %v1672_v63 = vpop.f32.mrf.mxu0 }
 0x34e   : > { %v1677_v9 = vadd.f32 %v1671_v62, %v2469_v25 }
 0x34f   : > { %v1673_v1 = vpop.f32.mrf.mxu0 }
 0x350   : > { %1679 = vst.msk [vmem:[%s2349_s21] sm:$0xff] %vm969_vm10, %v1677_v9  ;;  %v1674_v23 = vadd.f32 %v1982_v61, %v1673_v1 }
 0x351   : > { %v1675_v2 = vpop.f32.mrf.mxu0 }
 0x352   : > { %v1678_v3 = vadd.f32 %v1674_v23, %v2473_v26 }
 0x354   : > { %1680 = vst.msk [vmem:[%s2349_s21 + $0x8] sm:$0xff] %vm969_vm10, %v1678_v3 }
 0x355 PF: > { %s2755_s24 = sld [smem:[#allocation5_spill]] }
 0x356   : > { %s2756_s18 = sld [smem:[#allocation3_spill]] }
 0x357   : > { %s2757_s19 = sld [smem:[#allocation4_spill]] }
 0x358   : > { %s2758_s20 = sld [smem:[#allocation6_spill]] }
 0x359   : > { %s2759_s21 = sld [smem:[#allocation7_spill]] }
 0x35b   : > { %s26_s22 = sadd.s32 1, %s2755_s24  }
 0x35c   : > { %p23_p8 = scmp.ge.s32.totalorder %s26_s22, 6  }
 0x35e   :  { %25 = sbr.rel (!%p23_p8) target bundleno = 13 (0xd), region = 161 }

</bundles_post_ra>
